<compile_context>
chip_gen: v7x
topology: tpu7x:2x2x1
jax: 0.10.0
libtpu: 0.0.40
codegen_flags: <defaults>
</compile_context>

<pallas_src>
import jax
import jax.numpy as jnp
from jax.experimental import pallas as pl
from jax.experimental.pallas import tpu as pltpu


# ----------------------------------------------------------------------------
# Fused Pallas kernel (one grid step per batch element)
# ----------------------------------------------------------------------------
def _make_kernel(*, patch, mid, channels, in_pg, q_groups, k_groups, v_groups,
                 compute_dtype, has_mask):
    P, M, C = patch, mid, channels

    def body(cond_ref, x_ref, wq_ref, bq_ref, wk_ref, bk_ref, wv_ref, bv_ref,
             wout_ref, bout_ref, mask_ref, out_ref):
        W = out_ref.shape[1]
        cond = cond_ref[0]          # (W+4, P*C), activation dtype (no f32 cast)
        x = x_ref[0]

        # Weights are tiny: load each once and slice statically.
        wq_all = wq_ref[...]        # (5, nseg, in_pg, segw)
        wk_all = wk_ref[...]
        wv_all = wv_ref[...]

        # Grouped (5,1) conv == per-tap / per-group accumulated matmuls on the
        # word-halo'd activations; no im2col copies, no zero-block weights.
        def project(a, w_all, bias, seg_groups):
            blocks = []
            for p in range(P):
                segs = []
                for s, g in enumerate(seg_groups):
                    lo = p * C + g * in_pg
                    acc = jnp.dot(a[0:W, lo:lo + in_pg], w_all[0, s],
                                  preferred_element_type=jnp.float32)
                    for t in range(1, 5):
                        acc = acc + jnp.dot(a[t:t + W, lo:lo + in_pg],
                                            w_all[t, s],
                                            preferred_element_type=jnp.float32)
                    segs.append(acc)
                blk = segs[0] if len(segs) == 1 else jnp.concatenate(segs, -1)
                blocks.append(blk + bias)                       # (W, M)
            if P == 1:
                return blocks[0]
            return jnp.concatenate(blocks, axis=-1)             # (W, P*M)

        # Feature layout is p*M + m (a fixed permutation of PyTorch's m*P + p);
        # both softmaxes and the bilinear attention are permutation-equivariant
        # and the output conv below un-permutes with the same ordering.
        q = project(cond, wq_all, bq_ref[...], q_groups)        # (W, PM) f32
        k = project(x, wk_all, bk_ref[...], k_groups)
        v = project(x, wv_all, bv_ref[...], v_groups)

        if has_mask:
            # Bernoulli(p) * -1e9 added to k before softmax (module's literal
            # behavior; NOT standard zero+rescale nn.Dropout).
            k = k + mask_ref[0].astype(jnp.float32)

        # softmax(q, dim=-1) and softmax(k, dim=-2), f32 math.
        q = jnp.exp(q - jnp.max(q, axis=-1, keepdims=True))
        q = q / jnp.sum(q, axis=-1, keepdims=True)
        k = jnp.exp(k - jnp.max(k, axis=0, keepdims=True))
        k = k / jnp.sum(k, axis=0, keepdims=True)

        # ctx = k^T v (contract over words), attn = q @ ctx.  Explicit bf16
        # operands on the fast path, f32 accumulation.
        ctx = jax.lax.dot_general(
            k.astype(compute_dtype), v.astype(compute_dtype),
            (((0,), (0,)), ((), ())),
            preferred_element_type=jnp.float32)                 # (PM, PM)
        attn = jnp.dot(q.astype(compute_dtype), ctx.astype(compute_dtype),
                       preferred_element_type=jnp.float32)      # (W, PM)

        # Output Conv1d (kernel 3, 'same') over time t = w*P + p, fused as one
        # (W, 3M) @ (3M, C) matmul per patch slot.  Only the two boundary patch
        # slots need small word-shifted pieces (no full padded attn copy).
        wout = wout_ref[...]                                    # (3M, C)
        bout = bout_ref[...]                                    # (1, C)
        zrow = jnp.zeros((1, M), jnp.float32)
        out_blocks = []
        for p in range(P):
            if p == 0:       # tap t-1 wraps to the previous word, patch P-1
                prev = jnp.concatenate(
                    [zrow, attn[:W - 1, (P - 1) * M:P * M]], axis=0)
            else:
                prev = attn[:, (p - 1) * M:p * M]
            cur = attn[:, p * M:(p + 1) * M]
            if p == P - 1:   # tap t+1 wraps to the next word, patch 0
                nxt = jnp.concatenate([attn[1:W, 0:M], zrow], axis=0)
            else:
                nxt = attn[:, (p + 1) * M:(p + 2) * M]
            lhs = jnp.concatenate([prev, cur, nxt],
                                  axis=-1).astype(compute_dtype)   # (W, 3M)
            out_blocks.append(
                jnp.dot(lhs, wout, preferred_element_type=jnp.float32) + bout)

        # Word-major store: out[w, p*C + c] == y[c, w*P + p].
        out_ref[0] = (out_blocks[0] if P == 1
                      else jnp.concatenate(out_blocks, axis=-1))

    if has_mask:
        def kernel(cond_ref, x_ref, wq_ref, bq_ref, wk_ref, bk_ref, wv_ref,
                   bv_ref, wout_ref, bout_ref, mask_ref, out_ref):
            body(cond_ref, x_ref, wq_ref, bq_ref, wk_ref, bk_ref, wv_ref,
                 bv_ref, wout_ref, bout_ref, mask_ref, out_ref)
    else:
        def kernel(cond_ref, x_ref, wq_ref, bq_ref, wk_ref, bk_ref, wv_ref,
                   bv_ref, wout_ref, bout_ref, out_ref):
            body(cond_ref, x_ref, wq_ref, bq_ref, wk_ref, bk_ref, wv_ref,
                 bv_ref, wout_ref, bout_ref, None, out_ref)
    return kernel


# ----------------------------------------------------------------------------
# Host-side glue: weight restructuring + layout plumbing
# ----------------------------------------------------------------------------
def _proj_segments(w_full, out_lo, out_hi, groups):
    """Per-input-group weight slabs for output channels [out_lo, out_hi) of a
    grouped conv weight (Cout, Cin//G, 5, 1).

    Returns (seg_groups, w) where w has shape (5, nseg, in_pg, segw) and
    segment s maps input group seg_groups[s] to a contiguous run of output
    channels — no zero blocks materialized.
    """
    cout_total, in_pg, ktaps, _ = w_full.shape
    assert ktaps == 5
    out_pg = cout_total // groups
    seg_groups, seg_slices = [], []
    o = out_lo
    while o < out_hi:
        g = o // out_pg
        e = min(out_hi, (g + 1) * out_pg)
        seg_groups.append(g)
        seg_slices.append((o, e))
        o = e
    widths = {e - s for s, e in seg_slices}
    assert len(widths) == 1, "per-group output widths must be equal"
    w = jnp.stack(
        [jnp.stack([jnp.transpose(w_full[s:e, :, t, 0], (1, 0))
                    for (s, e) in seg_slices], axis=0)
         for t in range(5)], axis=0)
    return tuple(seg_groups), w


def _vmem_limit_bytes():
    # Per-generation VMEM budget (≈48 MiB on v7x's 64 MiB, capped at ~100 MiB
    # on v5e/v6e's 128 MiB).  Falls back to a safe default off-TPU.
    try:
        cap = int(pltpu.get_tpu_info().vmem_capacity_bytes)
    except Exception:
        return 64 * 1024 * 1024
    return min((cap * 3) // 4, 100 * 1024 * 1024)


def speech_attention_with_q(x, condition, params, *, channels, mid, groups,
                            patch, drop_rate=0.1, rng_key=None, use_bf16=True):
    """Forward pass of SpeechAttentionWithQ (weight_norm at init == identity)."""
    B, C, Tx = x.shape
    assert C == channels
    M = mid
    pad_x = (-Tx) % patch
    pad_c = (-condition.shape[-1]) % patch
    xp = jnp.pad(x, ((0, 0), (0, 0), (0, pad_x)))
    cp = jnp.pad(condition, ((0, 0), (0, 0), (0, pad_c)))
    W = xp.shape[-1] // patch
    assert cp.shape[-1] // patch == W, "x / condition must give the same wordNum"
    Dc = patch * C
    T = W * patch
    act_dtype = jnp.bfloat16 if use_bf16 else jnp.float32

    # (B, C, T) -> (B, W, P*C) word-major (feature p*C + c) with a 2-word halo.
    def to_word_major(a):
        a = a.reshape(B, C, W, patch).transpose(0, 2, 3, 1).reshape(B, W, Dc)
        return jnp.pad(a, ((0, 0), (2, 2), (0, 0))).astype(act_dtype)

    cond_wm = to_word_major(cp)
    x_wm = to_word_major(xp)

    in_pg = C // groups
    q_groups, wq = _proj_segments(params["wq"], 0, M, groups)
    k_groups, wk = _proj_segments(params["wkv"], 0, M, groups)
    v_groups, wv = _proj_segments(params["wkv"], M, 2 * M, groups)
    wq = wq.astype(act_dtype)
    wk = wk.astype(act_dtype)
    wv = wv.astype(act_dtype)
    bq = params["bq"].astype(jnp.float32)[None, :]
    bk = params["bkv"][:M].astype(jnp.float32)[None, :]
    bv = params["bkv"][M:].astype(jnp.float32)[None, :]
    # Conv1d taps fused: (3*M, C); row block k holds tap k (time offset k-1).
    wout3 = jnp.concatenate([params["wout"][:, :, t].T for t in range(3)],
                            axis=0).astype(act_dtype)
    bout = params["bout"].astype(jnp.float32)[None, :]

    has_mask = float(drop_rate) > 0.0
    kernel = _make_kernel(patch=patch, mid=M, channels=C, in_pg=in_pg,
                          q_groups=q_groups, k_groups=k_groups,
                          v_groups=v_groups, compute_dtype=act_dtype,
                          has_mask=has_mask)

    def full_spec(shape):
        return pl.BlockSpec(shape, lambda b: (0,) * len(shape))

    in_specs = [
        pl.BlockSpec((1, W + 4, Dc), lambda b: (b, 0, 0)),
        pl.BlockSpec((1, W + 4, Dc), lambda b: (b, 0, 0)),
        full_spec(wq.shape), full_spec(bq.shape),
        full_spec(wk.shape), full_spec(bk.shape),
        full_spec(wv.shape), full_spec(bv.shape),
        full_spec(wout3.shape), full_spec(bout.shape),
    ]
    args = [cond_wm, x_wm, wq, bq, wk, bk, wv, bv, wout3, bout]

    if has_mask:
        key = rng_key if rng_key is not None else jax.random.PRNGKey(0)
        bern = jax.random.bernoulli(key, p=float(drop_rate),
                                    shape=(B, W, patch * M))
        mask = jnp.where(bern, jnp.float32(-1e9),
                         jnp.float32(0.0)).astype(act_dtype)
        in_specs.append(pl.BlockSpec((1, W, patch * M), lambda b: (b, 0, 0)))
        args.append(mask)

    out_wm = pl.pallas_call(
        kernel,
        out_shape=jax.ShapeDtypeStruct((B, W, Dc), jnp.float32),
        grid=(B,),
        in_specs=in_specs,
        out_specs=pl.BlockSpec((1, W, Dc), lambda b: (b, 0, 0)),
        compiler_params=pltpu.CompilerParams(
            dimension_semantics=("parallel",),
            vmem_limit_bytes=_vmem_limit_bytes(),
        ),
    )(*args)

    # (B, W, P*C) -> (B, C, T); trim the patch padding (PyTorch NCW output).
    out = out_wm.reshape(B, W, patch, C).transpose(0, 3, 1, 2).reshape(B, C, T)
    return out[:, :, :Tx]


# ----------------------------------------------------------------------------
# Pure-JAX reference (mirrors the PyTorch forward, dropout disabled)
# ----------------------------------------------------------------------------
def reference_forward(x, condition, params, *, channels, mid, groups, patch):
    B, C, Tx = x.shape
    pad_x = (-Tx) % patch
    pad_c = (-condition.shape[-1]) % patch
    xp = jnp.pad(x, ((0, 0), (0, 0), (0, pad_x)))
    cp = jnp.pad(condition, ((0, 0), (0, 0), (0, pad_c)))
    W = xp.shape[-1] // patch
    xp = xp.reshape(B, C, W, patch)
    cp = cp.reshape(B, C, cp.shape[-1] // patch, patch)
    hp = jax.lax.Precision.HIGHEST

    def conv2d_g(inp, w, b):
        cout, in_pg, K, _ = w.shape
        out_pg = cout // groups
        inp_p = jnp.pad(inp, ((0, 0), (0, 0), (2, 2), (0, 0)))
        outs = []
        for g in range(groups):
            xg = inp_p[:, g * in_pg:(g + 1) * in_pg]
            wg = w[g * out_pg:(g + 1) * out_pg, :, :, 0]
            og = jnp.zeros((B, out_pg, W, patch), jnp.float32)
            for kk in range(K):
                og = og + jnp.einsum('biwp,oi->bowp', xg[:, :, kk:kk + W, :],
                                     wg[:, :, kk], precision=hp)
            outs.append(og)
        return jnp.concatenate(outs, axis=1) + b[None, :, None, None]

    q = conv2d_g(cp, params["wq"], params["bq"])
    kv = conv2d_g(xp, params["wkv"], params["bkv"])
    k, v = kv[:, :mid], kv[:, mid:]
    D = mid * patch
    q = q.transpose(0, 2, 1, 3).reshape(B, W, D)
    k = k.transpose(0, 2, 1, 3).reshape(B, W, D)
    v = v.transpose(0, 2, 1, 3).reshape(B, W, D)
    q = jax.nn.softmax(q, axis=-1)
    k = jax.nn.softmax(k, axis=-2)
    ctx = jnp.einsum('bki,bkj->bij', k, v, precision=hp)
    out = jnp.einsum('bik,bkj->bij', q, ctx, precision=hp)
    out = out.reshape(B, W, mid, patch).transpose(0, 2, 1, 3)
    out = out.reshape(B, mid, W * patch)
    op = jnp.pad(out, ((0, 0), (0, 0), (1, 1)))
    T = W * patch
    res = jnp.zeros((B, C, T), jnp.float32)
    for kk in range(3):
        res = res + jnp.einsum('bit,oi->bot', op[:, :, kk:kk + T],
                               params["wout"][:, :, kk], precision=hp)
    res = res + params["bout"][None, :, None]
    return res[:, :, :Tx]


# ----------------------------------------------------------------------------
if __name__ == "__main__":
    channels, mid, groups, patch, drop_rate = 4, 8, 2, 4, 0.1
    B, T = 2, 18  # T not a multiple of patch -> exercises the pad/trim path

    key = jax.random.PRNGKey(0)
    k1, k2, k3, k4, k5, k6, kx, kc, kd = jax.random.split(key, 9)

    # weight_norm at init is the identity map (g = ||v||): use raw weights.
    params = {
        "wq": 0.3 * jax.random.normal(k1, (mid, channels // groups, 5, 1),
                                      jnp.float32),
        "bq": 0.1 * jax.random.normal(k2, (mid,), jnp.float32),
        "wkv": 0.3 * jax.random.normal(k3, (2 * mid, channels // groups, 5, 1),
                                       jnp.float32),
        "bkv": 0.1 * jax.random.normal(k4, (2 * mid,), jnp.float32),
        "wout": 0.3 * jax.random.normal(k5, (channels, mid, 3), jnp.float32),
        "bout": 0.1 * jax.random.normal(k6, (channels,), jnp.float32),
    }
    x = jax.random.normal(kx, (B, channels, T), jnp.float32)
    condition = jax.random.normal(kc, (B, channels, T), jnp.float32)

    ref = jax.block_until_ready(
        reference_forward(x, condition, params, channels=channels, mid=mid,
                          groups=groups, patch=patch))

    common = dict(channels=channels, mid=mid, groups=groups, patch=patch)

    # 1) f32 path, dropout off: tight check against the pure-JAX reference.
    out_f32 = jax.block_until_ready(
        speech_attention_with_q(x, condition, params, drop_rate=0.0,
                                use_bf16=False, **common))
    assert out_f32.shape == (B, channels, T), out_f32.shape
    err_f32 = float(jnp.max(jnp.abs(out_f32 - ref)))
    assert err_f32 < 2e-2, f"f32 path max abs err vs reference: {err_f32}"

    # 2) bf16-MXU path, dropout off: looser tolerance (bf16 matmul operands).
    out_bf16 = jax.block_until_ready(
        speech_attention_with_q(x, condition, params, drop_rate=0.0,
                                use_bf16=True, **common))
    err_bf16 = float(jnp.max(jnp.abs(out_bf16 - ref)))
    assert err_bf16 < 1e-1, f"bf16 path max abs err vs reference: {err_bf16}"

    # 3) dropout path: fresh host-drawn Bernoulli(-1e9) additive K-mask per
    #    forward (matches the module's literal behavior); sanity-check only.
    out_drop = jax.block_until_ready(
        speech_attention_with_q(x, condition, params, drop_rate=drop_rate,
                                rng_key=kd, use_bf16=True, **common))
    assert out_drop.shape == (B, channels, T), out_drop.shape
    assert bool(jnp.all(jnp.isfinite(out_drop)))

    print("KERNEL_OK")
</pallas_src>

<mosaic_0001>
module attributes {stable_mosaic.version = 11 : i64} {
  func.func @kernel(%arg0: i32, %arg1: memref<1x9x16xf32, #tpu.memory_space<vmem>>, %arg2: memref<1x9x16xf32, #tpu.memory_space<vmem>>, %arg3: memref<5x2x2x4xf32, #tpu.memory_space<vmem>>, %arg4: memref<1x8xf32, #tpu.memory_space<vmem>>, %arg5: memref<5x1x2x8xf32, #tpu.memory_space<vmem>>, %arg6: memref<1x8xf32, #tpu.memory_space<vmem>>, %arg7: memref<5x1x2x8xf32, #tpu.memory_space<vmem>>, %arg8: memref<1x8xf32, #tpu.memory_space<vmem>>, %arg9: memref<24x4xf32, #tpu.memory_space<vmem>>, %arg10: memref<1x4xf32, #tpu.memory_space<vmem>>, %arg11: memref<1x5x16xf32, #tpu.memory_space<vmem>>) attributes {dimension_semantics = [#tpu.dimension_semantics<parallel>], iteration_bounds = array<i64: 2>, scalar_prefetch = 0 : i64, scratch_operands = 0 : i64, tpu.core_type = #tpu.core_type<tc>, window_params = [{transform_indices = @transform_0, window_bounds = array<i64: 1, 9, 16>}, {transform_indices = @transform_1, window_bounds = array<i64: 1, 9, 16>}, {pipeline_mode = #tpu.pipeline_mode<synchronous>, transform_indices = @transform_2, window_bounds = array<i64: 5, 2, 2, 4>}, {pipeline_mode = #tpu.pipeline_mode<synchronous>, transform_indices = @transform_3, window_bounds = array<i64: 1, 8>}, {pipeline_mode = #tpu.pipeline_mode<synchronous>, transform_indices = @transform_4, window_bounds = array<i64: 5, 1, 2, 8>}, {pipeline_mode = #tpu.pipeline_mode<synchronous>, transform_indices = @transform_5, window_bounds = array<i64: 1, 8>}, {pipeline_mode = #tpu.pipeline_mode<synchronous>, transform_indices = @transform_6, window_bounds = array<i64: 5, 1, 2, 8>}, {pipeline_mode = #tpu.pipeline_mode<synchronous>, transform_indices = @transform_7, window_bounds = array<i64: 1, 8>}, {pipeline_mode = #tpu.pipeline_mode<synchronous>, transform_indices = @transform_8, window_bounds = array<i64: 24, 4>}, {pipeline_mode = #tpu.pipeline_mode<synchronous>, transform_indices = @transform_9, window_bounds = array<i64: 1, 4>}, {transform_indices = @transform_10, window_bounds = array<i64: 1, 5, 16>}]} {
    %c0 = arith.constant 0 : index
    %c0_0 = arith.constant 0 : index
    %c0_1 = arith.constant 0 : index
    %0 = vector.load %arg1[%c0, %c0_0, %c0_1] : memref<1x9x16xf32, #tpu.memory_space<vmem>>, vector<1x9x16xf32>
    %1 = vector.shape_cast %0 : vector<1x9x16xf32> to vector<9x16xf32>
    %c0_2 = arith.constant 0 : index
    %c0_3 = arith.constant 0 : index
    %c0_4 = arith.constant 0 : index
    %2 = vector.load %arg2[%c0_2, %c0_3, %c0_4] : memref<1x9x16xf32, #tpu.memory_space<vmem>>, vector<1x9x16xf32>
    %3 = vector.shape_cast %2 : vector<1x9x16xf32> to vector<9x16xf32>
    %c0_5 = arith.constant 0 : index
    %c0_6 = arith.constant 0 : index
    %c0_7 = arith.constant 0 : index
    %c0_8 = arith.constant 0 : index
    %4 = vector.load %arg3[%c0_5, %c0_6, %c0_7, %c0_8] : memref<5x2x2x4xf32, #tpu.memory_space<vmem>>, vector<5x2x2x4xf32>
    %c0_9 = arith.constant 0 : index
    %c0_10 = arith.constant 0 : index
    %c0_11 = arith.constant 0 : index
    %c0_12 = arith.constant 0 : index
    %5 = vector.load %arg5[%c0_9, %c0_10, %c0_11, %c0_12] : memref<5x1x2x8xf32, #tpu.memory_space<vmem>>, vector<5x1x2x8xf32>
    %c0_13 = arith.constant 0 : index
    %c0_14 = arith.constant 0 : index
    %c0_15 = arith.constant 0 : index
    %c0_16 = arith.constant 0 : index
    %6 = vector.load %arg7[%c0_13, %c0_14, %c0_15, %c0_16] : memref<5x1x2x8xf32, #tpu.memory_space<vmem>>, vector<5x1x2x8xf32>
    %c0_17 = arith.constant 0 : index
    %c0_18 = arith.constant 0 : index
    %7 = vector.load %arg4[%c0_17, %c0_18] : memref<1x8xf32, #tpu.memory_space<vmem>>, vector<1x8xf32>
    %8 = vector.extract_strided_slice %1 {offsets = [0, 0], sizes = [5, 2], strides = [1, 1]} : vector<9x16xf32> to vector<5x2xf32>
    %9 = vector.extract_strided_slice %4 {offsets = [0, 0, 0, 0], sizes = [1, 1, 2, 4], strides = [1, 1, 1, 1]} : vector<5x2x2x4xf32> to vector<1x1x2x4xf32>
    %10 = vector.shape_cast %9 : vector<1x1x2x4xf32> to vector<2x4xf32>
    %cst = arith.constant dense<0.000000e+00> : vector<5x4xf32>
    %11 = tpu.matmul %8, %10, %cst {dimension_numbers = #tpu.dot_dimension_numbers<[1], [0], [0], [1], [0, 0, 1, 1], [], []>} : vector<5x2xf32>, vector<2x4xf32>, vector<5x4xf32> -> vector<5x4xf32>
    %12 = vector.extract_strided_slice %1 {offsets = [1, 0], sizes = [5, 2], strides = [1, 1]} : vector<9x16xf32> to vector<5x2xf32>
    %13 = vector.extract_strided_slice %4 {offsets = [1, 0, 0, 0], sizes = [1, 1, 2, 4], strides = [1, 1, 1, 1]} : vector<5x2x2x4xf32> to vector<1x1x2x4xf32>
    %14 = vector.shape_cast %13 : vector<1x1x2x4xf32> to vector<2x4xf32>
    %cst_19 = arith.constant dense<0.000000e+00> : vector<5x4xf32>
    %15 = tpu.matmul %12, %14, %cst_19 {dimension_numbers = #tpu.dot_dimension_numbers<[1], [0], [0], [1], [0, 0, 1, 1], [], []>} : vector<5x2xf32>, vector<2x4xf32>, vector<5x4xf32> -> vector<5x4xf32>
    %16 = arith.addf %11, %15 : vector<5x4xf32>
    %17 = vector.extract_strided_slice %1 {offsets = [2, 0], sizes = [5, 2], strides = [1, 1]} : vector<9x16xf32> to vector<5x2xf32>
    %18 = vector.extract_strided_slice %4 {offsets = [2, 0, 0, 0], sizes = [1, 1, 2, 4], strides = [1, 1, 1, 1]} : vector<5x2x2x4xf32> to vector<1x1x2x4xf32>
    %19 = vector.shape_cast %18 : vector<1x1x2x4xf32> to vector<2x4xf32>
    %cst_20 = arith.constant dense<0.000000e+00> : vector<5x4xf32>
    %20 = tpu.matmul %17, %19, %cst_20 {dimension_numbers = #tpu.dot_dimension_numbers<[1], [0], [0], [1], [0, 0, 1, 1], [], []>} : vector<5x2xf32>, vector<2x4xf32>, vector<5x4xf32> -> vector<5x4xf32>
    %21 = arith.addf %16, %20 : vector<5x4xf32>
    %22 = vector.extract_strided_slice %1 {offsets = [3, 0], sizes = [5, 2], strides = [1, 1]} : vector<9x16xf32> to vector<5x2xf32>
    %23 = vector.extract_strided_slice %4 {offsets = [3, 0, 0, 0], sizes = [1, 1, 2, 4], strides = [1, 1, 1, 1]} : vector<5x2x2x4xf32> to vector<1x1x2x4xf32>
    %24 = vector.shape_cast %23 : vector<1x1x2x4xf32> to vector<2x4xf32>
    %cst_21 = arith.constant dense<0.000000e+00> : vector<5x4xf32>
    %25 = tpu.matmul %22, %24, %cst_21 {dimension_numbers = #tpu.dot_dimension_numbers<[1], [0], [0], [1], [0, 0, 1, 1], [], []>} : vector<5x2xf32>, vector<2x4xf32>, vector<5x4xf32> -> vector<5x4xf32>
    %26 = arith.addf %21, %25 : vector<5x4xf32>
    %27 = vector.extract_strided_slice %1 {offsets = [4, 0], sizes = [5, 2], strides = [1, 1]} : vector<9x16xf32> to vector<5x2xf32>
    %28 = vector.extract_strided_slice %4 {offsets = [4, 0, 0, 0], sizes = [1, 1, 2, 4], strides = [1, 1, 1, 1]} : vector<5x2x2x4xf32> to vector<1x1x2x4xf32>
    %29 = vector.shape_cast %28 : vector<1x1x2x4xf32> to vector<2x4xf32>
    %cst_22 = arith.constant dense<0.000000e+00> : vector<5x4xf32>
    %30 = tpu.matmul %27, %29, %cst_22 {dimension_numbers = #tpu.dot_dimension_numbers<[1], [0], [0], [1], [0, 0, 1, 1], [], []>} : vector<5x2xf32>, vector<2x4xf32>, vector<5x4xf32> -> vector<5x4xf32>
    %31 = arith.addf %26, %30 : vector<5x4xf32>
    %32 = vector.extract_strided_slice %1 {offsets = [0, 2], sizes = [5, 2], strides = [1, 1]} : vector<9x16xf32> to vector<5x2xf32>
    %33 = vector.extract_strided_slice %4 {offsets = [0, 1, 0, 0], sizes = [1, 1, 2, 4], strides = [1, 1, 1, 1]} : vector<5x2x2x4xf32> to vector<1x1x2x4xf32>
    %34 = vector.shape_cast %33 : vector<1x1x2x4xf32> to vector<2x4xf32>
    %cst_23 = arith.constant dense<0.000000e+00> : vector<5x4xf32>
    %35 = tpu.matmul %32, %34, %cst_23 {dimension_numbers = #tpu.dot_dimension_numbers<[1], [0], [0], [1], [0, 0, 1, 1], [], []>} : vector<5x2xf32>, vector<2x4xf32>, vector<5x4xf32> -> vector<5x4xf32>
    %36 = vector.extract_strided_slice %1 {offsets = [1, 2], sizes = [5, 2], strides = [1, 1]} : vector<9x16xf32> to vector<5x2xf32>
    %37 = vector.extract_strided_slice %4 {offsets = [1, 1, 0, 0], sizes = [1, 1, 2, 4], strides = [1, 1, 1, 1]} : vector<5x2x2x4xf32> to vector<1x1x2x4xf32>
    %38 = vector.shape_cast %37 : vector<1x1x2x4xf32> to vector<2x4xf32>
    %cst_24 = arith.constant dense<0.000000e+00> : vector<5x4xf32>
    %39 = tpu.matmul %36, %38, %cst_24 {dimension_numbers = #tpu.dot_dimension_numbers<[1], [0], [0], [1], [0, 0, 1, 1], [], []>} : vector<5x2xf32>, vector<2x4xf32>, vector<5x4xf32> -> vector<5x4xf32>
    %40 = arith.addf %35, %39 : vector<5x4xf32>
    %41 = vector.extract_strided_slice %1 {offsets = [2, 2], sizes = [5, 2], strides = [1, 1]} : vector<9x16xf32> to vector<5x2xf32>
    %42 = vector.extract_strided_slice %4 {offsets = [2, 1, 0, 0], sizes = [1, 1, 2, 4], strides = [1, 1, 1, 1]} : vector<5x2x2x4xf32> to vector<1x1x2x4xf32>
    %43 = vector.shape_cast %42 : vector<1x1x2x4xf32> to vector<2x4xf32>
    %cst_25 = arith.constant dense<0.000000e+00> : vector<5x4xf32>
    %44 = tpu.matmul %41, %43, %cst_25 {dimension_numbers = #tpu.dot_dimension_numbers<[1], [0], [0], [1], [0, 0, 1, 1], [], []>} : vector<5x2xf32>, vector<2x4xf32>, vector<5x4xf32> -> vector<5x4xf32>
    %45 = arith.addf %40, %44 : vector<5x4xf32>
    %46 = vector.extract_strided_slice %1 {offsets = [3, 2], sizes = [5, 2], strides = [1, 1]} : vector<9x16xf32> to vector<5x2xf32>
    %47 = vector.extract_strided_slice %4 {offsets = [3, 1, 0, 0], sizes = [1, 1, 2, 4], strides = [1, 1, 1, 1]} : vector<5x2x2x4xf32> to vector<1x1x2x4xf32>
    %48 = vector.shape_cast %47 : vector<1x1x2x4xf32> to vector<2x4xf32>
    %cst_26 = arith.constant dense<0.000000e+00> : vector<5x4xf32>
    %49 = tpu.matmul %46, %48, %cst_26 {dimension_numbers = #tpu.dot_dimension_numbers<[1], [0], [0], [1], [0, 0, 1, 1], [], []>} : vector<5x2xf32>, vector<2x4xf32>, vector<5x4xf32> -> vector<5x4xf32>
    %50 = arith.addf %45, %49 : vector<5x4xf32>
    %51 = vector.extract_strided_slice %1 {offsets = [4, 2], sizes = [5, 2], strides = [1, 1]} : vector<9x16xf32> to vector<5x2xf32>
    %52 = vector.extract_strided_slice %4 {offsets = [4, 1, 0, 0], sizes = [1, 1, 2, 4], strides = [1, 1, 1, 1]} : vector<5x2x2x4xf32> to vector<1x1x2x4xf32>
    %53 = vector.shape_cast %52 : vector<1x1x2x4xf32> to vector<2x4xf32>
    %cst_27 = arith.constant dense<0.000000e+00> : vector<5x4xf32>
    %54 = tpu.matmul %51, %53, %cst_27 {dimension_numbers = #tpu.dot_dimension_numbers<[1], [0], [0], [1], [0, 0, 1, 1], [], []>} : vector<5x2xf32>, vector<2x4xf32>, vector<5x4xf32> -> vector<5x4xf32>
    %55 = arith.addf %50, %54 : vector<5x4xf32>
    %56 = tpu.concatenate %31, %55 in 1 : vector<5x4xf32>, vector<5x4xf32> -> vector<5x8xf32>
    %57 = vector.broadcast %7 : vector<1x8xf32> to vector<5x8xf32>
    %58 = arith.addf %56, %57 : vector<5x8xf32>
    %59 = vector.extract_strided_slice %1 {offsets = [0, 4], sizes = [5, 2], strides = [1, 1]} : vector<9x16xf32> to vector<5x2xf32>
    %60 = vector.extract_strided_slice %4 {offsets = [0, 0, 0, 0], sizes = [1, 1, 2, 4], strides = [1, 1, 1, 1]} : vector<5x2x2x4xf32> to vector<1x1x2x4xf32>
    %61 = vector.shape_cast %60 : vector<1x1x2x4xf32> to vector<2x4xf32>
    %cst_28 = arith.constant dense<0.000000e+00> : vector<5x4xf32>
    %62 = tpu.matmul %59, %61, %cst_28 {dimension_numbers = #tpu.dot_dimension_numbers<[1], [0], [0], [1], [0, 0, 1, 1], [], []>} : vector<5x2xf32>, vector<2x4xf32>, vector<5x4xf32> -> vector<5x4xf32>
    %63 = vector.extract_strided_slice %1 {offsets = [1, 4], sizes = [5, 2], strides = [1, 1]} : vector<9x16xf32> to vector<5x2xf32>
    %64 = vector.extract_strided_slice %4 {offsets = [1, 0, 0, 0], sizes = [1, 1, 2, 4], strides = [1, 1, 1, 1]} : vector<5x2x2x4xf32> to vector<1x1x2x4xf32>
    %65 = vector.shape_cast %64 : vector<1x1x2x4xf32> to vector<2x4xf32>
    %cst_29 = arith.constant dense<0.000000e+00> : vector<5x4xf32>
    %66 = tpu.matmul %63, %65, %cst_29 {dimension_numbers = #tpu.dot_dimension_numbers<[1], [0], [0], [1], [0, 0, 1, 1], [], []>} : vector<5x2xf32>, vector<2x4xf32>, vector<5x4xf32> -> vector<5x4xf32>
    %67 = arith.addf %62, %66 : vector<5x4xf32>
    %68 = vector.extract_strided_slice %1 {offsets = [2, 4], sizes = [5, 2], strides = [1, 1]} : vector<9x16xf32> to vector<5x2xf32>
    %69 = vector.extract_strided_slice %4 {offsets = [2, 0, 0, 0], sizes = [1, 1, 2, 4], strides = [1, 1, 1, 1]} : vector<5x2x2x4xf32> to vector<1x1x2x4xf32>
    %70 = vector.shape_cast %69 : vector<1x1x2x4xf32> to vector<2x4xf32>
    %cst_30 = arith.constant dense<0.000000e+00> : vector<5x4xf32>
    %71 = tpu.matmul %68, %70, %cst_30 {dimension_numbers = #tpu.dot_dimension_numbers<[1], [0], [0], [1], [0, 0, 1, 1], [], []>} : vector<5x2xf32>, vector<2x4xf32>, vector<5x4xf32> -> vector<5x4xf32>
    %72 = arith.addf %67, %71 : vector<5x4xf32>
    %73 = vector.extract_strided_slice %1 {offsets = [3, 4], sizes = [5, 2], strides = [1, 1]} : vector<9x16xf32> to vector<5x2xf32>
    %74 = vector.extract_strided_slice %4 {offsets = [3, 0, 0, 0], sizes = [1, 1, 2, 4], strides = [1, 1, 1, 1]} : vector<5x2x2x4xf32> to vector<1x1x2x4xf32>
    %75 = vector.shape_cast %74 : vector<1x1x2x4xf32> to vector<2x4xf32>
    %cst_31 = arith.constant dense<0.000000e+00> : vector<5x4xf32>
    %76 = tpu.matmul %73, %75, %cst_31 {dimension_numbers = #tpu.dot_dimension_numbers<[1], [0], [0], [1], [0, 0, 1, 1], [], []>} : vector<5x2xf32>, vector<2x4xf32>, vector<5x4xf32> -> vector<5x4xf32>
    %77 = arith.addf %72, %76 : vector<5x4xf32>
    %78 = vector.extract_strided_slice %1 {offsets = [4, 4], sizes = [5, 2], strides = [1, 1]} : vector<9x16xf32> to vector<5x2xf32>
    %79 = vector.extract_strided_slice %4 {offsets = [4, 0, 0, 0], sizes = [1, 1, 2, 4], strides = [1, 1, 1, 1]} : vector<5x2x2x4xf32> to vector<1x1x2x4xf32>
    %80 = vector.shape_cast %79 : vector<1x1x2x4xf32> to vector<2x4xf32>
    %cst_32 = arith.constant dense<0.000000e+00> : vector<5x4xf32>
    %81 = tpu.matmul %78, %80, %cst_32 {dimension_numbers = #tpu.dot_dimension_numbers<[1], [0], [0], [1], [0, 0, 1, 1], [], []>} : vector<5x2xf32>, vector<2x4xf32>, vector<5x4xf32> -> vector<5x4xf32>
    %82 = arith.addf %77, %81 : vector<5x4xf32>
    %83 = vector.extract_strided_slice %1 {offsets = [0, 6], sizes = [5, 2], strides = [1, 1]} : vector<9x16xf32> to vector<5x2xf32>
    %84 = vector.extract_strided_slice %4 {offsets = [0, 1, 0, 0], sizes = [1, 1, 2, 4], strides = [1, 1, 1, 1]} : vector<5x2x2x4xf32> to vector<1x1x2x4xf32>
    %85 = vector.shape_cast %84 : vector<1x1x2x4xf32> to vector<2x4xf32>
    %cst_33 = arith.constant dense<0.000000e+00> : vector<5x4xf32>
    %86 = tpu.matmul %83, %85, %cst_33 {dimension_numbers = #tpu.dot_dimension_numbers<[1], [0], [0], [1], [0, 0, 1, 1], [], []>} : vector<5x2xf32>, vector<2x4xf32>, vector<5x4xf32> -> vector<5x4xf32>
    %87 = vector.extract_strided_slice %1 {offsets = [1, 6], sizes = [5, 2], strides = [1, 1]} : vector<9x16xf32> to vector<5x2xf32>
    %88 = vector.extract_strided_slice %4 {offsets = [1, 1, 0, 0], sizes = [1, 1, 2, 4], strides = [1, 1, 1, 1]} : vector<5x2x2x4xf32> to vector<1x1x2x4xf32>
    %89 = vector.shape_cast %88 : vector<1x1x2x4xf32> to vector<2x4xf32>
    %cst_34 = arith.constant dense<0.000000e+00> : vector<5x4xf32>
    %90 = tpu.matmul %87, %89, %cst_34 {dimension_numbers = #tpu.dot_dimension_numbers<[1], [0], [0], [1], [0, 0, 1, 1], [], []>} : vector<5x2xf32>, vector<2x4xf32>, vector<5x4xf32> -> vector<5x4xf32>
    %91 = arith.addf %86, %90 : vector<5x4xf32>
    %92 = vector.extract_strided_slice %1 {offsets = [2, 6], sizes = [5, 2], strides = [1, 1]} : vector<9x16xf32> to vector<5x2xf32>
    %93 = vector.extract_strided_slice %4 {offsets = [2, 1, 0, 0], sizes = [1, 1, 2, 4], strides = [1, 1, 1, 1]} : vector<5x2x2x4xf32> to vector<1x1x2x4xf32>
    %94 = vector.shape_cast %93 : vector<1x1x2x4xf32> to vector<2x4xf32>
    %cst_35 = arith.constant dense<0.000000e+00> : vector<5x4xf32>
    %95 = tpu.matmul %92, %94, %cst_35 {dimension_numbers = #tpu.dot_dimension_numbers<[1], [0], [0], [1], [0, 0, 1, 1], [], []>} : vector<5x2xf32>, vector<2x4xf32>, vector<5x4xf32> -> vector<5x4xf32>
    %96 = arith.addf %91, %95 : vector<5x4xf32>
    %97 = vector.extract_strided_slice %1 {offsets = [3, 6], sizes = [5, 2], strides = [1, 1]} : vector<9x16xf32> to vector<5x2xf32>
    %98 = vector.extract_strided_slice %4 {offsets = [3, 1, 0, 0], sizes = [1, 1, 2, 4], strides = [1, 1, 1, 1]} : vector<5x2x2x4xf32> to vector<1x1x2x4xf32>
    %99 = vector.shape_cast %98 : vector<1x1x2x4xf32> to vector<2x4xf32>
    %cst_36 = arith.constant dense<0.000000e+00> : vector<5x4xf32>
    %100 = tpu.matmul %97, %99, %cst_36 {dimension_numbers = #tpu.dot_dimension_numbers<[1], [0], [0], [1], [0, 0, 1, 1], [], []>} : vector<5x2xf32>, vector<2x4xf32>, vector<5x4xf32> -> vector<5x4xf32>
    %101 = arith.addf %96, %100 : vector<5x4xf32>
    %102 = vector.extract_strided_slice %1 {offsets = [4, 6], sizes = [5, 2], strides = [1, 1]} : vector<9x16xf32> to vector<5x2xf32>
    %103 = vector.extract_strided_slice %4 {offsets = [4, 1, 0, 0], sizes = [1, 1, 2, 4], strides = [1, 1, 1, 1]} : vector<5x2x2x4xf32> to vector<1x1x2x4xf32>
    %104 = vector.shape_cast %103 : vector<1x1x2x4xf32> to vector<2x4xf32>
    %cst_37 = arith.constant dense<0.000000e+00> : vector<5x4xf32>
    %105 = tpu.matmul %102, %104, %cst_37 {dimension_numbers = #tpu.dot_dimension_numbers<[1], [0], [0], [1], [0, 0, 1, 1], [], []>} : vector<5x2xf32>, vector<2x4xf32>, vector<5x4xf32> -> vector<5x4xf32>
    %106 = arith.addf %101, %105 : vector<5x4xf32>
    %107 = tpu.concatenate %82, %106 in 1 : vector<5x4xf32>, vector<5x4xf32> -> vector<5x8xf32>
    %108 = vector.broadcast %7 : vector<1x8xf32> to vector<5x8xf32>
    %109 = arith.addf %107, %108 : vector<5x8xf32>
    %110 = vector.extract_strided_slice %1 {offsets = [0, 8], sizes = [5, 2], strides = [1, 1]} : vector<9x16xf32> to vector<5x2xf32>
    %111 = vector.extract_strided_slice %4 {offsets = [0, 0, 0, 0], sizes = [1, 1, 2, 4], strides = [1, 1, 1, 1]} : vector<5x2x2x4xf32> to vector<1x1x2x4xf32>
    %112 = vector.shape_cast %111 : vector<1x1x2x4xf32> to vector<2x4xf32>
    %cst_38 = arith.constant dense<0.000000e+00> : vector<5x4xf32>
    %113 = tpu.matmul %110, %112, %cst_38 {dimension_numbers = #tpu.dot_dimension_numbers<[1], [0], [0], [1], [0, 0, 1, 1], [], []>} : vector<5x2xf32>, vector<2x4xf32>, vector<5x4xf32> -> vector<5x4xf32>
    %114 = vector.extract_strided_slice %1 {offsets = [1, 8], sizes = [5, 2], strides = [1, 1]} : vector<9x16xf32> to vector<5x2xf32>
    %115 = vector.extract_strided_slice %4 {offsets = [1, 0, 0, 0], sizes = [1, 1, 2, 4], strides = [1, 1, 1, 1]} : vector<5x2x2x4xf32> to vector<1x1x2x4xf32>
    %116 = vector.shape_cast %115 : vector<1x1x2x4xf32> to vector<2x4xf32>
    %cst_39 = arith.constant dense<0.000000e+00> : vector<5x4xf32>
    %117 = tpu.matmul %114, %116, %cst_39 {dimension_numbers = #tpu.dot_dimension_numbers<[1], [0], [0], [1], [0, 0, 1, 1], [], []>} : vector<5x2xf32>, vector<2x4xf32>, vector<5x4xf32> -> vector<5x4xf32>
    %118 = arith.addf %113, %117 : vector<5x4xf32>
    %119 = vector.extract_strided_slice %1 {offsets = [2, 8], sizes = [5, 2], strides = [1, 1]} : vector<9x16xf32> to vector<5x2xf32>
    %120 = vector.extract_strided_slice %4 {offsets = [2, 0, 0, 0], sizes = [1, 1, 2, 4], strides = [1, 1, 1, 1]} : vector<5x2x2x4xf32> to vector<1x1x2x4xf32>
    %121 = vector.shape_cast %120 : vector<1x1x2x4xf32> to vector<2x4xf32>
    %cst_40 = arith.constant dense<0.000000e+00> : vector<5x4xf32>
    %122 = tpu.matmul %119, %121, %cst_40 {dimension_numbers = #tpu.dot_dimension_numbers<[1], [0], [0], [1], [0, 0, 1, 1], [], []>} : vector<5x2xf32>, vector<2x4xf32>, vector<5x4xf32> -> vector<5x4xf32>
    %123 = arith.addf %118, %122 : vector<5x4xf32>
    %124 = vector.extract_strided_slice %1 {offsets = [3, 8], sizes = [5, 2], strides = [1, 1]} : vector<9x16xf32> to vector<5x2xf32>
    %125 = vector.extract_strided_slice %4 {offsets = [3, 0, 0, 0], sizes = [1, 1, 2, 4], strides = [1, 1, 1, 1]} : vector<5x2x2x4xf32> to vector<1x1x2x4xf32>
    %126 = vector.shape_cast %125 : vector<1x1x2x4xf32> to vector<2x4xf32>
    %cst_41 = arith.constant dense<0.000000e+00> : vector<5x4xf32>
    %127 = tpu.matmul %124, %126, %cst_41 {dimension_numbers = #tpu.dot_dimension_numbers<[1], [0], [0], [1], [0, 0, 1, 1], [], []>} : vector<5x2xf32>, vector<2x4xf32>, vector<5x4xf32> -> vector<5x4xf32>
    %128 = arith.addf %123, %127 : vector<5x4xf32>
    %129 = vector.extract_strided_slice %1 {offsets = [4, 8], sizes = [5, 2], strides = [1, 1]} : vector<9x16xf32> to vector<5x2xf32>
    %130 = vector.extract_strided_slice %4 {offsets = [4, 0, 0, 0], sizes = [1, 1, 2, 4], strides = [1, 1, 1, 1]} : vector<5x2x2x4xf32> to vector<1x1x2x4xf32>
    %131 = vector.shape_cast %130 : vector<1x1x2x4xf32> to vector<2x4xf32>
    %cst_42 = arith.constant dense<0.000000e+00> : vector<5x4xf32>
    %132 = tpu.matmul %129, %131, %cst_42 {dimension_numbers = #tpu.dot_dimension_numbers<[1], [0], [0], [1], [0, 0, 1, 1], [], []>} : vector<5x2xf32>, vector<2x4xf32>, vector<5x4xf32> -> vector<5x4xf32>
    %133 = arith.addf %128, %132 : vector<5x4xf32>
    %134 = vector.extract_strided_slice %1 {offsets = [0, 10], sizes = [5, 2], strides = [1, 1]} : vector<9x16xf32> to vector<5x2xf32>
    %135 = vector.extract_strided_slice %4 {offsets = [0, 1, 0, 0], sizes = [1, 1, 2, 4], strides = [1, 1, 1, 1]} : vector<5x2x2x4xf32> to vector<1x1x2x4xf32>
    %136 = vector.shape_cast %135 : vector<1x1x2x4xf32> to vector<2x4xf32>
    %cst_43 = arith.constant dense<0.000000e+00> : vector<5x4xf32>
    %137 = tpu.matmul %134, %136, %cst_43 {dimension_numbers = #tpu.dot_dimension_numbers<[1], [0], [0], [1], [0, 0, 1, 1], [], []>} : vector<5x2xf32>, vector<2x4xf32>, vector<5x4xf32> -> vector<5x4xf32>
    %138 = vector.extract_strided_slice %1 {offsets = [1, 10], sizes = [5, 2], strides = [1, 1]} : vector<9x16xf32> to vector<5x2xf32>
    %139 = vector.extract_strided_slice %4 {offsets = [1, 1, 0, 0], sizes = [1, 1, 2, 4], strides = [1, 1, 1, 1]} : vector<5x2x2x4xf32> to vector<1x1x2x4xf32>
    %140 = vector.shape_cast %139 : vector<1x1x2x4xf32> to vector<2x4xf32>
    %cst_44 = arith.constant dense<0.000000e+00> : vector<5x4xf32>
    %141 = tpu.matmul %138, %140, %cst_44 {dimension_numbers = #tpu.dot_dimension_numbers<[1], [0], [0], [1], [0, 0, 1, 1], [], []>} : vector<5x2xf32>, vector<2x4xf32>, vector<5x4xf32> -> vector<5x4xf32>
    %142 = arith.addf %137, %141 : vector<5x4xf32>
    %143 = vector.extract_strided_slice %1 {offsets = [2, 10], sizes = [5, 2], strides = [1, 1]} : vector<9x16xf32> to vector<5x2xf32>
    %144 = vector.extract_strided_slice %4 {offsets = [2, 1, 0, 0], sizes = [1, 1, 2, 4], strides = [1, 1, 1, 1]} : vector<5x2x2x4xf32> to vector<1x1x2x4xf32>
    %145 = vector.shape_cast %144 : vector<1x1x2x4xf32> to vector<2x4xf32>
    %cst_45 = arith.constant dense<0.000000e+00> : vector<5x4xf32>
    %146 = tpu.matmul %143, %145, %cst_45 {dimension_numbers = #tpu.dot_dimension_numbers<[1], [0], [0], [1], [0, 0, 1, 1], [], []>} : vector<5x2xf32>, vector<2x4xf32>, vector<5x4xf32> -> vector<5x4xf32>
    %147 = arith.addf %142, %146 : vector<5x4xf32>
    %148 = vector.extract_strided_slice %1 {offsets = [3, 10], sizes = [5, 2], strides = [1, 1]} : vector<9x16xf32> to vector<5x2xf32>
    %149 = vector.extract_strided_slice %4 {offsets = [3, 1, 0, 0], sizes = [1, 1, 2, 4], strides = [1, 1, 1, 1]} : vector<5x2x2x4xf32> to vector<1x1x2x4xf32>
    %150 = vector.shape_cast %149 : vector<1x1x2x4xf32> to vector<2x4xf32>
    %cst_46 = arith.constant dense<0.000000e+00> : vector<5x4xf32>
    %151 = tpu.matmul %148, %150, %cst_46 {dimension_numbers = #tpu.dot_dimension_numbers<[1], [0], [0], [1], [0, 0, 1, 1], [], []>} : vector<5x2xf32>, vector<2x4xf32>, vector<5x4xf32> -> vector<5x4xf32>
    %152 = arith.addf %147, %151 : vector<5x4xf32>
    %153 = vector.extract_strided_slice %1 {offsets = [4, 10], sizes = [5, 2], strides = [1, 1]} : vector<9x16xf32> to vector<5x2xf32>
    %154 = vector.extract_strided_slice %4 {offsets = [4, 1, 0, 0], sizes = [1, 1, 2, 4], strides = [1, 1, 1, 1]} : vector<5x2x2x4xf32> to vector<1x1x2x4xf32>
    %155 = vector.shape_cast %154 : vector<1x1x2x4xf32> to vector<2x4xf32>
    %cst_47 = arith.constant dense<0.000000e+00> : vector<5x4xf32>
    %156 = tpu.matmul %153, %155, %cst_47 {dimension_numbers = #tpu.dot_dimension_numbers<[1], [0], [0], [1], [0, 0, 1, 1], [], []>} : vector<5x2xf32>, vector<2x4xf32>, vector<5x4xf32> -> vector<5x4xf32>
    %157 = arith.addf %152, %156 : vector<5x4xf32>
    %158 = tpu.concatenate %133, %157 in 1 : vector<5x4xf32>, vector<5x4xf32> -> vector<5x8xf32>
    %159 = vector.broadcast %7 : vector<1x8xf32> to vector<5x8xf32>
    %160 = arith.addf %158, %159 : vector<5x8xf32>
    %161 = vector.extract_strided_slice %1 {offsets = [0, 12], sizes = [5, 2], strides = [1, 1]} : vector<9x16xf32> to vector<5x2xf32>
    %162 = vector.extract_strided_slice %4 {offsets = [0, 0, 0, 0], sizes = [1, 1, 2, 4], strides = [1, 1, 1, 1]} : vector<5x2x2x4xf32> to vector<1x1x2x4xf32>
    %163 = vector.shape_cast %162 : vector<1x1x2x4xf32> to vector<2x4xf32>
    %cst_48 = arith.constant dense<0.000000e+00> : vector<5x4xf32>
    %164 = tpu.matmul %161, %163, %cst_48 {dimension_numbers = #tpu.dot_dimension_numbers<[1], [0], [0], [1], [0, 0, 1, 1], [], []>} : vector<5x2xf32>, vector<2x4xf32>, vector<5x4xf32> -> vector<5x4xf32>
    %165 = vector.extract_strided_slice %1 {offsets = [1, 12], sizes = [5, 2], strides = [1, 1]} : vector<9x16xf32> to vector<5x2xf32>
    %166 = vector.extract_strided_slice %4 {offsets = [1, 0, 0, 0], sizes = [1, 1, 2, 4], strides = [1, 1, 1, 1]} : vector<5x2x2x4xf32> to vector<1x1x2x4xf32>
    %167 = vector.shape_cast %166 : vector<1x1x2x4xf32> to vector<2x4xf32>
    %cst_49 = arith.constant dense<0.000000e+00> : vector<5x4xf32>
    %168 = tpu.matmul %165, %167, %cst_49 {dimension_numbers = #tpu.dot_dimension_numbers<[1], [0], [0], [1], [0, 0, 1, 1], [], []>} : vector<5x2xf32>, vector<2x4xf32>, vector<5x4xf32> -> vector<5x4xf32>
    %169 = arith.addf %164, %168 : vector<5x4xf32>
    %170 = vector.extract_strided_slice %1 {offsets = [2, 12], sizes = [5, 2], strides = [1, 1]} : vector<9x16xf32> to vector<5x2xf32>
    %171 = vector.extract_strided_slice %4 {offsets = [2, 0, 0, 0], sizes = [1, 1, 2, 4], strides = [1, 1, 1, 1]} : vector<5x2x2x4xf32> to vector<1x1x2x4xf32>
    %172 = vector.shape_cast %171 : vector<1x1x2x4xf32> to vector<2x4xf32>
    %cst_50 = arith.constant dense<0.000000e+00> : vector<5x4xf32>
    %173 = tpu.matmul %170, %172, %cst_50 {dimension_numbers = #tpu.dot_dimension_numbers<[1], [0], [0], [1], [0, 0, 1, 1], [], []>} : vector<5x2xf32>, vector<2x4xf32>, vector<5x4xf32> -> vector<5x4xf32>
    %174 = arith.addf %169, %173 : vector<5x4xf32>
    %175 = vector.extract_strided_slice %1 {offsets = [3, 12], sizes = [5, 2], strides = [1, 1]} : vector<9x16xf32> to vector<5x2xf32>
    %176 = vector.extract_strided_slice %4 {offsets = [3, 0, 0, 0], sizes = [1, 1, 2, 4], strides = [1, 1, 1, 1]} : vector<5x2x2x4xf32> to vector<1x1x2x4xf32>
    %177 = vector.shape_cast %176 : vector<1x1x2x4xf32> to vector<2x4xf32>
    %cst_51 = arith.constant dense<0.000000e+00> : vector<5x4xf32>
    %178 = tpu.matmul %175, %177, %cst_51 {dimension_numbers = #tpu.dot_dimension_numbers<[1], [0], [0], [1], [0, 0, 1, 1], [], []>} : vector<5x2xf32>, vector<2x4xf32>, vector<5x4xf32> -> vector<5x4xf32>
    %179 = arith.addf %174, %178 : vector<5x4xf32>
    %180 = vector.extract_strided_slice %1 {offsets = [4, 12], sizes = [5, 2], strides = [1, 1]} : vector<9x16xf32> to vector<5x2xf32>
    %181 = vector.extract_strided_slice %4 {offsets = [4, 0, 0, 0], sizes = [1, 1, 2, 4], strides = [1, 1, 1, 1]} : vector<5x2x2x4xf32> to vector<1x1x2x4xf32>
    %182 = vector.shape_cast %181 : vector<1x1x2x4xf32> to vector<2x4xf32>
    %cst_52 = arith.constant dense<0.000000e+00> : vector<5x4xf32>
    %183 = tpu.matmul %180, %182, %cst_52 {dimension_numbers = #tpu.dot_dimension_numbers<[1], [0], [0], [1], [0, 0, 1, 1], [], []>} : vector<5x2xf32>, vector<2x4xf32>, vector<5x4xf32> -> vector<5x4xf32>
    %184 = arith.addf %179, %183 : vector<5x4xf32>
    %185 = vector.extract_strided_slice %1 {offsets = [0, 14], sizes = [5, 2], strides = [1, 1]} : vector<9x16xf32> to vector<5x2xf32>
    %186 = vector.extract_strided_slice %4 {offsets = [0, 1, 0, 0], sizes = [1, 1, 2, 4], strides = [1, 1, 1, 1]} : vector<5x2x2x4xf32> to vector<1x1x2x4xf32>
    %187 = vector.shape_cast %186 : vector<1x1x2x4xf32> to vector<2x4xf32>
    %cst_53 = arith.constant dense<0.000000e+00> : vector<5x4xf32>
    %188 = tpu.matmul %185, %187, %cst_53 {dimension_numbers = #tpu.dot_dimension_numbers<[1], [0], [0], [1], [0, 0, 1, 1], [], []>} : vector<5x2xf32>, vector<2x4xf32>, vector<5x4xf32> -> vector<5x4xf32>
    %189 = vector.extract_strided_slice %1 {offsets = [1, 14], sizes = [5, 2], strides = [1, 1]} : vector<9x16xf32> to vector<5x2xf32>
    %190 = vector.extract_strided_slice %4 {offsets = [1, 1, 0, 0], sizes = [1, 1, 2, 4], strides = [1, 1, 1, 1]} : vector<5x2x2x4xf32> to vector<1x1x2x4xf32>
    %191 = vector.shape_cast %190 : vector<1x1x2x4xf32> to vector<2x4xf32>
    %cst_54 = arith.constant dense<0.000000e+00> : vector<5x4xf32>
    %192 = tpu.matmul %189, %191, %cst_54 {dimension_numbers = #tpu.dot_dimension_numbers<[1], [0], [0], [1], [0, 0, 1, 1], [], []>} : vector<5x2xf32>, vector<2x4xf32>, vector<5x4xf32> -> vector<5x4xf32>
    %193 = arith.addf %188, %192 : vector<5x4xf32>
    %194 = vector.extract_strided_slice %1 {offsets = [2, 14], sizes = [5, 2], strides = [1, 1]} : vector<9x16xf32> to vector<5x2xf32>
    %195 = vector.extract_strided_slice %4 {offsets = [2, 1, 0, 0], sizes = [1, 1, 2, 4], strides = [1, 1, 1, 1]} : vector<5x2x2x4xf32> to vector<1x1x2x4xf32>
    %196 = vector.shape_cast %195 : vector<1x1x2x4xf32> to vector<2x4xf32>
    %cst_55 = arith.constant dense<0.000000e+00> : vector<5x4xf32>
    %197 = tpu.matmul %194, %196, %cst_55 {dimension_numbers = #tpu.dot_dimension_numbers<[1], [0], [0], [1], [0, 0, 1, 1], [], []>} : vector<5x2xf32>, vector<2x4xf32>, vector<5x4xf32> -> vector<5x4xf32>
    %198 = arith.addf %193, %197 : vector<5x4xf32>
    %199 = vector.extract_strided_slice %1 {offsets = [3, 14], sizes = [5, 2], strides = [1, 1]} : vector<9x16xf32> to vector<5x2xf32>
    %200 = vector.extract_strided_slice %4 {offsets = [3, 1, 0, 0], sizes = [1, 1, 2, 4], strides = [1, 1, 1, 1]} : vector<5x2x2x4xf32> to vector<1x1x2x4xf32>
    %201 = vector.shape_cast %200 : vector<1x1x2x4xf32> to vector<2x4xf32>
    %cst_56 = arith.constant dense<0.000000e+00> : vector<5x4xf32>
    %202 = tpu.matmul %199, %201, %cst_56 {dimension_numbers = #tpu.dot_dimension_numbers<[1], [0], [0], [1], [0, 0, 1, 1], [], []>} : vector<5x2xf32>, vector<2x4xf32>, vector<5x4xf32> -> vector<5x4xf32>
    %203 = arith.addf %198, %202 : vector<5x4xf32>
    %204 = vector.extract_strided_slice %1 {offsets = [4, 14], sizes = [5, 2], strides = [1, 1]} : vector<9x16xf32> to vector<5x2xf32>
    %205 = vector.extract_strided_slice %4 {offsets = [4, 1, 0, 0], sizes = [1, 1, 2, 4], strides = [1, 1, 1, 1]} : vector<5x2x2x4xf32> to vector<1x1x2x4xf32>
    %206 = vector.shape_cast %205 : vector<1x1x2x4xf32> to vector<2x4xf32>
    %cst_57 = arith.constant dense<0.000000e+00> : vector<5x4xf32>
    %207 = tpu.matmul %204, %206, %cst_57 {dimension_numbers = #tpu.dot_dimension_numbers<[1], [0], [0], [1], [0, 0, 1, 1], [], []>} : vector<5x2xf32>, vector<2x4xf32>, vector<5x4xf32> -> vector<5x4xf32>
    %208 = arith.addf %203, %207 : vector<5x4xf32>
    %209 = tpu.concatenate %184, %208 in 1 : vector<5x4xf32>, vector<5x4xf32> -> vector<5x8xf32>
    %210 = vector.broadcast %7 : vector<1x8xf32> to vector<5x8xf32>
    %211 = arith.addf %209, %210 : vector<5x8xf32>
    %212 = tpu.concatenate %58, %109, %160, %211 in 1 : vector<5x8xf32>, vector<5x8xf32>, vector<5x8xf32>, vector<5x8xf32> -> vector<5x32xf32>
    %c0_58 = arith.constant 0 : index
    %c0_59 = arith.constant 0 : index
    %213 = vector.load %arg6[%c0_58, %c0_59] : memref<1x8xf32, #tpu.memory_space<vmem>>, vector<1x8xf32>
    %214 = vector.extract_strided_slice %3 {offsets = [0, 0], sizes = [5, 2], strides = [1, 1]} : vector<9x16xf32> to vector<5x2xf32>
    %215 = vector.extract_strided_slice %5 {offsets = [0, 0, 0, 0], sizes = [1, 1, 2, 8], strides = [1, 1, 1, 1]} : vector<5x1x2x8xf32> to vector<1x1x2x8xf32>
    %216 = vector.shape_cast %215 : vector<1x1x2x8xf32> to vector<2x8xf32>
    %cst_60 = arith.constant dense<0.000000e+00> : vector<5x8xf32>
    %217 = tpu.matmul %214, %216, %cst_60 {dimension_numbers = #tpu.dot_dimension_numbers<[1], [0], [0], [1], [0, 0, 1, 1], [], []>} : vector<5x2xf32>, vector<2x8xf32>, vector<5x8xf32> -> vector<5x8xf32>
    %218 = vector.extract_strided_slice %3 {offsets = [1, 0], sizes = [5, 2], strides = [1, 1]} : vector<9x16xf32> to vector<5x2xf32>
    %219 = vector.extract_strided_slice %5 {offsets = [1, 0, 0, 0], sizes = [1, 1, 2, 8], strides = [1, 1, 1, 1]} : vector<5x1x2x8xf32> to vector<1x1x2x8xf32>
    %220 = vector.shape_cast %219 : vector<1x1x2x8xf32> to vector<2x8xf32>
    %cst_61 = arith.constant dense<0.000000e+00> : vector<5x8xf32>
    %221 = tpu.matmul %218, %220, %cst_61 {dimension_numbers = #tpu.dot_dimension_numbers<[1], [0], [0], [1], [0, 0, 1, 1], [], []>} : vector<5x2xf32>, vector<2x8xf32>, vector<5x8xf32> -> vector<5x8xf32>
    %222 = arith.addf %217, %221 : vector<5x8xf32>
    %223 = vector.extract_strided_slice %3 {offsets = [2, 0], sizes = [5, 2], strides = [1, 1]} : vector<9x16xf32> to vector<5x2xf32>
    %224 = vector.extract_strided_slice %5 {offsets = [2, 0, 0, 0], sizes = [1, 1, 2, 8], strides = [1, 1, 1, 1]} : vector<5x1x2x8xf32> to vector<1x1x2x8xf32>
    %225 = vector.shape_cast %224 : vector<1x1x2x8xf32> to vector<2x8xf32>
    %cst_62 = arith.constant dense<0.000000e+00> : vector<5x8xf32>
    %226 = tpu.matmul %223, %225, %cst_62 {dimension_numbers = #tpu.dot_dimension_numbers<[1], [0], [0], [1], [0, 0, 1, 1], [], []>} : vector<5x2xf32>, vector<2x8xf32>, vector<5x8xf32> -> vector<5x8xf32>
    %227 = arith.addf %222, %226 : vector<5x8xf32>
    %228 = vector.extract_strided_slice %3 {offsets = [3, 0], sizes = [5, 2], strides = [1, 1]} : vector<9x16xf32> to vector<5x2xf32>
    %229 = vector.extract_strided_slice %5 {offsets = [3, 0, 0, 0], sizes = [1, 1, 2, 8], strides = [1, 1, 1, 1]} : vector<5x1x2x8xf32> to vector<1x1x2x8xf32>
    %230 = vector.shape_cast %229 : vector<1x1x2x8xf32> to vector<2x8xf32>
    %cst_63 = arith.constant dense<0.000000e+00> : vector<5x8xf32>
    %231 = tpu.matmul %228, %230, %cst_63 {dimension_numbers = #tpu.dot_dimension_numbers<[1], [0], [0], [1], [0, 0, 1, 1], [], []>} : vector<5x2xf32>, vector<2x8xf32>, vector<5x8xf32> -> vector<5x8xf32>
    %232 = arith.addf %227, %231 : vector<5x8xf32>
    %233 = vector.extract_strided_slice %3 {offsets = [4, 0], sizes = [5, 2], strides = [1, 1]} : vector<9x16xf32> to vector<5x2xf32>
    %234 = vector.extract_strided_slice %5 {offsets = [4, 0, 0, 0], sizes = [1, 1, 2, 8], strides = [1, 1, 1, 1]} : vector<5x1x2x8xf32> to vector<1x1x2x8xf32>
    %235 = vector.shape_cast %234 : vector<1x1x2x8xf32> to vector<2x8xf32>
    %cst_64 = arith.constant dense<0.000000e+00> : vector<5x8xf32>
    %236 = tpu.matmul %233, %235, %cst_64 {dimension_numbers = #tpu.dot_dimension_numbers<[1], [0], [0], [1], [0, 0, 1, 1], [], []>} : vector<5x2xf32>, vector<2x8xf32>, vector<5x8xf32> -> vector<5x8xf32>
    %237 = arith.addf %232, %236 : vector<5x8xf32>
    %238 = vector.broadcast %213 : vector<1x8xf32> to vector<5x8xf32>
    %239 = arith.addf %237, %238 : vector<5x8xf32>
    %240 = vector.extract_strided_slice %3 {offsets = [0, 4], sizes = [5, 2], strides = [1, 1]} : vector<9x16xf32> to vector<5x2xf32>
    %241 = vector.extract_strided_slice %5 {offsets = [0, 0, 0, 0], sizes = [1, 1, 2, 8], strides = [1, 1, 1, 1]} : vector<5x1x2x8xf32> to vector<1x1x2x8xf32>
    %242 = vector.shape_cast %241 : vector<1x1x2x8xf32> to vector<2x8xf32>
    %cst_65 = arith.constant dense<0.000000e+00> : vector<5x8xf32>
    %243 = tpu.matmul %240, %242, %cst_65 {dimension_numbers = #tpu.dot_dimension_numbers<[1], [0], [0], [1], [0, 0, 1, 1], [], []>} : vector<5x2xf32>, vector<2x8xf32>, vector<5x8xf32> -> vector<5x8xf32>
    %244 = vector.extract_strided_slice %3 {offsets = [1, 4], sizes = [5, 2], strides = [1, 1]} : vector<9x16xf32> to vector<5x2xf32>
    %245 = vector.extract_strided_slice %5 {offsets = [1, 0, 0, 0], sizes = [1, 1, 2, 8], strides = [1, 1, 1, 1]} : vector<5x1x2x8xf32> to vector<1x1x2x8xf32>
    %246 = vector.shape_cast %245 : vector<1x1x2x8xf32> to vector<2x8xf32>
    %cst_66 = arith.constant dense<0.000000e+00> : vector<5x8xf32>
    %247 = tpu.matmul %244, %246, %cst_66 {dimension_numbers = #tpu.dot_dimension_numbers<[1], [0], [0], [1], [0, 0, 1, 1], [], []>} : vector<5x2xf32>, vector<2x8xf32>, vector<5x8xf32> -> vector<5x8xf32>
    %248 = arith.addf %243, %247 : vector<5x8xf32>
    %249 = vector.extract_strided_slice %3 {offsets = [2, 4], sizes = [5, 2], strides = [1, 1]} : vector<9x16xf32> to vector<5x2xf32>
    %250 = vector.extract_strided_slice %5 {offsets = [2, 0, 0, 0], sizes = [1, 1, 2, 8], strides = [1, 1, 1, 1]} : vector<5x1x2x8xf32> to vector<1x1x2x8xf32>
    %251 = vector.shape_cast %250 : vector<1x1x2x8xf32> to vector<2x8xf32>
    %cst_67 = arith.constant dense<0.000000e+00> : vector<5x8xf32>
    %252 = tpu.matmul %249, %251, %cst_67 {dimension_numbers = #tpu.dot_dimension_numbers<[1], [0], [0], [1], [0, 0, 1, 1], [], []>} : vector<5x2xf32>, vector<2x8xf32>, vector<5x8xf32> -> vector<5x8xf32>
    %253 = arith.addf %248, %252 : vector<5x8xf32>
    %254 = vector.extract_strided_slice %3 {offsets = [3, 4], sizes = [5, 2], strides = [1, 1]} : vector<9x16xf32> to vector<5x2xf32>
    %255 = vector.extract_strided_slice %5 {offsets = [3, 0, 0, 0], sizes = [1, 1, 2, 8], strides = [1, 1, 1, 1]} : vector<5x1x2x8xf32> to vector<1x1x2x8xf32>
    %256 = vector.shape_cast %255 : vector<1x1x2x8xf32> to vector<2x8xf32>
    %cst_68 = arith.constant dense<0.000000e+00> : vector<5x8xf32>
    %257 = tpu.matmul %254, %256, %cst_68 {dimension_numbers = #tpu.dot_dimension_numbers<[1], [0], [0], [1], [0, 0, 1, 1], [], []>} : vector<5x2xf32>, vector<2x8xf32>, vector<5x8xf32> -> vector<5x8xf32>
    %258 = arith.addf %253, %257 : vector<5x8xf32>
    %259 = vector.extract_strided_slice %3 {offsets = [4, 4], sizes = [5, 2], strides = [1, 1]} : vector<9x16xf32> to vector<5x2xf32>
    %260 = vector.extract_strided_slice %5 {offsets = [4, 0, 0, 0], sizes = [1, 1, 2, 8], strides = [1, 1, 1, 1]} : vector<5x1x2x8xf32> to vector<1x1x2x8xf32>
    %261 = vector.shape_cast %260 : vector<1x1x2x8xf32> to vector<2x8xf32>
    %cst_69 = arith.constant dense<0.000000e+00> : vector<5x8xf32>
    %262 = tpu.matmul %259, %261, %cst_69 {dimension_numbers = #tpu.dot_dimension_numbers<[1], [0], [0], [1], [0, 0, 1, 1], [], []>} : vector<5x2xf32>, vector<2x8xf32>, vector<5x8xf32> -> vector<5x8xf32>
    %263 = arith.addf %258, %262 : vector<5x8xf32>
    %264 = vector.broadcast %213 : vector<1x8xf32> to vector<5x8xf32>
    %265 = arith.addf %263, %264 : vector<5x8xf32>
    %266 = vector.extract_strided_slice %3 {offsets = [0, 8], sizes = [5, 2], strides = [1, 1]} : vector<9x16xf32> to vector<5x2xf32>
    %267 = vector.extract_strided_slice %5 {offsets = [0, 0, 0, 0], sizes = [1, 1, 2, 8], strides = [1, 1, 1, 1]} : vector<5x1x2x8xf32> to vector<1x1x2x8xf32>
    %268 = vector.shape_cast %267 : vector<1x1x2x8xf32> to vector<2x8xf32>
    %cst_70 = arith.constant dense<0.000000e+00> : vector<5x8xf32>
    %269 = tpu.matmul %266, %268, %cst_70 {dimension_numbers = #tpu.dot_dimension_numbers<[1], [0], [0], [1], [0, 0, 1, 1], [], []>} : vector<5x2xf32>, vector<2x8xf32>, vector<5x8xf32> -> vector<5x8xf32>
    %270 = vector.extract_strided_slice %3 {offsets = [1, 8], sizes = [5, 2], strides = [1, 1]} : vector<9x16xf32> to vector<5x2xf32>
    %271 = vector.extract_strided_slice %5 {offsets = [1, 0, 0, 0], sizes = [1, 1, 2, 8], strides = [1, 1, 1, 1]} : vector<5x1x2x8xf32> to vector<1x1x2x8xf32>
    %272 = vector.shape_cast %271 : vector<1x1x2x8xf32> to vector<2x8xf32>
    %cst_71 = arith.constant dense<0.000000e+00> : vector<5x8xf32>
    %273 = tpu.matmul %270, %272, %cst_71 {dimension_numbers = #tpu.dot_dimension_numbers<[1], [0], [0], [1], [0, 0, 1, 1], [], []>} : vector<5x2xf32>, vector<2x8xf32>, vector<5x8xf32> -> vector<5x8xf32>
    %274 = arith.addf %269, %273 : vector<5x8xf32>
    %275 = vector.extract_strided_slice %3 {offsets = [2, 8], sizes = [5, 2], strides = [1, 1]} : vector<9x16xf32> to vector<5x2xf32>
    %276 = vector.extract_strided_slice %5 {offsets = [2, 0, 0, 0], sizes = [1, 1, 2, 8], strides = [1, 1, 1, 1]} : vector<5x1x2x8xf32> to vector<1x1x2x8xf32>
    %277 = vector.shape_cast %276 : vector<1x1x2x8xf32> to vector<2x8xf32>
    %cst_72 = arith.constant dense<0.000000e+00> : vector<5x8xf32>
    %278 = tpu.matmul %275, %277, %cst_72 {dimension_numbers = #tpu.dot_dimension_numbers<[1], [0], [0], [1], [0, 0, 1, 1], [], []>} : vector<5x2xf32>, vector<2x8xf32>, vector<5x8xf32> -> vector<5x8xf32>
    %279 = arith.addf %274, %278 : vector<5x8xf32>
    %280 = vector.extract_strided_slice %3 {offsets = [3, 8], sizes = [5, 2], strides = [1, 1]} : vector<9x16xf32> to vector<5x2xf32>
    %281 = vector.extract_strided_slice %5 {offsets = [3, 0, 0, 0], sizes = [1, 1, 2, 8], strides = [1, 1, 1, 1]} : vector<5x1x2x8xf32> to vector<1x1x2x8xf32>
    %282 = vector.shape_cast %281 : vector<1x1x2x8xf32> to vector<2x8xf32>
    %cst_73 = arith.constant dense<0.000000e+00> : vector<5x8xf32>
    %283 = tpu.matmul %280, %282, %cst_73 {dimension_numbers = #tpu.dot_dimension_numbers<[1], [0], [0], [1], [0, 0, 1, 1], [], []>} : vector<5x2xf32>, vector<2x8xf32>, vector<5x8xf32> -> vector<5x8xf32>
    %284 = arith.addf %279, %283 : vector<5x8xf32>
    %285 = vector.extract_strided_slice %3 {offsets = [4, 8], sizes = [5, 2], strides = [1, 1]} : vector<9x16xf32> to vector<5x2xf32>
    %286 = vector.extract_strided_slice %5 {offsets = [4, 0, 0, 0], sizes = [1, 1, 2, 8], strides = [1, 1, 1, 1]} : vector<5x1x2x8xf32> to vector<1x1x2x8xf32>
    %287 = vector.shape_cast %286 : vector<1x1x2x8xf32> to vector<2x8xf32>
    %cst_74 = arith.constant dense<0.000000e+00> : vector<5x8xf32>
    %288 = tpu.matmul %285, %287, %cst_74 {dimension_numbers = #tpu.dot_dimension_numbers<[1], [0], [0], [1], [0, 0, 1, 1], [], []>} : vector<5x2xf32>, vector<2x8xf32>, vector<5x8xf32> -> vector<5x8xf32>
    %289 = arith.addf %284, %288 : vector<5x8xf32>
    %290 = vector.broadcast %213 : vector<1x8xf32> to vector<5x8xf32>
    %291 = arith.addf %289, %290 : vector<5x8xf32>
    %292 = vector.extract_strided_slice %3 {offsets = [0, 12], sizes = [5, 2], strides = [1, 1]} : vector<9x16xf32> to vector<5x2xf32>
    %293 = vector.extract_strided_slice %5 {offsets = [0, 0, 0, 0], sizes = [1, 1, 2, 8], strides = [1, 1, 1, 1]} : vector<5x1x2x8xf32> to vector<1x1x2x8xf32>
    %294 = vector.shape_cast %293 : vector<1x1x2x8xf32> to vector<2x8xf32>
    %cst_75 = arith.constant dense<0.000000e+00> : vector<5x8xf32>
    %295 = tpu.matmul %292, %294, %cst_75 {dimension_numbers = #tpu.dot_dimension_numbers<[1], [0], [0], [1], [0, 0, 1, 1], [], []>} : vector<5x2xf32>, vector<2x8xf32>, vector<5x8xf32> -> vector<5x8xf32>
    %296 = vector.extract_strided_slice %3 {offsets = [1, 12], sizes = [5, 2], strides = [1, 1]} : vector<9x16xf32> to vector<5x2xf32>
    %297 = vector.extract_strided_slice %5 {offsets = [1, 0, 0, 0], sizes = [1, 1, 2, 8], strides = [1, 1, 1, 1]} : vector<5x1x2x8xf32> to vector<1x1x2x8xf32>
    %298 = vector.shape_cast %297 : vector<1x1x2x8xf32> to vector<2x8xf32>
    %cst_76 = arith.constant dense<0.000000e+00> : vector<5x8xf32>
    %299 = tpu.matmul %296, %298, %cst_76 {dimension_numbers = #tpu.dot_dimension_numbers<[1], [0], [0], [1], [0, 0, 1, 1], [], []>} : vector<5x2xf32>, vector<2x8xf32>, vector<5x8xf32> -> vector<5x8xf32>
    %300 = arith.addf %295, %299 : vector<5x8xf32>
    %301 = vector.extract_strided_slice %3 {offsets = [2, 12], sizes = [5, 2], strides = [1, 1]} : vector<9x16xf32> to vector<5x2xf32>
    %302 = vector.extract_strided_slice %5 {offsets = [2, 0, 0, 0], sizes = [1, 1, 2, 8], strides = [1, 1, 1, 1]} : vector<5x1x2x8xf32> to vector<1x1x2x8xf32>
    %303 = vector.shape_cast %302 : vector<1x1x2x8xf32> to vector<2x8xf32>
    %cst_77 = arith.constant dense<0.000000e+00> : vector<5x8xf32>
    %304 = tpu.matmul %301, %303, %cst_77 {dimension_numbers = #tpu.dot_dimension_numbers<[1], [0], [0], [1], [0, 0, 1, 1], [], []>} : vector<5x2xf32>, vector<2x8xf32>, vector<5x8xf32> -> vector<5x8xf32>
    %305 = arith.addf %300, %304 : vector<5x8xf32>
    %306 = vector.extract_strided_slice %3 {offsets = [3, 12], sizes = [5, 2], strides = [1, 1]} : vector<9x16xf32> to vector<5x2xf32>
    %307 = vector.extract_strided_slice %5 {offsets = [3, 0, 0, 0], sizes = [1, 1, 2, 8], strides = [1, 1, 1, 1]} : vector<5x1x2x8xf32> to vector<1x1x2x8xf32>
    %308 = vector.shape_cast %307 : vector<1x1x2x8xf32> to vector<2x8xf32>
    %cst_78 = arith.constant dense<0.000000e+00> : vector<5x8xf32>
    %309 = tpu.matmul %306, %308, %cst_78 {dimension_numbers = #tpu.dot_dimension_numbers<[1], [0], [0], [1], [0, 0, 1, 1], [], []>} : vector<5x2xf32>, vector<2x8xf32>, vector<5x8xf32> -> vector<5x8xf32>
    %310 = arith.addf %305, %309 : vector<5x8xf32>
    %311 = vector.extract_strided_slice %3 {offsets = [4, 12], sizes = [5, 2], strides = [1, 1]} : vector<9x16xf32> to vector<5x2xf32>
    %312 = vector.extract_strided_slice %5 {offsets = [4, 0, 0, 0], sizes = [1, 1, 2, 8], strides = [1, 1, 1, 1]} : vector<5x1x2x8xf32> to vector<1x1x2x8xf32>
    %313 = vector.shape_cast %312 : vector<1x1x2x8xf32> to vector<2x8xf32>
    %cst_79 = arith.constant dense<0.000000e+00> : vector<5x8xf32>
    %314 = tpu.matmul %311, %313, %cst_79 {dimension_numbers = #tpu.dot_dimension_numbers<[1], [0], [0], [1], [0, 0, 1, 1], [], []>} : vector<5x2xf32>, vector<2x8xf32>, vector<5x8xf32> -> vector<5x8xf32>
    %315 = arith.addf %310, %314 : vector<5x8xf32>
    %316 = vector.broadcast %213 : vector<1x8xf32> to vector<5x8xf32>
    %317 = arith.addf %315, %316 : vector<5x8xf32>
    %318 = tpu.concatenate %239, %265, %291, %317 in 1 : vector<5x8xf32>, vector<5x8xf32>, vector<5x8xf32>, vector<5x8xf32> -> vector<5x32xf32>
    %c0_80 = arith.constant 0 : index
    %c0_81 = arith.constant 0 : index
    %319 = vector.load %arg8[%c0_80, %c0_81] : memref<1x8xf32, #tpu.memory_space<vmem>>, vector<1x8xf32>
    %320 = vector.extract_strided_slice %3 {offsets = [0, 2], sizes = [5, 2], strides = [1, 1]} : vector<9x16xf32> to vector<5x2xf32>
    %321 = vector.extract_strided_slice %6 {offsets = [0, 0, 0, 0], sizes = [1, 1, 2, 8], strides = [1, 1, 1, 1]} : vector<5x1x2x8xf32> to vector<1x1x2x8xf32>
    %322 = vector.shape_cast %321 : vector<1x1x2x8xf32> to vector<2x8xf32>
    %cst_82 = arith.constant dense<0.000000e+00> : vector<5x8xf32>
    %323 = tpu.matmul %320, %322, %cst_82 {dimension_numbers = #tpu.dot_dimension_numbers<[1], [0], [0], [1], [0, 0, 1, 1], [], []>} : vector<5x2xf32>, vector<2x8xf32>, vector<5x8xf32> -> vector<5x8xf32>
    %324 = vector.extract_strided_slice %3 {offsets = [1, 2], sizes = [5, 2], strides = [1, 1]} : vector<9x16xf32> to vector<5x2xf32>
    %325 = vector.extract_strided_slice %6 {offsets = [1, 0, 0, 0], sizes = [1, 1, 2, 8], strides = [1, 1, 1, 1]} : vector<5x1x2x8xf32> to vector<1x1x2x8xf32>
    %326 = vector.shape_cast %325 : vector<1x1x2x8xf32> to vector<2x8xf32>
    %cst_83 = arith.constant dense<0.000000e+00> : vector<5x8xf32>
    %327 = tpu.matmul %324, %326, %cst_83 {dimension_numbers = #tpu.dot_dimension_numbers<[1], [0], [0], [1], [0, 0, 1, 1], [], []>} : vector<5x2xf32>, vector<2x8xf32>, vector<5x8xf32> -> vector<5x8xf32>
    %328 = arith.addf %323, %327 : vector<5x8xf32>
    %329 = vector.extract_strided_slice %3 {offsets = [2, 2], sizes = [5, 2], strides = [1, 1]} : vector<9x16xf32> to vector<5x2xf32>
    %330 = vector.extract_strided_slice %6 {offsets = [2, 0, 0, 0], sizes = [1, 1, 2, 8], strides = [1, 1, 1, 1]} : vector<5x1x2x8xf32> to vector<1x1x2x8xf32>
    %331 = vector.shape_cast %330 : vector<1x1x2x8xf32> to vector<2x8xf32>
    %cst_84 = arith.constant dense<0.000000e+00> : vector<5x8xf32>
    %332 = tpu.matmul %329, %331, %cst_84 {dimension_numbers = #tpu.dot_dimension_numbers<[1], [0], [0], [1], [0, 0, 1, 1], [], []>} : vector<5x2xf32>, vector<2x8xf32>, vector<5x8xf32> -> vector<5x8xf32>
    %333 = arith.addf %328, %332 : vector<5x8xf32>
    %334 = vector.extract_strided_slice %3 {offsets = [3, 2], sizes = [5, 2], strides = [1, 1]} : vector<9x16xf32> to vector<5x2xf32>
    %335 = vector.extract_strided_slice %6 {offsets = [3, 0, 0, 0], sizes = [1, 1, 2, 8], strides = [1, 1, 1, 1]} : vector<5x1x2x8xf32> to vector<1x1x2x8xf32>
    %336 = vector.shape_cast %335 : vector<1x1x2x8xf32> to vector<2x8xf32>
    %cst_85 = arith.constant dense<0.000000e+00> : vector<5x8xf32>
    %337 = tpu.matmul %334, %336, %cst_85 {dimension_numbers = #tpu.dot_dimension_numbers<[1], [0], [0], [1], [0, 0, 1, 1], [], []>} : vector<5x2xf32>, vector<2x8xf32>, vector<5x8xf32> -> vector<5x8xf32>
    %338 = arith.addf %333, %337 : vector<5x8xf32>
    %339 = vector.extract_strided_slice %3 {offsets = [4, 2], sizes = [5, 2], strides = [1, 1]} : vector<9x16xf32> to vector<5x2xf32>
    %340 = vector.extract_strided_slice %6 {offsets = [4, 0, 0, 0], sizes = [1, 1, 2, 8], strides = [1, 1, 1, 1]} : vector<5x1x2x8xf32> to vector<1x1x2x8xf32>
    %341 = vector.shape_cast %340 : vector<1x1x2x8xf32> to vector<2x8xf32>
    %cst_86 = arith.constant dense<0.000000e+00> : vector<5x8xf32>
    %342 = tpu.matmul %339, %341, %cst_86 {dimension_numbers = #tpu.dot_dimension_numbers<[1], [0], [0], [1], [0, 0, 1, 1], [], []>} : vector<5x2xf32>, vector<2x8xf32>, vector<5x8xf32> -> vector<5x8xf32>
    %343 = arith.addf %338, %342 : vector<5x8xf32>
    %344 = vector.broadcast %319 : vector<1x8xf32> to vector<5x8xf32>
    %345 = arith.addf %343, %344 : vector<5x8xf32>
    %346 = vector.extract_strided_slice %3 {offsets = [0, 6], sizes = [5, 2], strides = [1, 1]} : vector<9x16xf32> to vector<5x2xf32>
    %347 = vector.extract_strided_slice %6 {offsets = [0, 0, 0, 0], sizes = [1, 1, 2, 8], strides = [1, 1, 1, 1]} : vector<5x1x2x8xf32> to vector<1x1x2x8xf32>
    %348 = vector.shape_cast %347 : vector<1x1x2x8xf32> to vector<2x8xf32>
    %cst_87 = arith.constant dense<0.000000e+00> : vector<5x8xf32>
    %349 = tpu.matmul %346, %348, %cst_87 {dimension_numbers = #tpu.dot_dimension_numbers<[1], [0], [0], [1], [0, 0, 1, 1], [], []>} : vector<5x2xf32>, vector<2x8xf32>, vector<5x8xf32> -> vector<5x8xf32>
    %350 = vector.extract_strided_slice %3 {offsets = [1, 6], sizes = [5, 2], strides = [1, 1]} : vector<9x16xf32> to vector<5x2xf32>
    %351 = vector.extract_strided_slice %6 {offsets = [1, 0, 0, 0], sizes = [1, 1, 2, 8], strides = [1, 1, 1, 1]} : vector<5x1x2x8xf32> to vector<1x1x2x8xf32>
    %352 = vector.shape_cast %351 : vector<1x1x2x8xf32> to vector<2x8xf32>
    %cst_88 = arith.constant dense<0.000000e+00> : vector<5x8xf32>
    %353 = tpu.matmul %350, %352, %cst_88 {dimension_numbers = #tpu.dot_dimension_numbers<[1], [0], [0], [1], [0, 0, 1, 1], [], []>} : vector<5x2xf32>, vector<2x8xf32>, vector<5x8xf32> -> vector<5x8xf32>
    %354 = arith.addf %349, %353 : vector<5x8xf32>
    %355 = vector.extract_strided_slice %3 {offsets = [2, 6], sizes = [5, 2], strides = [1, 1]} : vector<9x16xf32> to vector<5x2xf32>
    %356 = vector.extract_strided_slice %6 {offsets = [2, 0, 0, 0], sizes = [1, 1, 2, 8], strides = [1, 1, 1, 1]} : vector<5x1x2x8xf32> to vector<1x1x2x8xf32>
    %357 = vector.shape_cast %356 : vector<1x1x2x8xf32> to vector<2x8xf32>
    %cst_89 = arith.constant dense<0.000000e+00> : vector<5x8xf32>
    %358 = tpu.matmul %355, %357, %cst_89 {dimension_numbers = #tpu.dot_dimension_numbers<[1], [0], [0], [1], [0, 0, 1, 1], [], []>} : vector<5x2xf32>, vector<2x8xf32>, vector<5x8xf32> -> vector<5x8xf32>
    %359 = arith.addf %354, %358 : vector<5x8xf32>
    %360 = vector.extract_strided_slice %3 {offsets = [3, 6], sizes = [5, 2], strides = [1, 1]} : vector<9x16xf32> to vector<5x2xf32>
    %361 = vector.extract_strided_slice %6 {offsets = [3, 0, 0, 0], sizes = [1, 1, 2, 8], strides = [1, 1, 1, 1]} : vector<5x1x2x8xf32> to vector<1x1x2x8xf32>
    %362 = vector.shape_cast %361 : vector<1x1x2x8xf32> to vector<2x8xf32>
    %cst_90 = arith.constant dense<0.000000e+00> : vector<5x8xf32>
    %363 = tpu.matmul %360, %362, %cst_90 {dimension_numbers = #tpu.dot_dimension_numbers<[1], [0], [0], [1], [0, 0, 1, 1], [], []>} : vector<5x2xf32>, vector<2x8xf32>, vector<5x8xf32> -> vector<5x8xf32>
    %364 = arith.addf %359, %363 : vector<5x8xf32>
    %365 = vector.extract_strided_slice %3 {offsets = [4, 6], sizes = [5, 2], strides = [1, 1]} : vector<9x16xf32> to vector<5x2xf32>
    %366 = vector.extract_strided_slice %6 {offsets = [4, 0, 0, 0], sizes = [1, 1, 2, 8], strides = [1, 1, 1, 1]} : vector<5x1x2x8xf32> to vector<1x1x2x8xf32>
    %367 = vector.shape_cast %366 : vector<1x1x2x8xf32> to vector<2x8xf32>
    %cst_91 = arith.constant dense<0.000000e+00> : vector<5x8xf32>
    %368 = tpu.matmul %365, %367, %cst_91 {dimension_numbers = #tpu.dot_dimension_numbers<[1], [0], [0], [1], [0, 0, 1, 1], [], []>} : vector<5x2xf32>, vector<2x8xf32>, vector<5x8xf32> -> vector<5x8xf32>
    %369 = arith.addf %364, %368 : vector<5x8xf32>
    %370 = vector.broadcast %319 : vector<1x8xf32> to vector<5x8xf32>
    %371 = arith.addf %369, %370 : vector<5x8xf32>
    %372 = vector.extract_strided_slice %3 {offsets = [0, 10], sizes = [5, 2], strides = [1, 1]} : vector<9x16xf32> to vector<5x2xf32>
    %373 = vector.extract_strided_slice %6 {offsets = [0, 0, 0, 0], sizes = [1, 1, 2, 8], strides = [1, 1, 1, 1]} : vector<5x1x2x8xf32> to vector<1x1x2x8xf32>
    %374 = vector.shape_cast %373 : vector<1x1x2x8xf32> to vector<2x8xf32>
    %cst_92 = arith.constant dense<0.000000e+00> : vector<5x8xf32>
    %375 = tpu.matmul %372, %374, %cst_92 {dimension_numbers = #tpu.dot_dimension_numbers<[1], [0], [0], [1], [0, 0, 1, 1], [], []>} : vector<5x2xf32>, vector<2x8xf32>, vector<5x8xf32> -> vector<5x8xf32>
    %376 = vector.extract_strided_slice %3 {offsets = [1, 10], sizes = [5, 2], strides = [1, 1]} : vector<9x16xf32> to vector<5x2xf32>
    %377 = vector.extract_strided_slice %6 {offsets = [1, 0, 0, 0], sizes = [1, 1, 2, 8], strides = [1, 1, 1, 1]} : vector<5x1x2x8xf32> to vector<1x1x2x8xf32>
    %378 = vector.shape_cast %377 : vector<1x1x2x8xf32> to vector<2x8xf32>
    %cst_93 = arith.constant dense<0.000000e+00> : vector<5x8xf32>
    %379 = tpu.matmul %376, %378, %cst_93 {dimension_numbers = #tpu.dot_dimension_numbers<[1], [0], [0], [1], [0, 0, 1, 1], [], []>} : vector<5x2xf32>, vector<2x8xf32>, vector<5x8xf32> -> vector<5x8xf32>
    %380 = arith.addf %375, %379 : vector<5x8xf32>
    %381 = vector.extract_strided_slice %3 {offsets = [2, 10], sizes = [5, 2], strides = [1, 1]} : vector<9x16xf32> to vector<5x2xf32>
    %382 = vector.extract_strided_slice %6 {offsets = [2, 0, 0, 0], sizes = [1, 1, 2, 8], strides = [1, 1, 1, 1]} : vector<5x1x2x8xf32> to vector<1x1x2x8xf32>
    %383 = vector.shape_cast %382 : vector<1x1x2x8xf32> to vector<2x8xf32>
    %cst_94 = arith.constant dense<0.000000e+00> : vector<5x8xf32>
    %384 = tpu.matmul %381, %383, %cst_94 {dimension_numbers = #tpu.dot_dimension_numbers<[1], [0], [0], [1], [0, 0, 1, 1], [], []>} : vector<5x2xf32>, vector<2x8xf32>, vector<5x8xf32> -> vector<5x8xf32>
    %385 = arith.addf %380, %384 : vector<5x8xf32>
    %386 = vector.extract_strided_slice %3 {offsets = [3, 10], sizes = [5, 2], strides = [1, 1]} : vector<9x16xf32> to vector<5x2xf32>
    %387 = vector.extract_strided_slice %6 {offsets = [3, 0, 0, 0], sizes = [1, 1, 2, 8], strides = [1, 1, 1, 1]} : vector<5x1x2x8xf32> to vector<1x1x2x8xf32>
    %388 = vector.shape_cast %387 : vector<1x1x2x8xf32> to vector<2x8xf32>
    %cst_95 = arith.constant dense<0.000000e+00> : vector<5x8xf32>
    %389 = tpu.matmul %386, %388, %cst_95 {dimension_numbers = #tpu.dot_dimension_numbers<[1], [0], [0], [1], [0, 0, 1, 1], [], []>} : vector<5x2xf32>, vector<2x8xf32>, vector<5x8xf32> -> vector<5x8xf32>
    %390 = arith.addf %385, %389 : vector<5x8xf32>
    %391 = vector.extract_strided_slice %3 {offsets = [4, 10], sizes = [5, 2], strides = [1, 1]} : vector<9x16xf32> to vector<5x2xf32>
    %392 = vector.extract_strided_slice %6 {offsets = [4, 0, 0, 0], sizes = [1, 1, 2, 8], strides = [1, 1, 1, 1]} : vector<5x1x2x8xf32> to vector<1x1x2x8xf32>
    %393 = vector.shape_cast %392 : vector<1x1x2x8xf32> to vector<2x8xf32>
    %cst_96 = arith.constant dense<0.000000e+00> : vector<5x8xf32>
    %394 = tpu.matmul %391, %393, %cst_96 {dimension_numbers = #tpu.dot_dimension_numbers<[1], [0], [0], [1], [0, 0, 1, 1], [], []>} : vector<5x2xf32>, vector<2x8xf32>, vector<5x8xf32> -> vector<5x8xf32>
    %395 = arith.addf %390, %394 : vector<5x8xf32>
    %396 = vector.broadcast %319 : vector<1x8xf32> to vector<5x8xf32>
    %397 = arith.addf %395, %396 : vector<5x8xf32>
    %398 = vector.extract_strided_slice %3 {offsets = [0, 14], sizes = [5, 2], strides = [1, 1]} : vector<9x16xf32> to vector<5x2xf32>
    %399 = vector.extract_strided_slice %6 {offsets = [0, 0, 0, 0], sizes = [1, 1, 2, 8], strides = [1, 1, 1, 1]} : vector<5x1x2x8xf32> to vector<1x1x2x8xf32>
    %400 = vector.shape_cast %399 : vector<1x1x2x8xf32> to vector<2x8xf32>
    %cst_97 = arith.constant dense<0.000000e+00> : vector<5x8xf32>
    %401 = tpu.matmul %398, %400, %cst_97 {dimension_numbers = #tpu.dot_dimension_numbers<[1], [0], [0], [1], [0, 0, 1, 1], [], []>} : vector<5x2xf32>, vector<2x8xf32>, vector<5x8xf32> -> vector<5x8xf32>
    %402 = vector.extract_strided_slice %3 {offsets = [1, 14], sizes = [5, 2], strides = [1, 1]} : vector<9x16xf32> to vector<5x2xf32>
    %403 = vector.extract_strided_slice %6 {offsets = [1, 0, 0, 0], sizes = [1, 1, 2, 8], strides = [1, 1, 1, 1]} : vector<5x1x2x8xf32> to vector<1x1x2x8xf32>
    %404 = vector.shape_cast %403 : vector<1x1x2x8xf32> to vector<2x8xf32>
    %cst_98 = arith.constant dense<0.000000e+00> : vector<5x8xf32>
    %405 = tpu.matmul %402, %404, %cst_98 {dimension_numbers = #tpu.dot_dimension_numbers<[1], [0], [0], [1], [0, 0, 1, 1], [], []>} : vector<5x2xf32>, vector<2x8xf32>, vector<5x8xf32> -> vector<5x8xf32>
    %406 = arith.addf %401, %405 : vector<5x8xf32>
    %407 = vector.extract_strided_slice %3 {offsets = [2, 14], sizes = [5, 2], strides = [1, 1]} : vector<9x16xf32> to vector<5x2xf32>
    %408 = vector.extract_strided_slice %6 {offsets = [2, 0, 0, 0], sizes = [1, 1, 2, 8], strides = [1, 1, 1, 1]} : vector<5x1x2x8xf32> to vector<1x1x2x8xf32>
    %409 = vector.shape_cast %408 : vector<1x1x2x8xf32> to vector<2x8xf32>
    %cst_99 = arith.constant dense<0.000000e+00> : vector<5x8xf32>
    %410 = tpu.matmul %407, %409, %cst_99 {dimension_numbers = #tpu.dot_dimension_numbers<[1], [0], [0], [1], [0, 0, 1, 1], [], []>} : vector<5x2xf32>, vector<2x8xf32>, vector<5x8xf32> -> vector<5x8xf32>
    %411 = arith.addf %406, %410 : vector<5x8xf32>
    %412 = vector.extract_strided_slice %3 {offsets = [3, 14], sizes = [5, 2], strides = [1, 1]} : vector<9x16xf32> to vector<5x2xf32>
    %413 = vector.extract_strided_slice %6 {offsets = [3, 0, 0, 0], sizes = [1, 1, 2, 8], strides = [1, 1, 1, 1]} : vector<5x1x2x8xf32> to vector<1x1x2x8xf32>
    %414 = vector.shape_cast %413 : vector<1x1x2x8xf32> to vector<2x8xf32>
    %cst_100 = arith.constant dense<0.000000e+00> : vector<5x8xf32>
    %415 = tpu.matmul %412, %414, %cst_100 {dimension_numbers = #tpu.dot_dimension_numbers<[1], [0], [0], [1], [0, 0, 1, 1], [], []>} : vector<5x2xf32>, vector<2x8xf32>, vector<5x8xf32> -> vector<5x8xf32>
    %416 = arith.addf %411, %415 : vector<5x8xf32>
    %417 = vector.extract_strided_slice %3 {offsets = [4, 14], sizes = [5, 2], strides = [1, 1]} : vector<9x16xf32> to vector<5x2xf32>
    %418 = vector.extract_strided_slice %6 {offsets = [4, 0, 0, 0], sizes = [1, 1, 2, 8], strides = [1, 1, 1, 1]} : vector<5x1x2x8xf32> to vector<1x1x2x8xf32>
    %419 = vector.shape_cast %418 : vector<1x1x2x8xf32> to vector<2x8xf32>
    %cst_101 = arith.constant dense<0.000000e+00> : vector<5x8xf32>
    %420 = tpu.matmul %417, %419, %cst_101 {dimension_numbers = #tpu.dot_dimension_numbers<[1], [0], [0], [1], [0, 0, 1, 1], [], []>} : vector<5x2xf32>, vector<2x8xf32>, vector<5x8xf32> -> vector<5x8xf32>
    %421 = arith.addf %416, %420 : vector<5x8xf32>
    %422 = vector.broadcast %319 : vector<1x8xf32> to vector<5x8xf32>
    %423 = arith.addf %421, %422 : vector<5x8xf32>
    %424 = tpu.concatenate %345, %371, %397, %423 in 1 : vector<5x8xf32>, vector<5x8xf32>, vector<5x8xf32>, vector<5x8xf32> -> vector<5x32xf32>
    %cst_102 = arith.constant dense<0xFF800000> : vector<5xf32>
    %425 = vector.multi_reduction <maximumf>, %212, %cst_102 [1] : vector<5x32xf32> to vector<5xf32>
    %426 = vector.shape_cast %425 : vector<5xf32> to vector<5x1xf32>
    %427 = vector.broadcast %426 : vector<5x1xf32> to vector<5x32xf32>
    %428 = arith.subf %212, %427 : vector<5x32xf32>
    %429 = math.exp %428 : vector<5x32xf32>
    %cst_103 = arith.constant dense<0.000000e+00> : vector<5xf32>
    %430 = vector.multi_reduction <add>, %429, %cst_103 [1] : vector<5x32xf32> to vector<5xf32>
    %431 = vector.shape_cast %430 : vector<5xf32> to vector<5x1xf32>
    %432 = vector.broadcast %431 : vector<5x1xf32> to vector<5x32xf32>
    %433 = arith.divf %429, %432 : vector<5x32xf32>
    %cst_104 = arith.constant dense<0xFF800000> : vector<32xf32>
    %434 = vector.multi_reduction <maximumf>, %318, %cst_104 [0] : vector<5x32xf32> to vector<32xf32>
    %435 = vector.shape_cast %434 : vector<32xf32> to vector<1x32xf32>
    %436 = vector.broadcast %435 : vector<1x32xf32> to vector<5x32xf32>
    %437 = arith.subf %318, %436 : vector<5x32xf32>
    %438 = math.exp %437 : vector<5x32xf32>
    %cst_105 = arith.constant dense<0.000000e+00> : vector<32xf32>
    %439 = vector.multi_reduction <add>, %438, %cst_105 [0] : vector<5x32xf32> to vector<32xf32>
    %440 = vector.shape_cast %439 : vector<32xf32> to vector<1x32xf32>
    %441 = vector.broadcast %440 : vector<1x32xf32> to vector<5x32xf32>
    %442 = arith.divf %438, %441 : vector<5x32xf32>
    %cst_106 = arith.constant dense<0.000000e+00> : vector<32x32xf32>
    %443 = tpu.matmul %442, %424, %cst_106 {dimension_numbers = #tpu.dot_dimension_numbers<[0], [0], [1], [1], [0, 1, 1, 1], [], []>} : vector<5x32xf32>, vector<5x32xf32>, vector<32x32xf32> -> vector<32x32xf32>
    %cst_107 = arith.constant dense<0.000000e+00> : vector<5x32xf32>
    %444 = tpu.matmul %433, %443, %cst_107 {dimension_numbers = #tpu.dot_dimension_numbers<[1], [0], [0], [1], [0, 0, 1, 1], [], []>} : vector<5x32xf32>, vector<32x32xf32>, vector<5x32xf32> -> vector<5x32xf32>
    %c0_108 = arith.constant 0 : index
    %c0_109 = arith.constant 0 : index
    %445 = vector.load %arg9[%c0_108, %c0_109] : memref<24x4xf32, #tpu.memory_space<vmem>>, vector<24x4xf32>
    %c0_110 = arith.constant 0 : index
    %c0_111 = arith.constant 0 : index
    %446 = vector.load %arg10[%c0_110, %c0_111] : memref<1x4xf32, #tpu.memory_space<vmem>>, vector<1x4xf32>
    %cst_112 = arith.constant 0.000000e+00 : f32
    %447 = vector.broadcast %cst_112 : f32 to vector<1x8xf32>
    %448 = vector.extract_strided_slice %444 {offsets = [0, 24], sizes = [4, 8], strides = [1, 1]} : vector<5x32xf32> to vector<4x8xf32>
    %449 = tpu.concatenate %447, %448 in 0 : vector<1x8xf32>, vector<4x8xf32> -> vector<5x8xf32>
    %450 = vector.extract_strided_slice %444 {offsets = [0, 0], sizes = [5, 8], strides = [1, 1]} : vector<5x32xf32> to vector<5x8xf32>
    %451 = vector.extract_strided_slice %444 {offsets = [0, 8], sizes = [5, 8], strides = [1, 1]} : vector<5x32xf32> to vector<5x8xf32>
    %452 = tpu.concatenate %449, %450, %451 in 1 : vector<5x8xf32>, vector<5x8xf32>, vector<5x8xf32> -> vector<5x24xf32>
    %cst_113 = arith.constant dense<0.000000e+00> : vector<5x4xf32>
    %453 = tpu.matmul %452, %445, %cst_113 {dimension_numbers = #tpu.dot_dimension_numbers<[1], [0], [0], [1], [0, 0, 1, 1], [], []>} : vector<5x24xf32>, vector<24x4xf32>, vector<5x4xf32> -> vector<5x4xf32>
    %454 = vector.broadcast %446 : vector<1x4xf32> to vector<5x4xf32>
    %455 = arith.addf %453, %454 : vector<5x4xf32>
    %456 = vector.extract_strided_slice %444 {offsets = [0, 0], sizes = [5, 8], strides = [1, 1]} : vector<5x32xf32> to vector<5x8xf32>
    %457 = vector.extract_strided_slice %444 {offsets = [0, 8], sizes = [5, 8], strides = [1, 1]} : vector<5x32xf32> to vector<5x8xf32>
    %458 = vector.extract_strided_slice %444 {offsets = [0, 16], sizes = [5, 8], strides = [1, 1]} : vector<5x32xf32> to vector<5x8xf32>
    %459 = tpu.concatenate %456, %457, %458 in 1 : vector<5x8xf32>, vector<5x8xf32>, vector<5x8xf32> -> vector<5x24xf32>
    %cst_114 = arith.constant dense<0.000000e+00> : vector<5x4xf32>
    %460 = tpu.matmul %459, %445, %cst_114 {dimension_numbers = #tpu.dot_dimension_numbers<[1], [0], [0], [1], [0, 0, 1, 1], [], []>} : vector<5x24xf32>, vector<24x4xf32>, vector<5x4xf32> -> vector<5x4xf32>
    %461 = vector.broadcast %446 : vector<1x4xf32> to vector<5x4xf32>
    %462 = arith.addf %460, %461 : vector<5x4xf32>
    %463 = vector.extract_strided_slice %444 {offsets = [0, 8], sizes = [5, 8], strides = [1, 1]} : vector<5x32xf32> to vector<5x8xf32>
    %464 = vector.extract_strided_slice %444 {offsets = [0, 16], sizes = [5, 8], strides = [1, 1]} : vector<5x32xf32> to vector<5x8xf32>
    %465 = vector.extract_strided_slice %444 {offsets = [0, 24], sizes = [5, 8], strides = [1, 1]} : vector<5x32xf32> to vector<5x8xf32>
    %466 = tpu.concatenate %463, %464, %465 in 1 : vector<5x8xf32>, vector<5x8xf32>, vector<5x8xf32> -> vector<5x24xf32>
    %cst_115 = arith.constant dense<0.000000e+00> : vector<5x4xf32>
    %467 = tpu.matmul %466, %445, %cst_115 {dimension_numbers = #tpu.dot_dimension_numbers<[1], [0], [0], [1], [0, 0, 1, 1], [], []>} : vector<5x24xf32>, vector<24x4xf32>, vector<5x4xf32> -> vector<5x4xf32>
    %468 = vector.broadcast %446 : vector<1x4xf32> to vector<5x4xf32>
    %469 = arith.addf %467, %468 : vector<5x4xf32>
    %470 = vector.extract_strided_slice %444 {offsets = [0, 16], sizes = [5, 8], strides = [1, 1]} : vector<5x32xf32> to vector<5x8xf32>
    %471 = vector.extract_strided_slice %444 {offsets = [0, 24], sizes = [5, 8], strides = [1, 1]} : vector<5x32xf32> to vector<5x8xf32>
    %472 = vector.extract_strided_slice %444 {offsets = [1, 0], sizes = [4, 8], strides = [1, 1]} : vector<5x32xf32> to vector<4x8xf32>
    %473 = tpu.concatenate %472, %447 in 0 : vector<4x8xf32>, vector<1x8xf32> -> vector<5x8xf32>
    %474 = tpu.concatenate %470, %471, %473 in 1 : vector<5x8xf32>, vector<5x8xf32>, vector<5x8xf32> -> vector<5x24xf32>
    %cst_116 = arith.constant dense<0.000000e+00> : vector<5x4xf32>
    %475 = tpu.matmul %474, %445, %cst_116 {dimension_numbers = #tpu.dot_dimension_numbers<[1], [0], [0], [1], [0, 0, 1, 1], [], []>} : vector<5x24xf32>, vector<24x4xf32>, vector<5x4xf32> -> vector<5x4xf32>
    %476 = vector.broadcast %446 : vector<1x4xf32> to vector<5x4xf32>
    %477 = arith.addf %475, %476 : vector<5x4xf32>
    %478 = tpu.concatenate %455, %462, %469, %477 in 1 : vector<5x4xf32>, vector<5x4xf32>, vector<5x4xf32>, vector<5x4xf32> -> vector<5x16xf32>
    %c0_117 = arith.constant 0 : index
    %c0_118 = arith.constant 0 : index
    %c0_119 = arith.constant 0 : index
    %479 = vector.load %arg11[%c0_117, %c0_118, %c0_119] : memref<1x5x16xf32, #tpu.memory_space<vmem>>, vector<1x5x16xf32>
    %480 = vector.shape_cast %479 : vector<1x5x16xf32> to vector<5x16xf32>
    %481 = vector.shape_cast %478 : vector<5x16xf32> to vector<1x5x16xf32>
    tpu.vector_store %arg11[%c0_117, %c0_118, %c0_119], %481 {strides = array<i32>} : memref<1x5x16xf32, #tpu.memory_space<vmem>>, vector<1x5x16xf32>,
    return
  }
  func.func @transform_0(%arg0: i32) -> (i32, i32, i32) {
    %c0_i32 = arith.constant 0 : i32
    %c0_i32_0 = arith.constant 0 : i32
    %c0_i32_1 = arith.constant 0 : i32
    return %arg0, %c0_i32, %c0_i32_0 : i32, i32, i32
  }
  func.func @transform_1(%arg0: i32) -> (i32, i32, i32) {
    %c0_i32 = arith.constant 0 : i32
    %c0_i32_0 = arith.constant 0 : i32
    %c0_i32_1 = arith.constant 0 : i32
    return %arg0, %c0_i32, %c0_i32_0 : i32, i32, i32
  }
  func.func @transform_2(%arg0: i32) -> (i32, i32, i32, i32) {
    %c0_i32 = arith.constant 0 : i32
    %c0_i32_0 = arith.constant 0 : i32
    %c0_i32_1 = arith.constant 0 : i32
    %c0_i32_2 = arith.constant 0 : i32
    %c0_i32_3 = arith.constant 0 : i32
    return %c0_i32, %c0_i32_0, %c0_i32_1, %c0_i32_2 : i32, i32, i32, i32
  }
  func.func @transform_3(%arg0: i32) -> (i32, i32) {
    %c0_i32 = arith.constant 0 : i32
    %c0_i32_0 = arith.constant 0 : i32
    %c0_i32_1 = arith.constant 0 : i32
    return %c0_i32, %c0_i32_0 : i32, i32
  }
  func.func @transform_4(%arg0: i32) -> (i32, i32, i32, i32) {
    %c0_i32 = arith.constant 0 : i32
    %c0_i32_0 = arith.constant 0 : i32
    %c0_i32_1 = arith.constant 0 : i32
    %c0_i32_2 = arith.constant 0 : i32
    %c0_i32_3 = arith.constant 0 : i32
    return %c0_i32, %c0_i32_0, %c0_i32_1, %c0_i32_2 : i32, i32, i32, i32
  }
  func.func @transform_5(%arg0: i32) -> (i32, i32) {
    %c0_i32 = arith.constant 0 : i32
    %c0_i32_0 = arith.constant 0 : i32
    %c0_i32_1 = arith.constant 0 : i32
    return %c0_i32, %c0_i32_0 : i32, i32
  }
  func.func @transform_6(%arg0: i32) -> (i32, i32, i32, i32) {
    %c0_i32 = arith.constant 0 : i32
    %c0_i32_0 = arith.constant 0 : i32
    %c0_i32_1 = arith.constant 0 : i32
    %c0_i32_2 = arith.constant 0 : i32
    %c0_i32_3 = arith.constant 0 : i32
    return %c0_i32, %c0_i32_0, %c0_i32_1, %c0_i32_2 : i32, i32, i32, i32
  }
  func.func @transform_7(%arg0: i32) -> (i32, i32) {
    %c0_i32 = arith.constant 0 : i32
    %c0_i32_0 = arith.constant 0 : i32
    %c0_i32_1 = arith.constant 0 : i32
    return %c0_i32, %c0_i32_0 : i32, i32
  }
  func.func @transform_8(%arg0: i32) -> (i32, i32) {
    %c0_i32 = arith.constant 0 : i32
    %c0_i32_0 = arith.constant 0 : i32
    %c0_i32_1 = arith.constant 0 : i32
    return %c0_i32, %c0_i32_0 : i32, i32
  }
  func.func @transform_9(%arg0: i32) -> (i32, i32) {
    %c0_i32 = arith.constant 0 : i32
    %c0_i32_0 = arith.constant 0 : i32
    %c0_i32_1 = arith.constant 0 : i32
    return %c0_i32, %c0_i32_0 : i32, i32
  }
  func.func @transform_10(%arg0: i32) -> (i32, i32, i32) {
    %c0_i32 = arith.constant 0 : i32
    %c0_i32_0 = arith.constant 0 : i32
    %c0_i32_1 = arith.constant 0 : i32
    return %arg0, %c0_i32, %c0_i32_0 : i32, i32, i32
  }
}

</mosaic_0001>

<bundles_post_ra>
// kernel: tpu_custom_call.1
= control target key start
LH: loop header
LB: loop body
LE: loop exit
PB: predicated region body
PF: predicated region fallthrough
CT: control target
= control target key end

     0   :  { %s10246_s0 = inlined_call_operand.hbm [shape: f32[2,9,16], index: 0, kind: input, shape index: {}]   ;;  %s10247_s1 = inlined_call_operand.hbm [shape: f32[2,9,16], index: 1, kind: input, shape index: {}]   ;;  %s10248_s2 = inlined_call_operand.hbm [shape: f32[5,2,2,4], index: 2, kind: input, shape index: {}]   ;;  %s10249_s3 = inlined_call_operand.hbm [shape: f32[1,8], index: 3, kind: input, shape index: {}]   ;;  %s10250_s4 = inlined_call_operand.hbm [shape: f32[5,1,2,8], index: 4, kind: input, shape index: {}]   ;;  %s10251_s5 = inlined_call_operand.hbm [shape: f32[1,8], index: 5, kind: input, shape index: {}]   ;;  %s10252_s6 = inlined_call_operand.hbm [shape: f32[5,1,2,8], index: 6, kind: input, shape index: {}]   ;;  %s10253_s7 = inlined_call_operand.hbm [shape: f32[1,8], index: 7, kind: input, shape index: {}]   ;;  %s10254_s8 = inlined_call_operand.hbm [shape: f32[24,4], index: 8, kind: input, shape index: {}]   ;;  %s10255_s9 = inlined_call_operand.hbm [shape: f32[1,4], index: 9, kind: input, shape index: {}]   ;;  %s10256_s10 = inlined_call_operand.hbm [shape: f32[2,5,16], index: 10, kind: output, shape index: {}]  }
   0x1   :  { %10268 = sst [smem:[#allocation29_spill]] %s10246_s0 }
   0x2   :  { %10269 = sst [smem:[#allocation30_spill]] %s10248_s2 }
   0x3   :  { %10270 = sst [smem:[#allocation31_spill]] %s10249_s3 }
   0x4   :  { %10271 = sst [smem:[#allocation32_spill]] %s10250_s4 }
   0x5   :  { %10272 = sst [smem:[#allocation33_spill]] %s10251_s5 }
   0x6   :  { %10273 = sst [smem:[#allocation34_spill]] %s10256_s10 }
   0x7   :  { %15 = vsyncpa [#allocation3], 0 }
   0x8   :  { %17 = vsyncpa [#allocation3 + $0x1], 0 }
   0x9   :  { %18 = vsyncpa [#allocation6], 0 }
   0xa   :  { %20 = vsyncpa [#allocation6 + $0x1], 0 }
   0xb   :  { %21 = vsyncpa [#allocation9], 0 }
   0xc   :  { %22 = vsyncpa [#allocation12], 0 }
   0xd   :  { %23 = vsyncpa [#allocation15], 0 }
   0xe   :  { %24 = vsyncpa [#allocation18], 0 }
   0xf   :  { %25 = vsyncpa [#allocation4], 0 }
  0x10   :  { %27 = vsyncpa [#allocation4 + $0x1], 0  ;;  %s9003_s13 = smov 0   ;;  %s9005_s14 = smov 0  }
  0x11   :  { %s9007_s15 = smov 0   ;;  %s9009_s16 = smov 0  }
  0x12 LB: > { %s8916_s17 = smov [#allocation7]   ;;  %s9024_s19 = sadd.s32 4294967295, %s8914_s16   ;;  %s8914_s16 = sphi %s9009_s16, %s10311_s16   ;;  %s8910_s15 = sphi %s9007_s15, %s10310_s15   ;;  %s8906_s14 = sphi %s9005_s14, %s10309_s14   ;;  %s8902_s13 = sphi %s9003_s13, %s10308_s13  }
  0x13   : > { %s296_s18 = sshll.u32 %s8916_s17, 4  ;;  %p7448_p0 = scmp.ge.s32.totalorder %s8914_s16, 1  ;;  %s9029_s18 = int_to_ptr.vmem [resolvable:$true] %s296_s18 }
  0x14   : > { %p10261_p1 = scmp.eq.s32.totalorder %s9024_s19, 0  ;;  %p284_p2 = scmp.lt.s32.totalorder %s8914_s16, 3 }
  0x15   : > { %s8917_s21 = smov [#allocation8]   ;;  %s8918_s24 = smov [#allocation11]  }
  0x16   : > { %p9031_p3 = pnand %p7448_p0, %p284_p2  ;;  %s310_s22 = sshll.u32 %s8917_s21, 4  ;;  %s9044_s22 = int_to_ptr.vmem [resolvable:$true] %s310_s22 }
  0x17   : > { %s334_s25 = sshll.u32 %s8918_s24, 4  ;;  %s10277_s2 = sld [smem:[#allocation30_spill]]  ;;  %s9046_s25 = int_to_ptr.vmem [resolvable:$true] %s334_s25 }
  0x18   : > { %s10274_s20 = scalar_select %p9031_p3, 1, 0 }
  0x19   : > { %p8417_p5 = pneg %p9031_p3 }
  0x1a   : > { %10275 = sst [smem:[#allocation28_spill]] %s10274_s20 }
  0x1b   : > { %p9040_p6 = pnand %p8417_p5, %p10261_p1 }
  0x1d   : > { %s8540_s28 = scalar_lea.hbm %s10277_s2, 320  ;;  %p9056_p8 = pneg %p9040_p6 }
  0x1e   : > { %p8541_p7 = scmp.ne.s32.totalorder %s10277_s2, %s8540_s28  ;;  %p8547_p11 = scmp.lt.u32.totalorder %s8540_s28, %s10277_s2 }
  0x20   : > { %p8543_p9 = pnand %p9056_p8, %p8541_p7 }
  0x22   : > { %p8544_p10 = pneg %p8543_p9 }
  0x24   : > { %p8549_p12 = pnand %p8547_p11, %p8544_p10 }
  0x26   : > { %8552 = shalt.err (!%p8549_p12)
}
  0x27   : > { %s8553_s21 = scalar_lea.vmem %s9029_s18, 320  ;;  %p8561_p5 = scmp.lt.s32.totalorder %s9029_s18, %s9029_s18 }
  0x28   : > { %p8554_p13 = scmp.ne.s32.totalorder %s9029_s18, %s8553_s21  ;;  %p8562_p4 = scmp.lt.s32.totalorder %s8553_s21, %s8553_s21 }
  0x2a   : > { %p8556_p0 = pnand %p8554_p13, %p9056_p8  ;;  %p8563_p7 = por %p8562_p4, %p8561_p5 }
  0x2c   : > { %p8557_p2 = pneg %p8556_p0 }
  0x2e   : > { %p8564_p9 = pnand %p8563_p7, %p8557_p2 }
  0x30   : > { %8567 = shalt.err (!%p8564_p9)
}
  0x31   : > { %s10259_s24 = smov 32   ;;  %s8920_s26 = smov 2  }
  0x32   : > { %8420 = dma.hbm_to_vmem [thread:$0]  (!%p9040_p6), %s10277_s2, 320, %s9029_s18, [#allocation6], %s10259_s24, %s10259_s24, %s8920_s26  }
  0x33   : > { %s10279_s3 = sld [smem:[#allocation31_spill]] }
  0x39   : > { %s8568_s12 = scalar_lea.hbm %s10279_s3, 16 }
  0x3a   : > { %p8569_p4 = scmp.ne.s32.totalorder %s10279_s3, %s8568_s12  ;;  %p8575_p12 = scmp.lt.u32.totalorder %s8568_s12, %s10279_s3 }
  0x3c   : > { %p8571_p10 = pnand %p8569_p4, %p9056_p8 }
  0x3e   : > { %p8572_p11 = pneg %p8571_p10 }
  0x40   : > { %p8577_p13 = pnand %p8575_p12, %p8572_p11 }
  0x42   : > { %8580 = shalt.err (!%p8577_p13)
}
  0x43   : > { %s8581_s18 = scalar_lea.vmem %s9044_s22, 16  ;;  %s8588_s27 = scalar_lea.vmem %s9044_s22, 32 }
  0x44   : > { %p8582_p0 = scmp.ne.s32.totalorder %s9044_s22, %s8581_s18  ;;  %p8589_p7 = scmp.lt.s32.totalorder %s9044_s22, %s9044_s22 }
  0x45   : > { %p8590_p9 = scmp.lt.s32.totalorder %s8588_s27, %s8581_s18 }
  0x46   : > { %p8584_p2 = pnand %p8582_p0, %p9056_p8 }
  0x47   : > { %p8591_p4 = por %p8590_p9, %p8589_p7 }
  0x48   : > { %p8585_p5 = pneg %p8584_p2 }
  0x4a   : > { %p8592_p10 = pnand %p8591_p4, %p8585_p5 }
  0x4c   : > { %8595 = shalt.err (!%p8592_p10)
}
  0x4d   : > { %8423 = dma.hbm_to_vmem [thread:$0]  (!%p9040_p6), %s10279_s3, 16, %s9044_s22, [#allocation9]  }
  0x4e   : > { %s10280_s5 = sld [smem:[#allocation33_spill]] }
  0x54   : > { %s8596_s30 = scalar_lea.hbm %s10280_s5, 16 }
  0x55   : > { %p8597_p11 = scmp.ne.s32.totalorder %s10280_s5, %s8596_s30  ;;  %p8603_p0 = scmp.lt.u32.totalorder %s8596_s30, %s10280_s5 }
  0x57   : > { %p8599_p12 = pnand %p8597_p11, %p9056_p8 }
  0x59   : > { %p8600_p13 = pneg %p8599_p12 }
  0x5b   : > { %p8605_p2 = pnand %p8603_p0, %p8600_p13 }
  0x5d   : > { %8608 = shalt.err (!%p8605_p2)
}
  0x5e   : > { %s8609_s22 = scalar_lea.vmem %s9046_s25, 16  ;;  %s8616_s27 = scalar_lea.vmem %s9046_s25, 32 }
  0x5f   : > { %p8610_p5 = scmp.ne.s32.totalorder %s9046_s25, %s8609_s22  ;;  %p8617_p4 = scmp.lt.s32.totalorder %s9046_s25, %s9046_s25 }
  0x60   : > { %p8618_p10 = scmp.lt.s32.totalorder %s8616_s27, %s8609_s22 }
  0x61   : > { %p8612_p7 = pnand %p8610_p5, %p9056_p8 }
  0x62   : > { %p8619_p11 = por %p8618_p10, %p8617_p4 }
  0x63   : > { %p8613_p9 = pneg %p8612_p7 }
  0x65   : > { %p8620_p12 = pnand %p8619_p11, %p8613_p9 }
  0x67   : > { %8623 = shalt.err (!%p8620_p12)
}
  0x68   : > { %8429 = dma.hbm_to_vmem [thread:$0]  (!%p9040_p6), %s10280_s5, 16, %s9046_s25, [#allocation12]  }
  0x69   : > { %s8921_s28 = smov [#allocation14]   ;;  %s8922_s30 = smov [#allocation10]  }
  0x6a   : > { %s358_s29 = sshll.u32 %s8921_s28, 4  ;;  %s320_s12 = sshll.u32 %s8922_s30, 4  ;;  %s359_s29 = int_to_ptr.vmem [resolvable:$true] %s358_s29  ;;  %s321_s12 = int_to_ptr.vmem [resolvable:$true] %s320_s12 }
  0x6b   : > { %s8624_s18 = scalar_lea.hbm %s10253_s7, 16 }
  0x6c   : > { %p8625_p13 = scmp.ne.s32.totalorder %s10253_s7, %s8624_s18  ;;  %p8631_p5 = scmp.lt.u32.totalorder %s8624_s18, %s10253_s7 }
  0x6e   : > { %p8627_p0 = pnand %p8625_p13, %p9056_p8 }
  0x70   : > { %p8628_p2 = pneg %p8627_p0 }
  0x72   : > { %p8633_p7 = pnand %p8631_p5, %p8628_p2 }
  0x74   : > { %8636 = shalt.err (!%p8633_p7)
}
  0x75   : > { %s8637_s25 = scalar_lea.vmem %s359_s29, 16  ;;  %s8644_s20 = scalar_lea.vmem %s359_s29, 32 }
  0x76   : > { %p8638_p9 = scmp.ne.s32.totalorder %s359_s29, %s8637_s25  ;;  %p8645_p11 = scmp.lt.s32.totalorder %s359_s29, %s359_s29 }
  0x77   : > { %p8646_p12 = scmp.lt.s32.totalorder %s8644_s20, %s8637_s25 }
  0x78   : > { %p8640_p4 = pnand %p8638_p9, %p9056_p8 }
  0x79   : > { %p8647_p1 = por %p8646_p12, %p8645_p11 }
  0x7a   : > { %p8641_p10 = pneg %p8640_p4 }
  0x7c   : > { %p8648_p3 = pnand %p8647_p1, %p8641_p10 }
  0x7e   : > { %8651 = shalt.err (!%p8648_p3)
}
  0x7f   : > { %8435 = dma.hbm_to_vmem [thread:$0]  (!%p9040_p6), %s10253_s7, 16, %s359_s29, [#allocation15]  }
  0x80   : > { %s10281_s4 = sld [smem:[#allocation32_spill]] }
  0x86   : > { %s8652_s21 = scalar_lea.hbm %s10281_s4, 160 }
  0x87   : > { %p8653_p13 = scmp.ne.s32.totalorder %s10281_s4, %s8652_s21  ;;  %p8659_p3 = scmp.lt.u32.totalorder %s8652_s21, %s10281_s4 }
  0x89   : > { %p8655_p0 = pnand %p8653_p13, %p9056_p8 }
  0x8b   : > { %p8656_p1 = pneg %p8655_p0 }
  0x8d   : > { %p8661_p2 = pnand %p8659_p3, %p8656_p1 }
  0x8f   : > { %8664 = shalt.err (!%p8661_p2)
}
  0x90   : > { %s8665_s25 = scalar_lea.vmem %s321_s12, 160  ;;  %p8673_p4 = scmp.lt.s32.totalorder %s321_s12, %s321_s12 }
  0x91   : > { %p8666_p5 = scmp.ne.s32.totalorder %s321_s12, %s8665_s25  ;;  %p8674_p10 = scmp.lt.s32.totalorder %s8665_s25, %s8665_s25 }
  0x93   : > { %p8668_p7 = pnand %p8666_p5, %p9056_p8  ;;  %p8675_p11 = por %p8674_p10, %p8673_p4 }
  0x95   : > { %p8669_p9 = pneg %p8668_p7 }
  0x97   : > { %p8676_p12 = pnand %p8675_p11, %p8669_p9 }
  0x99   : > { %8679 = shalt.err (!%p8676_p12)
}
  0x9a   : > { %s10282_s29 = smov 32   ;;  %s8923_s30 = smov [#allocation13]  }
  0x9b   : > { %8426 = dma.hbm_to_vmem [thread:$0]  (!%p9040_p6), %s10281_s4, 160, %s321_s12, [#allocation9], %s10282_s29, %s10282_s29, %s8920_s26  }
  0x9c   : > { %s344_s24 = sshll.u32 %s8923_s30, 4  ;;  %s8924_s17 = smov [#allocation16]   ;;  %s345_s24 = int_to_ptr.vmem [resolvable:$true] %s344_s24 }
  0x9d   : > { %s368_s21 = sshll.u32 %s8924_s17, 4  ;;  %s8680_s27 = scalar_lea.hbm %s10252_s6, 160  ;;  %s369_s21 = int_to_ptr.vmem [resolvable:$true] %s368_s21 }
  0x9e   : > { %p8681_p13 = scmp.ne.s32.totalorder %s10252_s6, %s8680_s27  ;;  %p8687_p3 = scmp.lt.u32.totalorder %s8680_s27, %s10252_s6 }
  0xa0   : > { %p8683_p0 = pnand %p8681_p13, %p9056_p8 }
  0xa2   : > { %p8684_p1 = pneg %p8683_p0 }
  0xa4   : > { %p8689_p2 = pnand %p8687_p3, %p8684_p1 }
  0xa6   : > { %8692 = shalt.err (!%p8689_p2)
}
  0xa7   : > { %s8693_s12 = scalar_lea.vmem %s345_s24, 160  ;;  %p8701_p4 = scmp.lt.s32.totalorder %s345_s24, %s345_s24 }
  0xa8   : > { %p8694_p5 = scmp.ne.s32.totalorder %s345_s24, %s8693_s12  ;;  %p8702_p10 = scmp.lt.s32.totalorder %s8693_s12, %s8693_s12 }
  0xaa   : > { %p8696_p7 = pnand %p8694_p5, %p9056_p8  ;;  %p8703_p11 = por %p8702_p10, %p8701_p4 }
  0xac   : > { %p8697_p9 = pneg %p8696_p7 }
  0xae   : > { %p8704_p12 = pnand %p8703_p11, %p8697_p9 }
  0xb0   : > { %8707 = shalt.err (!%p8704_p12)
}
  0xb1   : > { %8432 = dma.hbm_to_vmem [thread:$0]  (!%p9040_p6), %s10252_s6, 160, %s345_s24, [#allocation12], %s10282_s29, %s10282_s29, %s8920_s26  }
  0xb2   : > { %s8708_s18 = scalar_lea.hbm %s10254_s8, 384 }
  0xb3   : > { %p8709_p13 = scmp.ne.s32.totalorder %s10254_s8, %s8708_s18  ;;  %p8715_p3 = scmp.lt.u32.totalorder %s8708_s18, %s10254_s8 }
  0xb5   : > { %p8711_p0 = pnand %p8709_p13, %p9056_p8 }
  0xb7   : > { %p8712_p1 = pneg %p8711_p0 }
  0xb9   : > { %p8717_p2 = pnand %p8715_p3, %p8712_p1 }
  0xbb   : > { %8720 = shalt.err (!%p8717_p2)
}
  0xbc   : > { %s8721_s20 = scalar_lea.vmem %s369_s21, 384  ;;  %p8729_p4 = scmp.lt.s32.totalorder %s369_s21, %s369_s21 }
  0xbd   : > { %p8722_p5 = scmp.ne.s32.totalorder %s369_s21, %s8721_s20  ;;  %p8730_p10 = scmp.lt.s32.totalorder %s8721_s20, %s8721_s20 }
  0xbf   : > { %p8724_p7 = pnand %p8722_p5, %p9056_p8  ;;  %p8731_p11 = por %p8730_p10, %p8729_p4 }
  0xc1   : > { %p8725_p9 = pneg %p8724_p7 }
  0xc3   : > { %p8732_p12 = pnand %p8731_p11, %p8725_p9 }
  0xc5   : > { %8735 = shalt.err (!%p8732_p12)
}
  0xc6   : > { %s10263_s26 = smov 128   ;;  %s10265_s29 = smov 8  }
  0xc7   : > { %8438 = dma.hbm_to_vmem [thread:$0]  (!%p9040_p6), %s10254_s8, 384, %s369_s21, [#allocation15], %s10263_s26, %s10263_s26, %s10265_s29  }
  0xc8   : > { %s8927_s2 = smov [#allocation17]   ;;  %s8736_s18 = scalar_lea.hbm %s10255_s9, 16 }
  0xc9   : > { %s382_s28 = sshll.u32 %s8927_s2, 4  ;;  %p8737_p13 = scmp.ne.s32.totalorder %s10255_s9, %s8736_s18  ;;  %s383_s28 = int_to_ptr.vmem [resolvable:$true] %s382_s28 }
  0xca   : > { %p8743_p3 = scmp.lt.u32.totalorder %s8736_s18, %s10255_s9 }
  0xcb   : > { %p8739_p0 = pnand %p8737_p13, %p9056_p8 }
  0xcd   : > { %p8740_p1 = pneg %p8739_p0 }
  0xcf   : > { %p8745_p2 = pnand %p8743_p3, %p8740_p1 }
  0xd1   : > { %8748 = shalt.err (!%p8745_p2)
}
  0xd2   : > { %s8749_s21 = scalar_lea.vmem %s383_s28, 16  ;;  %s8756_s20 = scalar_lea.vmem %s383_s28, 32 }
  0xd3   : > { %p8750_p5 = scmp.ne.s32.totalorder %s383_s28, %s8749_s21  ;;  %p8757_p4 = scmp.lt.s32.totalorder %s383_s28, %s383_s28 }
  0xd4   : > { %p8758_p10 = scmp.lt.s32.totalorder %s8756_s20, %s8749_s21 }
  0xd5   : > { %p8752_p7 = pnand %p8750_p5, %p9056_p8 }
  0xd6   : > { %p8759_p11 = por %p8758_p10, %p8757_p4 }
  0xd7   : > { %p8753_p9 = pneg %p8752_p7 }
  0xd9   : > { %p8760_p12 = pnand %p8759_p11, %p8753_p9 }
  0xdb   : > { %8763 = shalt.err (!%p8760_p12)
}
  0xdc   : > { %8441 = dma.hbm_to_vmem [thread:$0]  (!%p9040_p6), %s10255_s9, 16, %s383_s28, [#allocation18]  }
  0xdd   : > { %s7447_s11 = sadd.s32 4294967294, %s8914_s16   ;;  %s9229_s23 = sadd.s32 1, %s8914_s16  }
  0xde   : > { %s37_s2 = ssub.s32 %s8914_s16, %s9229_s23  ;;  %s40_s30 = sadd.s32 1, %s8910_s15 }
  0xdf   : > { %p38_p8 = scmp.eq.s32.totalorder %s37_s2, 0  ;;  %p47_p13 = scmp.ne.s32.totalorder %s8910_s15, %s8906_s14 }
  0xe0   : > { %p48_p0 = scmp.eq.s32.totalorder %s8914_s16, 0  ;;  %p53_p1 = scmp.ne.s32.totalorder %s8906_s14, %s8902_s13 }
  0xe1   : > { %s9240_s17 = scalar_select %p38_p8, %s8910_s15, %s40_s30  }
  0xe2   : > { %p9242_p3 = por %p48_p0, %p47_p13  ;;  %p10284_p2 = scmp.eq.s32.totalorder %s9024_s19, 0 }
  0xe3   : > { %p271_p5 = scmp.eq.s32.totalorder %s9024_s19, 1  ;;  %p277_p7 = scmp.eq.s32.totalorder %s7447_s11, 1 }
  0xe4   : > { %p9248_p6 = por %p10284_p2, %p53_p1  ;;  %p8461_p9 = scmp.lt.s32.totalorder %s8914_s16, 2 }
  0xe5   : > { %s393_s22 = sand.u32 1, %s8910_s15   ;;  %p9255_p4 = por %p271_p5, %p47_p13 }
  0xe6   : > { %p9259_p10 = por %p277_p7, %p53_p1  ;;  %s7458_s25 = sshll.u32 %s393_s22, 4 }
  0xe7   : > { %s10286_s27 = scalar_select %p9255_p4, 1, 0 }
  0xe8   : > { %s10287_s10 = scalar_select %p9259_p10, 1, 0 }
  0xe9   : > { %s7654_s21 = sshll.u32 %s8914_s16, 8  ;;  %s10288_s0 = sld [smem:[#allocation29_spill]] }
  0xea   : > { %s397_s11 = scalar_lea.vmem [#allocation2], %s7458_s25  ;;  %p9273_p11 = pnand %p8461_p9, %p9242_p3 }
  0xeb   : > { %s404_s2 = sshll.u32 %s397_s11, 4  ;;  %s9280_s20 = scalar_lea.hbm %s10247_s1, %s7654_s21  ;;  %s9269_s2 = int_to_ptr.vmem [resolvable:$true] %s404_s2 }
  0xec   : > { %s418_s24 = scalar_lea.vmem [#allocation5], %s7458_s25  ;;  %s9284_s4 = scalar_lea.sflag [#allocation3], %s393_s22 }
  0xed   : > { %s9282_s3 = sshll.u32 %s418_s24, 4  ;;  %p8766_p8 = pneg %p9273_p11  ;;  %s9316_s3 = int_to_ptr.vmem [resolvable:$true] %s9282_s3 }
  0xef   : > { %s9267_s12 = scalar_lea.hbm %s10288_s0, %s7654_s21  ;;  %s8769_s26 = scalar_lea.hbm %s10288_s0, 512 }
  0xf0   : > { %s8764_s11 = scalar_lea.hbm %s9267_s12, 256  ;;  %p8770_p1 = scmp.lt.u32.totalorder %s9267_s12, %s10288_s0 }
  0xf1   : > { %p8765_p12 = scmp.ne.s32.totalorder %s9267_s12, %s8764_s11  ;;  %p8771_p3 = scmp.lt.u32.totalorder %s8769_s26, %s8764_s11 }
  0xf2   : > { %p8773_p5 = scmp.lt.u32.totalorder %s8764_s11, %s9267_s12 }
  0xf3   : > { %p8767_p13 = pnand %p8766_p8, %p8765_p12  ;;  %p8772_p2 = por %p8771_p3, %p8770_p1 }
  0xf5   : > { %p8768_p0 = pneg %p8767_p13  ;;  %p8774_p7 = por %p8773_p5, %p8772_p2 }
  0xf7   : > { %p8775_p9 = pnand %p8774_p7, %p8768_p0 }
  0xf9   : > { %8778 = shalt.err (!%p8775_p9)
}
  0xfa   : > { %s8779_s22 = scalar_lea.vmem %s9269_s2, 256  ;;  %s8928_s5 = smov [#allocation2]  }
  0xfb   : > { %p8780_p12 = scmp.ne.s32.totalorder %s9269_s2, %s8779_s22  ;;  %s8784_s25 = sshll.u32 %s8928_s5, 4  ;;  %s8785_s25 = int_to_ptr.vmem [resolvable:$false] %s8784_s25 }
  0xfc   : > { %s8786_s24 = scalar_lea.vmem %s8785_s25, 512  ;;  %p8787_p4 = scmp.lt.s32.totalorder %s9269_s2, %s8785_s25 }
  0xfd   : > { %p8782_p13 = pnand %p8780_p12, %p8766_p8  ;;  %p8788_p1 = scmp.lt.s32.totalorder %s8786_s24, %s8779_s22 }
  0xff   : > { %p8783_p10 = pneg %p8782_p13  ;;  %p8789_p3 = por %p8788_p1, %p8787_p4 }
 0x101   : > { %p8790_p2 = pnand %p8789_p3, %p8783_p10 }
 0x103   : > { %8793 = shalt.err (!%p8790_p2)
}
 0x104   : > { %s10290_s11 = smov 8   ;;  %s10291_s18 = smov 128  }
 0x105   : > { %8445 = dma.hbm_to_vmem [thread:$0]  (!%p9273_p11), %s9267_s12, 256, %s9269_s2, %s9284_s4, %s10291_s18, %s10291_s18, %s10290_s11  }
 0x106   : > { %s414_s26 = sand.u32 1, %s8914_s16   ;;  %s8794_s21 = scalar_lea.hbm %s9280_s20, 256 }
 0x107   : > { %s9319_s29 = scalar_lea.sflag [#allocation6], %s414_s26  ;;  %p8795_p4 = scmp.ne.s32.totalorder %s9280_s20, %s8794_s21 }
 0x108   : > { %s8799_s25 = scalar_lea.hbm %s10247_s1, 512  ;;  %p8800_p5 = scmp.lt.u32.totalorder %s9280_s20, %s10247_s1 }
 0x109   : > { %p8797_p10 = pnand %p8795_p4, %p8766_p8  ;;  %p8801_p7 = scmp.lt.u32.totalorder %s8799_s25, %s8794_s21 }
 0x10a   : > { %p8803_p12 = scmp.lt.u32.totalorder %s8794_s21, %s9280_s20 }
 0x10b   : > { %p8798_p0 = pneg %p8797_p10  ;;  %p8802_p9 = por %p8801_p7, %p8800_p5 }
 0x10d   : > { %p8804_p13 = por %p8803_p12, %p8802_p9 }
 0x10f   : > { %p8805_p1 = pnand %p8804_p13, %p8798_p0 }
 0x111   : > { %8808 = shalt.err (!%p8805_p1)
}
 0x112   : > { %s8809_s4 = scalar_lea.vmem %s9316_s3, 256  ;;  %s8929_s12 = smov [#allocation5]  }
 0x113   : > { %p8810_p3 = scmp.ne.s32.totalorder %s9316_s3, %s8809_s4  ;;  %s8814_s2 = sshll.u32 %s8929_s12, 4  ;;  %s8815_s2 = int_to_ptr.vmem [resolvable:$false] %s8814_s2 }
 0x114   : > { %s8816_s0 = scalar_lea.vmem %s8815_s2, 512  ;;  %p8817_p10 = scmp.lt.s32.totalorder %s9316_s3, %s8815_s2 }
 0x115   : > { %p8812_p2 = pnand %p8810_p3, %p8766_p8  ;;  %p8818_p5 = scmp.lt.s32.totalorder %s8816_s0, %s8809_s4 }
 0x117   : > { %p8813_p4 = pneg %p8812_p2  ;;  %p8819_p7 = por %p8818_p5, %p8817_p10 }
 0x119   : > { %p8820_p9 = pnand %p8819_p7, %p8813_p4 }
 0x11b   : > { %8823 = shalt.err (!%p8820_p9)
}
 0x11c   : > { %8448 = dma.hbm_to_vmem [thread:$0]  (!%p9273_p11), %s9280_s20, 256, %s9316_s3, %s9319_s29, %s10291_s18, %s10291_s18, %s10290_s11  }
 0x11d   : > { %s10292_s26 = sld [smem:[#allocation28_spill]] }
 0x123   : > { %p10293_p8 = scmp.ne.s32.totalorder %s10292_s26, 0 }
 0x124   : > { %s9351_s21 = sand.u32 (!%p10293_p8), 1, %s8906_s14  }
 0x125   : > { %437 = sbr.rel (%p10293_p8) target bundleno = 2080 (0x820), region = 60  ;;  %s7465_s22 = sshll.u32 (!%p10293_p8), %s9351_s21, 4 }
 0x126   : > { %s440_s5 = scalar_lea.sflag (!%p10293_p8), [#allocation3], %s9351_s21  ;;  %s443_s25 = scalar_lea.vmem (!%p10293_p8), [#allocation2], %s7465_s22 }
 0x12c   : > { %8869 = dma.done.wait (%p9248_p6), %s440_s5, 256  }
 0x12d   : > { %8871 = vsyncadd (%p9248_p6), %s440_s5, 4294967040  ;;  %s448_s3 = sand.u32 1, %s9024_s19   ;;  %s9360_s20 = scalar_lea.vmem [#allocation5], %s7465_s22 }
 0x12e   : > { %s449_s30 = scalar_lea.sflag [#allocation6], %s448_s3 }
 0x12f   : > { %8873 = dma.done.wait (%p9248_p6), %s449_s30, 256  }
 0x130   : > { %8875 = vsyncadd (%p9248_p6), %s449_s30, 4294967040  ;;  %p10294_p11 = scmp.eq.s32.totalorder %s9024_s19, 0 }
 0x132   : > { %8877 = dma.done.wait (%p10294_p11), [#allocation6], 320   ;;  %p10295_p0 = pmov %p10294_p11 }
 0x134   : > { %8879 = vsyncadd (%p10295_p0), [#allocation6], 4294966976  ;;  %p10296_p12 = pmov %p10295_p0 }
 0x135   : > { %p10297_p13 = pmov %p10295_p0 }
 0x136   : > { %8881 = dma.done.wait (%p10296_p12), [#allocation9], 176  }
 0x137   : > { %8883 = vsyncadd (%p10297_p13), [#allocation9], 4294967120  ;;  %p10298_p1 = pmov %p10295_p0 }
 0x138   : > { %p10299_p3 = pmov %p10295_p0 }
 0x139   : > { %8885 = dma.done.wait (%p10298_p1), [#allocation12], 176  }
 0x13a   : > { %8887 = vsyncadd (%p10299_p3), [#allocation12], 4294967120  ;;  %p10300_p6 = pmov %p10295_p0 }
 0x13b   : > { %p10301_p2 = pmov %p10295_p0 }
 0x13c   : > { %8889 = dma.done.wait (%p10300_p6), [#allocation15], 400  }
 0x13d   : > { %8891 = vsyncadd (%p10301_p2), [#allocation15], 4294966896  ;;  %p10302_p4 = pmov %p10295_p0 }
 0x13e   : > { %p10303_p10 = pmov %p10295_p0 }
 0x13f   : > { %8893 = dma.done.wait (%p10302_p4), [#allocation18], 16  }
 0x140   : > { %8895 = vsyncadd (%p10303_p10), [#allocation18], 4294967280  ;;  %v8930_v0 = vmov 0.0   ;;  %vm8931_vm0 = vmmov 0   ;;  %vm556_vm1 = vcmask 1041408   ;;  %v9392_v1 = vld [vmem:[%s443_s25] sm:$0xff] }
 0x141   : > { %7842 = vmatprep.subr.mxu0 %v8930_v0  ;;  %7867 = vmatprep.subr.mxu1 %v8930_v0  ;;  %v9394_v2 = vld [vmem:[#allocation7 + $0x4] sm:$0x3]  ;;  %v9397_v3 = vrot.slane %v9392_v1, 2  ;;  %v9400_v4 = vrot.slane %v9392_v1, 1  ;;  %v527_v5 = vld [vmem:[%s443_s25 + $0x8] sm:$0x1] }
 0x142   : > { %7844 = vmatprep.mubr.msk.f32.mxu0 %vm8931_vm0, %v8930_v0  ;;  %7869 = vmatprep.mubr.msk.f32.mxu1 %vm8931_vm0, %v8930_v0  ;;  %vm553_vm2 = vcmask 15360   ;;  %v9405_v6 = vld [vmem:[#allocation7] sm:$0x3]  ;;  %s8932_s28 = smov 126   ;;  %v9412_v7 = vrot.slane %v9392_v1, 3  ;;  %v861_v9 = vrot.slane %v9392_v1, 4 }
 0x143   : > { %7843 = vmatpush3.msk.msra.mxu0 %vm556_vm1, %v9394_v2  ;;  %1094 = vrot.lane.b32.xlu1 %v9397_v3, %s8932_s28  ;;  %v9414_v8 = vld [vmem:[#allocation7 + $0x6] sm:$0x3]  ;;  %v862_v10 = vrot.slane %v527_v5, 4  ;;  %vm860_vm3 = vcmask 1043456   ;;  %v9432_v12 = vld [vmem:[#allocation7 + $0x8] sm:$0x3] }
 0x144   : > { %7847 = vmatprep.subr.mxu0 %v8930_v0  ;;  %940 = vrot.lane.b32.xlu0 %v9400_v4, %s8932_s28  ;;  %s8933_s11 = smov 124   ;;  %s8934_s18 = smov 122   ;;  %v9448_v13 = vld [vmem:[#allocation7 + $0xc] sm:$0x3]  ;;  %v9465_v14 = vld [vmem:[#allocation7 + $0x10] sm:$0x3] }
 0x145   : > { %7845 = vmatmul.mubr.msk.f32.vlgmr.msra.gmra.mrb[0].mxu0 %vm553_vm2, %v9400_v4  ;;  %7868 = vmatpush3.msk.msra.mxu1 %vm556_vm1, %v9414_v8  ;;  %v863_v11 = vsel %vm860_vm3, %v861_v9, %v862_v10  ;;  %s8935_s29 = smov 120   ;;  %s8936_s24 = smov 118   ;;  %v9517_v15 = vld [vmem:[%s9360_s20] sm:$0xff]  ;;  %v529_v17 = vld [vmem:[%s9360_s20 + $0x8] sm:$0x1]  ;;  %vm1332_vm4 = vcmask 31744  }
 0x146   : > { %7848 = vmatpush3.msk.msra.mxu0 %vm556_vm1, %v9405_v6  ;;  %7849 = vmatprep.mubr.msk.f32.mxu0 %vm8931_vm0, %v8930_v0  ;;  %s8937_s4 = smov 116   ;;  %s8938_s12 = smov 114   ;;  %v9523_v16 = vrot.slane %v9517_v15, 1  ;;  %v9530_v18 = vrot.slane %v9517_v15, 2  ;;  %v3923_v19 = vrot.slane %v9517_v15, 4  ;;  %v3924_v20 = vrot.slane %v529_v17, 4 }
 0x147   : > { %7852 = vmatprep.subr.mxu0 %v8930_v0  ;;  %7872 = vmatprep.subr.mxu1 %v8930_v0  ;;  %v9538_v21 = vrot.slane %v9517_v15, 3  ;;  %v9583_v23 = vld [vmem:[#allocation7 + $0x2] sm:$0x3]  ;;  %v9595_v28 = vld [vmem:[#allocation7 + $0xa] sm:$0x3]  ;;  %s8939_s2 = smov 8  }
 0x148   : > { %1172 = vrot.lane.b32.xlu1 %v9412_v7, %s8932_s28  ;;  %1017 = vrot.lane.b32.xlu0 %v9392_v1, %s8932_s28  ;;  %v9541_v22 = vsel %vm860_vm3, %v3923_v19, %v3924_v20  ;;  %v9617_v31 = vld [vmem:[#allocation7 + $0xe] sm:$0x3]  ;;  %v9635_v33 = vld [vmem:[#allocation7 + $0x12] sm:$0x3]  ;;  %v9845_v10 = vld [vmem:[#allocation10] sm:$0x3] }
 0x149   : > { %s8940_s0 = smov 16   ;;  %s8941_s26 = smov 4   ;;  %vm3609_vm5 = vcmask 64512   ;;  %vm3611_vm6 = vcmask 130048   ;;  %vm3613_vm7 = vcmask 195584   ;;  %vm6679_vm8 = vcmask 258048  }
 0x14a   : > { %s8942_s22 = smov 24   ;;  %vm6755_vm9 = vcmask 1044480   ;;  %vm6742_vm10 = vcmask 39936   ;;  %vm6844_vm11 = vcmask 261120   ;;  %s8944_s5 = smov 104   ;;  %vm6927_vm12 = vcmask 1040384  }
 0x14b   : > { %s8945_s25 = smov 112   ;;  %s8946_s3 = smov 12   ;;  %vm7260_vm13 = vcmask 97280   ;;  %vm7262_vm14 = vcmask 126976  }
 0x14c   : > { %1341 = vrot.lane.b32.xlu1 %v9400_v4, %s8933_s11  ;;  %1250 = vrot.lane.b32.xlu0 %v863_v11, %s8932_s28  ;;  %s7475_s30 = sshll.u32 %s9351_s21, 3  ;;  %s7651_s20 = sshll.u32 %s9024_s19, 7 }
 0x14d   : > { %7850 = vmatmul.mubr.msk.f32.vlgmr.msra.gmra.mrb[0].mxu0 %vm553_vm2, %v9392_v1  ;;  %s7265_s19 = scalar_lea.sflag [#allocation4], %s9351_s21  ;;  %p10305_p7 = scmp.ne.s32.totalorder %s10286_s27, 0 }
 0x14e   : > { %7853 = vmatpush3.msk.msra.mxu0 %vm556_vm1, %v9432_v12  ;;  %7854 = vmatprep.mubr.msk.f32.mxu0 %vm8931_vm0, %v8930_v0 }
 0x14f   : > { %7857 = vmatprep.subr.mxu0 %v8930_v0 }
 0x150   : > { %1415 = vrot.lane.b32.xlu1 %v9392_v1, %s8933_s11  ;;  %1714 = vrot.lane.b32.xlu0 %v9400_v4, %s8934_s18 }
 0x154   : > { %1489 = vrot.lane.b32.xlu1 %v9397_v3, %s8933_s11  ;;  %1788 = vrot.lane.b32.xlu0 %v9392_v1, %s8934_s18 }
 0x155   : > { %7855 = vmatmul.mubr.msk.f32.vlgmr.msra.gmra.mrb[0].mxu0 %vm553_vm2, %v9397_v3 }
 0x156   : > { %7858 = vmatpush3.msk.msra.mxu0 %vm556_vm1, %v9448_v13  ;;  %7859 = vmatprep.mubr.msk.f32.mxu0 %vm8931_vm0, %v8930_v0 }
 0x157   : > { %7862 = vmatprep.subr.mxu0 %v8930_v0 }
 0x158   : > { %1564 = vrot.lane.b32.xlu1 %v9412_v7, %s8933_s11  ;;  %1862 = vrot.lane.b32.xlu0 %v9397_v3, %s8934_s18 }
 0x15c   : > { %1639 = vrot.lane.b32.xlu1 %v863_v11, %s8933_s11  ;;  %1937 = vrot.lane.b32.xlu0 %v9412_v7, %s8934_s18 }
 0x15d   : > { %7860 = vmatmul.mubr.msk.f32.vlgmr.msra.gmra.mrb[0].mxu0 %vm553_vm2, %v9412_v7 }
 0x15e   : > { %7863 = vmatpush3.msk.msra.mxu0 %vm556_vm1, %v9465_v14  ;;  %7864 = vmatprep.mubr.msk.f32.mxu0 %vm8931_vm0, %v8930_v0 }
 0x15f   : > { %7892 = vmatprep.subr.mxu0 %v8930_v0 }
 0x160   : > { %2093 = vrot.lane.b32.xlu1 %v9400_v4, %s8935_s29  ;;  %2012 = vrot.lane.b32.xlu0 %v863_v11, %s8934_s18 }
 0x164   : > { %2167 = vrot.lane.b32.xlu1 %v9392_v1, %s8935_s29  ;;  %2466 = vrot.lane.b32.xlu0 %v9400_v4, %s8936_s24 }
 0x165   : > { %7865 = vmatmul.mubr.msk.f32.vlgmr.msra.gmra.mrb[0].mxu0 %vm553_vm2, %v863_v11 }
 0x166   : > { %7893 = vmatpush3.msk.msra.mxu0 %vm556_vm1, %v9394_v2  ;;  %7894 = vmatprep.mubr.msk.f32.mxu0 %vm8931_vm0, %v8930_v0 }
 0x167   : > { %7897 = vmatprep.subr.mxu0 %v8930_v0 }
 0x168   : > { %2241 = vrot.lane.b32.xlu1 %v9397_v3, %s8935_s29  ;;  %2540 = vrot.lane.b32.xlu0 %v9392_v1, %s8936_s24 }
 0x16c   : > { %2316 = vrot.lane.b32.xlu1 %v9412_v7, %s8935_s29  ;;  %2614 = vrot.lane.b32.xlu0 %v9397_v3, %s8936_s24 }
 0x170   : > { %2391 = vrot.lane.b32.xlu1 %v863_v11, %s8935_s29  ;;  %2689 = vrot.lane.b32.xlu0 %v9412_v7, %s8936_s24 }
 0x174   : > { %2845 = vrot.lane.b32.xlu1 %v9400_v4, %s8937_s4  ;;  %2764 = vrot.lane.b32.xlu0 %v863_v11, %s8936_s24 }
 0x178   : > { %2919 = vrot.lane.b32.xlu1 %v9392_v1, %s8937_s4  ;;  %3218 = vrot.lane.b32.xlu0 %v9400_v4, %s8938_s12  ;;  %v9809_v4 = vld [vmem:[#allocation10 + $0x4] sm:$0x3] }
 0x17c   : > { %2993 = vrot.lane.b32.xlu1 %v9397_v3, %s8937_s4  ;;  %3292 = vrot.lane.b32.xlu0 %v9392_v1, %s8938_s12 }
 0x180   : > { %3068 = vrot.lane.b32.xlu1 %v9412_v7, %s8937_s4  ;;  %3366 = vrot.lane.b32.xlu0 %v9397_v3, %s8938_s12 }
 0x184   : > { %3143 = vrot.lane.b32.xlu1 %v863_v11, %s8937_s4  ;;  %3441 = vrot.lane.b32.xlu0 %v9412_v7, %s8938_s12  ;;  %v9823_v7 = vld [vmem:[#allocation10 + $0x8] sm:$0x3] }
 0x188   : > { %3516 = vrot.lane.b32.xlu0 %v863_v11, %s8938_s12  ;;  %4009 = vrot.lane.b32.xlu1 %v9523_v16, %s8933_s11 }
 0x18c   : > { %4083 = vrot.lane.b32.xlu0 %v9517_v15, %s8933_s11  ;;  %4157 = vrot.lane.b32.xlu1 %v9530_v18, %s8933_s11 }
 0x190   : > { %4232 = vrot.lane.b32.xlu0 %v9538_v21, %s8933_s11  ;;  %4307 = vrot.lane.b32.xlu1 %v9541_v22, %s8933_s11 }
 0x194   : > { %4383 = vrot.lane.b32.xlu0 %v9523_v16, %s8935_s29  ;;  %4457 = vrot.lane.b32.xlu1 %v9517_v15, %s8935_s29 }
 0x198   : > { %4531 = vrot.lane.b32.xlu0 %v9530_v18, %s8935_s29  ;;  %4606 = vrot.lane.b32.xlu1 %v9538_v21, %s8935_s29 }
 0x19c   : > { %4681 = vrot.lane.b32.xlu0 %v9541_v22, %s8935_s29  ;;  %4757 = vrot.lane.b32.xlu1 %v9523_v16, %s8937_s4 }
 0x1a0   : > { %4831 = vrot.lane.b32.xlu0 %v9517_v15, %s8937_s4  ;;  %4905 = vrot.lane.b32.xlu1 %v9530_v18, %s8937_s4 }
 0x1a4   : > { %4980 = vrot.lane.b32.xlu0 %v9538_v21, %s8937_s4  ;;  %5055 = vrot.lane.b32.xlu1 %v9541_v22, %s8937_s4 }
 0x1a8   : > { %5147 = vrot.lane.b32.xlu0 %v9523_v16, %s8932_s28  ;;  %5224 = vrot.lane.b32.xlu1 %v9517_v15, %s8932_s28 }
 0x1ac   : > { %5301 = vrot.lane.b32.xlu0 %v9530_v18, %s8932_s28  ;;  %5379 = vrot.lane.b32.xlu1 %v9538_v21, %s8932_s28 }
 0x1b0   : > { %5457 = vrot.lane.b32.xlu0 %v9541_v22, %s8932_s28  ;;  %5542 = vrot.lane.b32.xlu1 %v9523_v16, %s8934_s18  ;;  %s525_s28 = scalar_lea.vmem [#allocation19], %s7475_s30 }
 0x1b1   : > { %s7278_s11 = sshll.u32 %s525_s28, 4  ;;  %s10204_s11 = int_to_ptr.vmem [resolvable:$true] %s7278_s11 }
 0x1b4   : > { %5616 = vrot.lane.b32.xlu0 %v9517_v15, %s8934_s18  ;;  %5690 = vrot.lane.b32.xlu1 %v9530_v18, %s8934_s18 }
 0x1b5   : > { %v1095_v24 = vpop.permute.xlu1 %1094 }
 0x1b6   : > { %v941_v25 = vpop.permute.xlu0 %940 }
 0x1b7   : > { %7870 = vmatmul.mubr.msk.f32.vlgmr.msra.gmra.mrb[0].mxu1 %vm553_vm2, %v941_v25  ;;  %v9946_v25 = vld [vmem:[#allocation13 + $0x4] sm:$0x3] }
 0x1b8   : > { %7873 = vmatpush3.msk.msra.mxu1 %vm556_vm1, %v9583_v23  ;;  %7874 = vmatprep.mubr.msk.f32.mxu1 %vm8931_vm0, %v8930_v0 }
 0x1b9   : > { %7877 = vmatprep.subr.mxu1 %v8930_v0  ;;  %5765 = vrot.lane.b32.xlu0 %v9538_v21, %s8934_s18 }
 0x1ba   : > { %v1173_v26 = vpop.permute.xlu1 %1172  ;;  %5840 = vrot.lane.b32.xlu1 %v9541_v22, %s8934_s18  ;;  %v1018_v27 = vpop.permute.xlu0 %1017 }
 0x1bd   : > { %5916 = vrot.lane.b32.xlu0 %v9523_v16, %s8936_s24 }
 0x1be   : > { %v1342_v29 = vpop.permute.xlu1 %1341  ;;  %5990 = vrot.lane.b32.xlu1 %v9517_v15, %s8936_s24  ;;  %v1251_v34 = vpop.permute.xlu0 %1250 }
 0x1bf   : > { %7875 = vmatmul.mubr.msk.f32.vlgmr.msra.gmra.mrb[0].mxu1 %vm553_vm2, %v1018_v27  ;;  %7895 = vmatmul.mubr.msk.f32.vlgmr.msra.gmra.mrb[2].mxu0 %vm553_vm2, %v1342_v29  ;;  %v9961_v27 = vld [vmem:[#allocation13 + $0x8] sm:$0x3] }
 0x1c0   : > { %7878 = vmatpush3.msk.msra.mxu1 %vm556_vm1, %v9595_v28  ;;  %7879 = vmatprep.mubr.msk.f32.mxu1 %vm8931_vm0, %v8930_v0 }
 0x1c1   : > { %7898 = vmatpush3.msk.msra.mxu0 %vm556_vm1, %v9405_v6  ;;  %7899 = vmatprep.mubr.msk.f32.mxu0 %vm8931_vm0, %v8930_v0 }
 0x1c2   : > { %7882 = vmatprep.subr.mxu1 %v8930_v0  ;;  %7902 = vmatprep.subr.mxu0 %v8930_v0  ;;  %v1416_v30 = vpop.permute.xlu1 %1415  ;;  %v1715_v36 = vpop.permute.xlu0 %1714 }
 0x1c3   : > { %6064 = vrot.lane.b32.xlu0 %v9530_v18, %s8936_s24  ;;  %6139 = vrot.lane.b32.xlu1 %v9538_v21, %s8936_s24 }
 0x1c6   : > { %v1490_v32 = vpop.permute.xlu1 %1489  ;;  %v1789_v37 = vpop.permute.xlu0 %1788 }
 0x1c7   : > { %7880 = vmatmul.mubr.msk.f32.vlgmr.msra.gmra.mrb[0].mxu1 %vm553_vm2, %v1095_v24  ;;  %7900 = vmatmul.mubr.msk.f32.vlgmr.msra.gmra.mrb[2].mxu0 %vm553_vm2, %v1416_v30  ;;  %v9983_v30 = vld [vmem:[#allocation13] sm:$0x3] }
 0x1c8   : > { %7883 = vmatpush3.msk.msra.mxu1 %vm556_vm1, %v9617_v31  ;;  %7884 = vmatprep.mubr.msk.f32.mxu1 %vm8931_vm0, %v8930_v0 }
 0x1c9   : > { %7903 = vmatpush3.msk.msra.mxu0 %vm556_vm1, %v9432_v12  ;;  %7904 = vmatprep.mubr.msk.f32.mxu0 %vm8931_vm0, %v8930_v0 }
 0x1ca   : > { %7887 = vmatprep.subr.mxu1 %v8930_v0  ;;  %7907 = vmatprep.subr.mxu0 %v8930_v0  ;;  %v1565_v35 = vpop.permute.xlu1 %1564  ;;  %v1863_v39 = vpop.permute.xlu0 %1862 }
 0x1cb   : > { %6214 = vrot.lane.b32.xlu0 %v9541_v22, %s8936_s24  ;;  %6290 = vrot.lane.b32.xlu1 %v9523_v16, %s8938_s12  ;;  %s10304_s24 = sld [smem:[#allocation34_spill]] }
 0x1ce   : > { %v1640_v38 = vpop.permute.xlu1 %1639  ;;  %v1938_v41 = vpop.permute.xlu0 %1937 }
 0x1cf   : > { %7885 = vmatmul.mubr.msk.f32.vlgmr.msra.gmra.mrb[0].mxu1 %vm553_vm2, %v1173_v26  ;;  %7905 = vmatmul.mubr.msk.f32.vlgmr.msra.gmra.mrb[2].mxu0 %vm553_vm2, %v1490_v32 }
 0x1d0   : > { %7888 = vmatpush3.msk.msra.mxu1 %vm556_vm1, %v9635_v33  ;;  %7889 = vmatprep.mubr.msk.f32.mxu1 %vm8931_vm0, %v8930_v0 }
 0x1d1   : > { %7908 = vmatpush3.msk.msra.mxu0 %vm556_vm1, %v9448_v13  ;;  %7909 = vmatprep.mubr.msk.f32.mxu0 %vm8931_vm0, %v8930_v0  ;;  %s10202_s4 = scalar_lea.hbm %s10304_s24, %s7651_s20 }
 0x1d2   : > { %7917 = vmatprep.subr.mxu1 %v8930_v0  ;;  %7912 = vmatprep.subr.mxu0 %v8930_v0  ;;  %v2094_v40 = vpop.permute.xlu1 %2093  ;;  %v2013_v42 = vpop.permute.xlu0 %2012 }
 0x1d3   : > { %6364 = vrot.lane.b32.xlu0 %v9517_v15, %s8938_s12  ;;  %6438 = vrot.lane.b32.xlu1 %v9530_v18, %s8938_s12 }
 0x1d6   : > { %v2168_v43 = vpop.permute.xlu1 %2167  ;;  %v2467_v44 = vpop.permute.xlu0 %2466 }
 0x1d7   : > { %7890 = vmatmul.mubr.msk.f32.vlgmr.msra.gmra.mrb[0].mxu1 %vm553_vm2, %v1251_v34  ;;  %7910 = vmatmul.mubr.msk.f32.vlgmr.msra.gmra.mrb[2].mxu0 %vm553_vm2, %v1565_v35 }
 0x1d8   : > { %7918 = vmatpush3.msk.msra.mxu1 %vm556_vm1, %v9414_v8  ;;  %7919 = vmatprep.mubr.msk.f32.mxu1 %vm8931_vm0, %v8930_v0 }
 0x1d9   : > { %7922 = vmatprep.subr.mxu1 %v8930_v0  ;;  %7913 = vmatpush3.msk.msra.mxu0 %vm556_vm1, %v9465_v14 }
 0x1da   : > { %7914 = vmatprep.mubr.msk.f32.mxu0 %vm8931_vm0, %v8930_v0  ;;  %7942 = vmatprep.subr.mxu0 %v8930_v0  ;;  %v2541_v45 = vpop.permute.xlu0 %2540  ;;  %v2242_v46 = vpop.permute.xlu1 %2241 }
 0x1db   : > { %7920 = vmatmul.mubr.msk.f32.vlgmr.msra.gmra.mrb[2].mxu1 %vm553_vm2, %v1715_v36  ;;  %6513 = vrot.lane.b32.xlu0 %v9538_v21, %s8938_s12 }
 0x1dc   : > { %7923 = vmatpush3.msk.msra.mxu1 %vm556_vm1, %v9583_v23  ;;  %7924 = vmatprep.mubr.msk.f32.mxu1 %vm8931_vm0, %v8930_v0 }
 0x1dd   : > { %7927 = vmatprep.subr.mxu1 %v8930_v0  ;;  %6588 = vrot.lane.b32.xlu1 %v9541_v22, %s8938_s12  ;;  %s8824_s12 = scalar_lea.vmem %s10204_s11, 128 }
 0x1de   : > { %v2615_v47 = vpop.permute.xlu0 %2614  ;;  %v2317_v49 = vpop.permute.xlu1 %2316  ;;  %p8825_p5 = scmp.ne.s32.totalorder %s10204_s11, %s8824_s12 }
 0x1df   : > { %7915 = vmatmul.mubr.msk.f32.vlgmr.msra.gmra.mrb[2].mxu0 %vm553_vm2, %v1640_v38 }
 0x1e0   : > { %7943 = vmatpush3.msk.msra.mxu0 %vm556_vm1, %v9394_v2  ;;  %7944 = vmatprep.mubr.msk.f32.mxu0 %vm8931_vm0, %v8930_v0  ;;  %p8826_p9 = pnand %p8825_p5, %p10305_p7 }
 0x1e1   : > { %7947 = vmatprep.subr.mxu0 %v8930_v0 }
 0x1e2   : > { %v2690_v48 = vpop.permute.xlu0 %2689  ;;  %v2392_v51 = vpop.permute.xlu1 %2391  ;;  %p8827_p8 = pneg %p8826_p9 }
 0x1e3   : > { %7925 = vmatmul.mubr.msk.f32.vlgmr.msra.gmra.mrb[2].mxu1 %vm553_vm2, %v1789_v37  ;;  %7945 = vmatmul.mubr.msk.f32.vlgmr.msra.gmra.mrb[4].mxu0 %vm553_vm2, %v2094_v40 }
 0x1e4   : > { %7928 = vmatpush3.msk.msra.mxu1 %vm556_vm1, %v9595_v28  ;;  %7929 = vmatprep.mubr.msk.f32.mxu1 %vm8931_vm0, %v8930_v0 }
 0x1e5   : > { %7948 = vmatpush3.msk.msra.mxu0 %vm556_vm1, %v9405_v6  ;;  %7949 = vmatprep.mubr.msk.f32.mxu0 %vm8931_vm0, %v8930_v0 }
 0x1e6   : > { %7932 = vmatprep.subr.mxu1 %v8930_v0  ;;  %7952 = vmatprep.subr.mxu0 %v8930_v0  ;;  %v2765_v50 = vpop.permute.xlu0 %2764  ;;  %v2846_v53 = vpop.permute.xlu1 %2845 }
 0x1ea   : > { %v3219_v52 = vpop.permute.xlu0 %3218  ;;  %v2920_v56 = vpop.permute.xlu1 %2919 }
 0x1eb   : > { %7930 = vmatmul.mubr.msk.f32.vlgmr.msra.gmra.mrb[2].mxu1 %vm553_vm2, %v1863_v39  ;;  %7950 = vmatmul.mubr.msk.f32.vlgmr.msra.gmra.mrb[4].mxu0 %vm553_vm2, %v2168_v43 }
 0x1ec   : > { %7933 = vmatpush3.msk.msra.mxu1 %vm556_vm1, %v9617_v31  ;;  %7934 = vmatprep.mubr.msk.f32.mxu1 %vm8931_vm0, %v8930_v0 }
 0x1ed   : > { %7953 = vmatpush3.msk.msra.mxu0 %vm556_vm1, %v9432_v12  ;;  %7954 = vmatprep.mubr.msk.f32.mxu0 %vm8931_vm0, %v8930_v0 }
 0x1ee   : > { %7937 = vmatprep.subr.mxu1 %v8930_v0  ;;  %7957 = vmatprep.subr.mxu0 %v8930_v0  ;;  %v3293_v54 = vpop.permute.xlu0 %3292  ;;  %v2994_v59 = vpop.permute.xlu1 %2993 }
 0x1f2   : > { %v9747_v55 = vpop.permute.xlu0 %3366  ;;  %v3069_v62 = vpop.permute.xlu1 %3068 }
 0x1f3   : > { %7935 = vmatmul.mubr.msk.f32.vlgmr.msra.gmra.mrb[2].mxu1 %vm553_vm2, %v1938_v41  ;;  %7955 = vmatmul.mubr.msk.f32.vlgmr.msra.gmra.mrb[4].mxu0 %vm553_vm2, %v2242_v46 }
 0x1f4   : > { %7938 = vmatpush3.msk.msra.mxu1 %vm556_vm1, %v9635_v33  ;;  %7939 = vmatprep.mubr.msk.f32.mxu1 %vm8931_vm0, %v8930_v0 }
 0x1f5   : > { %7958 = vmatpush3.msk.msra.mxu0 %vm556_vm1, %v9448_v13  ;;  %7959 = vmatprep.mubr.msk.f32.mxu0 %vm8931_vm0, %v8930_v0 }
 0x1f6   : > { %7967 = vmatprep.subr.mxu1 %v8930_v0  ;;  %7962 = vmatprep.subr.mxu0 %v8930_v0  ;;  %v9755_v57 = vpop.permute.xlu0 %3441  ;;  %v3144_v1 = vpop.permute.xlu1 %3143 }
 0x1fa   : > { %v9763_v58 = vpop.permute.xlu0 %3516  ;;  %v9811_v5 = vpop.permute.xlu1 %4009 }
 0x1fb   : > { %7940 = vmatmul.mubr.msk.f32.vlgmr.msra.gmra.mrb[2].mxu1 %vm553_vm2, %v2013_v42  ;;  %7960 = vmatmul.mubr.msk.f32.vlgmr.msra.gmra.mrb[4].mxu0 %vm553_vm2, %v2317_v49 }
 0x1fc   : > { %7968 = vmatpush3.msk.msra.mxu1 %vm556_vm1, %v9414_v8  ;;  %7969 = vmatprep.mubr.msk.f32.mxu1 %vm8931_vm0, %v8930_v0 }
 0x1fd   : > { %7972 = vmatprep.subr.mxu1 %v8930_v0  ;;  %7963 = vmatpush3.msk.msra.mxu0 %vm556_vm1, %v9465_v14 }
 0x1fe   : > { %7964 = vmatprep.mubr.msk.f32.mxu0 %vm8931_vm0, %v8930_v0  ;;  %7992 = vmatprep.subr.mxu0 %v8930_v0  ;;  %v4084_v60 = vpop.permute.xlu0 %4083 }
 0x1ff   : > { %7970 = vmatmul.mubr.msk.f32.vlgmr.msra.gmra.mrb[4].mxu1 %vm553_vm2, %v2467_v44 }
 0x200   : > { %7973 = vmatpush3.msk.msra.mxu1 %vm556_vm1, %v9583_v23  ;;  %7974 = vmatprep.mubr.msk.f32.mxu1 %vm8931_vm0, %v8930_v0 }
 0x201   : > { %7977 = vmatprep.subr.mxu1 %v8930_v0 }
 0x202   : > { %v4233_v61 = vpop.permute.xlu0 %4232 }
 0x203   : > { %7965 = vmatmul.mubr.msk.f32.vlgmr.msra.gmra.mrb[4].mxu0 %vm553_vm2, %v2392_v51 }
 0x204   : > { %7993 = vmatpush3.msk.msra.mxu0 %vm556_vm1, %v9394_v2  ;;  %7994 = vmatprep.mubr.msk.f32.mxu0 %vm8931_vm0, %v8930_v0  ;;  %v9801_v2 = vld [vmem:[#allocation10 + $0x2] sm:$0x3] }
 0x205   : > { %7997 = vmatprep.subr.mxu0 %v8930_v0 }
 0x206   : > { %v4384_v63 = vpop.permute.xlu0 %4383 }
 0x207   : > { %7975 = vmatmul.mubr.msk.f32.vlgmr.msra.gmra.mrb[4].mxu1 %vm553_vm2, %v2541_v45  ;;  %7995 = vmatmul.mubr.msk.f32.vlgmr.msra.gmra.mrb[6].mxu0 %vm553_vm2, %v2846_v53 }
 0x208   : > { %7978 = vmatpush3.msk.msra.mxu1 %vm556_vm1, %v9595_v28  ;;  %7979 = vmatprep.mubr.msk.f32.mxu1 %vm8931_vm0, %v8930_v0 }
 0x209   : > { %7998 = vmatpush3.msk.msra.mxu0 %vm556_vm1, %v9405_v6  ;;  %7999 = vmatprep.mubr.msk.f32.mxu0 %vm8931_vm0, %v8930_v0 }
 0x20a   : > { %7982 = vmatprep.subr.mxu1 %v8930_v0  ;;  %8002 = vmatprep.subr.mxu0 %v8930_v0  ;;  %v4532_v3 = vpop.permute.xlu0 %4531 }
 0x20e   : > { %v4682_v6 = vpop.permute.xlu0 %4681 }
 0x20f   : > { %7980 = vmatmul.mubr.msk.f32.vlgmr.msra.gmra.mrb[4].mxu1 %vm553_vm2, %v2615_v47  ;;  %8000 = vmatmul.mubr.msk.f32.vlgmr.msra.gmra.mrb[6].mxu0 %vm553_vm2, %v2920_v56 }
 0x210   : > { %7983 = vmatpush3.msk.msra.mxu1 %vm556_vm1, %v9617_v31  ;;  %7984 = vmatprep.mubr.msk.f32.mxu1 %vm8931_vm0, %v8930_v0 }
 0x211   : > { %8003 = vmatpush3.msk.msra.mxu0 %vm556_vm1, %v9432_v12  ;;  %8004 = vmatprep.mubr.msk.f32.mxu0 %vm8931_vm0, %v8930_v0  ;;  %v9855_v12 = vld [vmem:[#allocation10 + $0x6] sm:$0x3] }
 0x212   : > { %7987 = vmatprep.subr.mxu1 %v8930_v0  ;;  %8007 = vmatprep.subr.mxu0 %v8930_v0  ;;  %v4832_v9 = vpop.permute.xlu0 %4831 }
 0x217   : > { %7985 = vmatmul.mubr.msk.f32.vlgmr.msra.gmra.mrb[4].mxu1 %vm553_vm2, %v2690_v48  ;;  %8005 = vmatmul.mubr.msk.f32.vlgmr.msra.gmra.mrb[6].mxu0 %vm553_vm2, %v2994_v59 }
 0x218   : > { %7988 = vmatpush3.msk.msra.mxu1 %vm556_vm1, %v9635_v33  ;;  %7989 = vmatprep.mubr.msk.f32.mxu1 %vm8931_vm0, %v8930_v0 }
 0x219   : > { %8008 = vmatpush3.msk.msra.mxu0 %vm556_vm1, %v9448_v13  ;;  %8009 = vmatprep.mubr.msk.f32.mxu0 %vm8931_vm0, %v8930_v0  ;;  %v4981_v13 = vpop.permute.xlu0 %4980 }
 0x21a   : > { %8017 = vmatprep.subr.mxu1 %v8930_v0  ;;  %8012 = vmatprep.subr.mxu0 %v8930_v0 }
 0x21f   : > { %7990 = vmatmul.mubr.msk.f32.vlgmr.msra.gmra.mrb[4].mxu1 %vm553_vm2, %v2765_v50  ;;  %8010 = vmatmul.mubr.msk.f32.vlgmr.msra.gmra.mrb[6].mxu0 %vm553_vm2, %v3069_v62 }
 0x220   : > { %8018 = vmatpush3.msk.msra.mxu1 %vm556_vm1, %v9414_v8  ;;  %8019 = vmatprep.mubr.msk.f32.mxu1 %vm8931_vm0, %v8930_v0  ;;  %v9834_v8 = vpop.permute.xlu1 %4157 }
 0x221   : > { %8022 = vmatprep.subr.mxu1 %v8930_v0  ;;  %8013 = vmatpush3.msk.msra.mxu0 %vm556_vm1, %v9465_v14 }
 0x222   : > { %8014 = vmatprep.mubr.msk.f32.mxu0 %vm8931_vm0, %v8930_v0  ;;  %8042 = vmatprep.subr.mxu0 %v8930_v0 }
 0x223   : > { %8020 = vmatmul.mubr.msk.f32.vlgmr.msra.gmra.mrb[6].mxu1 %vm553_vm2, %v3219_v52 }
 0x224   : > { %8023 = vmatpush3.msk.msra.mxu1 %vm556_vm1, %v9583_v23  ;;  %8024 = vmatprep.mubr.msk.f32.mxu1 %vm8931_vm0, %v8930_v0  ;;  %v9853_v11 = vpop.permute.xlu1 %4307 }
 0x225   : > { %8027 = vmatprep.subr.mxu1 %v8930_v0 }
 0x227   : > { %8015 = vmatmul.mubr.msk.f32.vlgmr.msra.gmra.mrb[6].mxu0 %vm553_vm2, %v3144_v1 }
 0x228   : > { %8043 = vmatpush3.msk.msra.mxu0 %vm556_vm1, %v9801_v2  ;;  %8044 = vmatprep.mubr.msk.f32.mxu0 %vm8931_vm0, %v8930_v0  ;;  %v9872_v17 = vpop.permute.xlu1 %4457 }
 0x229   : > { %8052 = vmatprep.subr.mxu0 %v8930_v0 }
 0x22b   : > { %8025 = vmatmul.mubr.msk.f32.vlgmr.msra.gmra.mrb[6].mxu1 %vm553_vm2, %v3293_v54  ;;  %8045 = vmatmul.mubr.msk.f32.vlgmr.msra.gmra.mrb[8].mxu0 %vm553_vm2, %v9523_v16 }
 0x22c   : > { %8028 = vmatpush3.msk.msra.mxu1 %vm556_vm1, %v9595_v28  ;;  %8029 = vmatprep.mubr.msk.f32.mxu1 %vm8931_vm0, %v8930_v0  ;;  %v9886_v19 = vpop.permute.xlu1 %4606 }
 0x22d   : > { %8032 = vmatprep.subr.mxu1 %v8930_v0  ;;  %8053 = vmatpush3.msk.msra.mxu0 %vm556_vm1, %v9809_v4 }
 0x22e   : > { %8054 = vmatprep.mubr.msk.f32.mxu0 %vm8931_vm0, %v8930_v0  ;;  %8062 = vmatprep.subr.mxu0 %v8930_v0 }
 0x22f   : > { %8055 = vmatmul.mubr.msk.f32.vlgmr.msra.gmra.mrb[10].mxu0 %vm553_vm2, %v9530_v18  ;;  %v5148_v18 = vpop.permute.xlu0 %5147 }
 0x230   : > { %8063 = vmatpush3.msk.msra.mxu0 %vm556_vm1, %v9823_v7  ;;  %8064 = vmatprep.mubr.msk.f32.mxu0 %vm8931_vm0, %v8930_v0 }
 0x231   : > { %8072 = vmatprep.subr.mxu0 %v8930_v0 }
 0x233   : > { %8030 = vmatmul.mubr.msk.f32.vlgmr.msra.gmra.mrb[6].mxu1 %vm553_vm2, %v9747_v55  ;;  %8065 = vmatmul.mubr.msk.f32.vlgmr.msra.gmra.mrb[12].mxu0 %vm553_vm2, %v9541_v22  ;;  %v5302_v20 = vpop.permute.xlu0 %5301  ;;  %v9908_v22 = vpop.permute.xlu1 %4757 }
 0x234   : > { %8033 = vmatpush3.msk.msra.mxu1 %vm556_vm1, %v9617_v31  ;;  %8034 = vmatprep.mubr.msk.f32.mxu1 %vm8931_vm0, %v8930_v0 }
 0x235   : > { %8037 = vmatprep.subr.mxu1 %v8930_v0  ;;  %8073 = vmatpush3.msk.msra.mxu0 %vm556_vm1, %v9845_v10 }
 0x236   : > { %8074 = vmatprep.mubr.msk.f32.mxu0 %vm8931_vm0, %v8930_v0  ;;  %8082 = vmatprep.subr.mxu0 %v8930_v0 }
 0x237   : > { %8075 = vmatmul.mubr.msk.f32.vlgmr.msra.gmra.mrb[14].mxu0 %vm553_vm2, %v4084_v60  ;;  %v9926_v23 = vpop.permute.xlu1 %4905 }
 0x238   : > { %8083 = vmatpush3.msk.msra.mxu0 %vm556_vm1, %v9855_v12  ;;  %8084 = vmatprep.mubr.msk.f32.mxu0 %vm8931_vm0, %v8930_v0  ;;  %v9862_v14 = vpop.f32.mrb[0].mxu0 }
 0x239   : > { %8092 = vmatprep.subr.mxu0 %v8930_v0  ;;  %v7866_v16 = vpop.f32.mrb[1].mxu0 }
 0x23b   : > { %8035 = vmatmul.mubr.msk.f32.vlgmr.msra.gmra.mrb[6].mxu1 %vm553_vm2, %v9755_v57  ;;  %8085 = vmatmul.mubr.msk.f32.vlgmr.msra.gmra.mrb[16].mxu0 %vm553_vm2, %v4233_v61  ;;  %v5056_v26 = vpop.permute.xlu1 %5055 }
 0x23c   : > { %8038 = vmatpush3.msk.msra.mxu1 %vm556_vm1, %v9635_v33  ;;  %8039 = vmatprep.mubr.msk.f32.mxu1 %vm8931_vm0, %v8930_v0  ;;  %v9998_v33 = vld [vmem:[#allocation13 + $0x6] sm:$0x3] }
 0x23d   : > { %8047 = vmatprep.subr.mxu1 %v8930_v0  ;;  %8093 = vmatpush3.msk.msra.mxu0 %vm556_vm1, %v9801_v2 }
 0x23e   : > { %8094 = vmatprep.mubr.msk.f32.mxu0 %vm8931_vm0, %v8930_v0  ;;  %8102 = vmatprep.subr.mxu0 %v8930_v0 }
 0x23f   : > { %8095 = vmatmul.mubr.msk.f32.vlgmr.msra.gmra.mrb[18].mxu0 %vm553_vm2, %v4384_v63  ;;  %v5225_v29 = vpop.permute.xlu1 %5224 }
 0x240   : > { %8103 = vmatpush3.msk.msra.mxu0 %vm556_vm1, %v9809_v4  ;;  %8104 = vmatprep.mubr.msk.f32.mxu0 %vm8931_vm0, %v8930_v0 }
 0x241   : > { %8112 = vmatprep.subr.mxu0 %v8930_v0 }
 0x243   : > { %8040 = vmatmul.mubr.msk.f32.vlgmr.msra.gmra.mrb[6].mxu1 %vm553_vm2, %v9763_v58  ;;  %8105 = vmatmul.mubr.msk.f32.vlgmr.msra.gmra.mrb[20].mxu0 %vm553_vm2, %v4532_v3  ;;  %v5380_v32 = vpop.permute.xlu1 %5379 }
 0x244   : > { %8048 = vmatpush3.msk.msra.mxu1 %vm556_vm1, %v9845_v10  ;;  %8049 = vmatprep.mubr.msk.f32.mxu1 %vm8931_vm0, %v8930_v0 }
 0x245   : > { %8057 = vmatprep.subr.mxu1 %v8930_v0  ;;  %8113 = vmatpush3.msk.msra.mxu0 %vm556_vm1, %v9823_v7 }
 0x246   : > { %8114 = vmatprep.mubr.msk.f32.mxu0 %vm8931_vm0, %v8930_v0  ;;  %8122 = vmatprep.subr.mxu0 %v8930_v0 }
 0x247   : > { %8050 = vmatmul.mubr.msk.f32.vlgmr.msra.gmra.mrb[8].mxu1 %vm553_vm2, %v9517_v15  ;;  %8115 = vmatmul.mubr.msk.f32.vlgmr.msra.gmra.mrb[22].mxu0 %vm553_vm2, %v4682_v6  ;;  %v5458_v15 = vpop.permute.xlu0 %5457  ;;  %v5543_v35 = vpop.permute.xlu1 %5542 }
 0x248   : > { %8058 = vmatpush3.msk.msra.mxu1 %vm556_vm1, %v9855_v12  ;;  %8059 = vmatprep.mubr.msk.f32.mxu1 %vm8931_vm0, %v8930_v0 }
 0x249   : > { %8067 = vmatprep.subr.mxu1 %v8930_v0  ;;  %8123 = vmatpush3.msk.msra.mxu0 %vm556_vm1, %v9845_v10 }
 0x24a   : > { %8124 = vmatprep.mubr.msk.f32.mxu0 %vm8931_vm0, %v8930_v0  ;;  %8132 = vmatprep.subr.mxu0 %v8930_v0 }
 0x24b   : > { %8060 = vmatmul.mubr.msk.f32.vlgmr.msra.gmra.mrb[10].mxu1 %vm553_vm2, %v9538_v21  ;;  %8125 = vmatmul.mubr.msk.f32.vlgmr.msra.gmra.mrb[24].mxu0 %vm553_vm2, %v4832_v9  ;;  %v9931_v21 = vld [vmem:[#allocation13 + $0x2] sm:$0x3]  ;;  %v5617_v24 = vpop.permute.xlu0 %5616  ;;  %v5691_v37 = vpop.permute.xlu1 %5690 }
 0x24c   : > { %8068 = vmatpush3.msk.msra.mxu1 %vm556_vm1, %v9801_v2  ;;  %8069 = vmatprep.mubr.msk.f32.mxu1 %vm8931_vm0, %v8930_v0 }
 0x24d   : > { %8077 = vmatprep.subr.mxu1 %v8930_v0  ;;  %8133 = vmatpush3.msk.msra.mxu0 %vm556_vm1, %v9855_v12 }
 0x24e   : > { %8134 = vmatprep.mubr.msk.f32.mxu0 %vm8931_vm0, %v8930_v0  ;;  %8142 = vmatprep.subr.mxu0 %v8930_v0 }
 0x24f   : > { %8070 = vmatmul.mubr.msk.f32.vlgmr.msra.gmra.mrb[12].mxu1 %vm553_vm2, %v9811_v5  ;;  %8135 = vmatmul.mubr.msk.f32.vlgmr.msra.gmra.mrb[26].mxu0 %vm553_vm2, %v4981_v13  ;;  %v5766_v28 = vpop.permute.xlu0 %5765  ;;  %v5841_v39 = vpop.permute.xlu1 %5840 }
 0x250   : > { %8078 = vmatpush3.msk.msra.mxu1 %vm556_vm1, %v9809_v4  ;;  %8079 = vmatprep.mubr.msk.f32.mxu1 %vm8931_vm0, %v8930_v0 }
 0x251   : > { %8087 = vmatprep.subr.mxu1 %v8930_v0  ;;  %8143 = vmatpush3.msk.msra.mxu0 %vm556_vm1, %v9931_v21 }
 0x252   : > { %8144 = vmatprep.mubr.msk.f32.mxu0 %vm8931_vm0, %v8930_v0  ;;  %8152 = vmatprep.subr.mxu0 %v8930_v0 }
 0x253   : > { %8080 = vmatmul.mubr.msk.f32.vlgmr.msra.gmra.mrb[14].mxu1 %vm553_vm2, %v9834_v8  ;;  %8145 = vmatmul.mubr.msk.f32.vlgmr.msra.gmra.mrb[28].mxu0 %vm553_vm2, %v5148_v18  ;;  %v5917_v31 = vpop.permute.xlu0 %5916  ;;  %v5991_v41 = vpop.permute.xlu1 %5990 }
 0x254   : > { %8088 = vmatpush3.msk.msra.mxu1 %vm556_vm1, %v9823_v7  ;;  %8089 = vmatprep.mubr.msk.f32.mxu1 %vm8931_vm0, %v8930_v0 }
 0x255   : > { %8097 = vmatprep.subr.mxu1 %v8930_v0  ;;  %8153 = vmatpush3.msk.msra.mxu0 %vm556_vm1, %v9946_v25 }
 0x256   : > { %8154 = vmatprep.mubr.msk.f32.mxu0 %vm8931_vm0, %v8930_v0  ;;  %8162 = vmatprep.subr.mxu0 %v8930_v0 }
 0x257   : > { %8090 = vmatmul.mubr.msk.f32.vlgmr.msra.gmra.mrb[16].mxu1 %vm553_vm2, %v9853_v11  ;;  %8155 = vmatmul.mubr.msk.f32.vlgmr.msra.gmra.mrb[30].mxu0 %vm553_vm2, %v5302_v20  ;;  %v6065_v34 = vpop.permute.xlu0 %6064  ;;  %v6140_v42 = vpop.permute.xlu1 %6139 }
 0x258   : > { %8098 = vmatpush3.msk.msra.mxu1 %vm556_vm1, %v9845_v10  ;;  %8099 = vmatprep.mubr.msk.f32.mxu1 %vm8931_vm0, %v8930_v0 }
 0x259   : > { %8107 = vmatprep.subr.mxu1 %v8930_v0  ;;  %8163 = vmatpush3.msk.msra.mxu0 %vm556_vm1, %v9961_v27 }
 0x25a   : > { %8164 = vmatprep.mubr.msk.f32.mxu0 %vm8931_vm0, %v8930_v0  ;;  %8172 = vmatprep.subr.mxu0 %v8930_v0 }
 0x25b   : > { %8100 = vmatmul.mubr.msk.f32.vlgmr.msra.gmra.mrb[18].mxu1 %vm553_vm2, %v9872_v17  ;;  %8165 = vmatmul.mubr.msk.f32.vlgmr.msra.gmra.mrb[32].mxu0 %vm553_vm2, %v5458_v15  ;;  %v6215_v36 = vpop.permute.xlu0 %6214  ;;  %v6291_v43 = vpop.permute.xlu1 %6290 }
 0x25c   : > { %8108 = vmatpush3.msk.msra.mxu1 %vm556_vm1, %v9855_v12  ;;  %8109 = vmatprep.mubr.msk.f32.mxu1 %vm8931_vm0, %v8930_v0 }
 0x25d   : > { %8117 = vmatprep.subr.mxu1 %v8930_v0  ;;  %8173 = vmatpush3.msk.msra.mxu0 %vm556_vm1, %v9983_v30 }
 0x25e   : > { %8174 = vmatprep.mubr.msk.f32.mxu0 %vm8931_vm0, %v8930_v0  ;;  %8182 = vmatprep.subr.mxu0 %v8930_v0 }
 0x25f   : > { %8110 = vmatmul.mubr.msk.f32.vlgmr.msra.gmra.mrb[20].mxu1 %vm553_vm2, %v9886_v19  ;;  %8175 = vmatmul.mubr.msk.f32.vlgmr.msra.gmra.mrb[34].mxu0 %vm553_vm2, %v5617_v24  ;;  %v6365_v38 = vpop.permute.xlu0 %6364  ;;  %v6439_v44 = vpop.permute.xlu1 %6438 }
 0x260   : > { %8118 = vmatpush3.msk.msra.mxu1 %vm556_vm1, %v9801_v2  ;;  %8119 = vmatprep.mubr.msk.f32.mxu1 %vm8931_vm0, %v8930_v0 }
 0x261   : > { %8127 = vmatprep.subr.mxu1 %v8930_v0  ;;  %8183 = vmatpush3.msk.msra.mxu0 %vm556_vm1, %v9998_v33 }
 0x262   : > { %8184 = vmatprep.mubr.msk.f32.mxu0 %vm8931_vm0, %v8930_v0  ;;  %8192 = vmatprep.subr.mxu0 %v8930_v0 }
 0x263   : > { %8120 = vmatmul.mubr.msk.f32.vlgmr.msra.gmra.mrb[22].mxu1 %vm553_vm2, %v9908_v22  ;;  %8185 = vmatmul.mubr.msk.f32.vlgmr.msra.gmra.mrb[36].mxu0 %vm553_vm2, %v5766_v28  ;;  %v6514_v40 = vpop.permute.xlu0 %6513  ;;  %v6589_v45 = vpop.permute.xlu1 %6588 }
 0x264   : > { %8128 = vmatpush3.msk.msra.mxu1 %vm556_vm1, %v9809_v4  ;;  %8129 = vmatprep.mubr.msk.f32.mxu1 %vm8931_vm0, %v8930_v0 }
 0x265   : > { %8137 = vmatprep.subr.mxu1 %v8930_v0  ;;  %8193 = vmatpush3.msk.msra.mxu0 %vm556_vm1, %v9931_v21 }
 0x266   : > { %8194 = vmatprep.mubr.msk.f32.mxu0 %vm8931_vm0, %v8930_v0  ;;  %8202 = vmatprep.subr.mxu0 %v8930_v0 }
 0x267   : > { %8130 = vmatmul.mubr.msk.f32.vlgmr.msra.gmra.mrb[24].mxu1 %vm553_vm2, %v9926_v23  ;;  %8195 = vmatmul.mubr.msk.f32.vlgmr.msra.gmra.mrb[38].mxu0 %vm553_vm2, %v5917_v31 }
 0x268   : > { %8138 = vmatpush3.msk.msra.mxu1 %vm556_vm1, %v9823_v7  ;;  %8139 = vmatprep.mubr.msk.f32.mxu1 %vm8931_vm0, %v8930_v0 }
 0x269   : > { %8147 = vmatprep.subr.mxu1 %v8930_v0  ;;  %8203 = vmatpush3.msk.msra.mxu0 %vm556_vm1, %v9946_v25 }
 0x26a   : > { %8204 = vmatprep.mubr.msk.f32.mxu0 %vm8931_vm0, %v8930_v0  ;;  %8212 = vmatprep.subr.mxu0 %v8930_v0 }
 0x26b   : > { %8140 = vmatmul.mubr.msk.f32.vlgmr.msra.gmra.mrb[26].mxu1 %vm553_vm2, %v5056_v26  ;;  %8205 = vmatmul.mubr.msk.f32.vlgmr.msra.gmra.mrb[40].mxu0 %vm553_vm2, %v6065_v34 }
 0x26c   : > { %8148 = vmatpush3.msk.msra.mxu1 %vm556_vm1, %v9983_v30  ;;  %8149 = vmatprep.mubr.msk.f32.mxu1 %vm8931_vm0, %v8930_v0 }
 0x26d   : > { %8157 = vmatprep.subr.mxu1 %v8930_v0  ;;  %8213 = vmatpush3.msk.msra.mxu0 %vm556_vm1, %v9961_v27 }
 0x26e   : > { %8214 = vmatprep.mubr.msk.f32.mxu0 %vm8931_vm0, %v8930_v0  ;;  %8222 = vmatprep.subr.mxu0 %v8930_v0 }
 0x26f   : > { %8150 = vmatmul.mubr.msk.f32.vlgmr.msra.gmra.mrb[28].mxu1 %vm553_vm2, %v5225_v29  ;;  %8215 = vmatmul.mubr.msk.f32.vlgmr.msra.gmra.mrb[42].mxu0 %vm553_vm2, %v6215_v36 }
 0x270   : > { %8158 = vmatpush3.msk.msra.mxu1 %vm556_vm1, %v9998_v33  ;;  %8159 = vmatprep.mubr.msk.f32.mxu1 %vm8931_vm0, %v8930_v0 }
 0x271   : > { %8167 = vmatprep.subr.mxu1 %v8930_v0  ;;  %8223 = vmatpush3.msk.msra.mxu0 %vm556_vm1, %v9983_v30 }
 0x272   : > { %8224 = vmatprep.mubr.msk.f32.mxu0 %vm8931_vm0, %v8930_v0  ;;  %8232 = vmatprep.subr.mxu0 %v8930_v0 }
 0x273   : > { %8160 = vmatmul.mubr.msk.f32.vlgmr.msra.gmra.mrb[30].mxu1 %vm553_vm2, %v5380_v32  ;;  %8225 = vmatmul.mubr.msk.f32.vlgmr.msra.gmra.mrb[44].mxu0 %vm553_vm2, %v6365_v38 }
 0x274   : > { %8168 = vmatpush3.msk.msra.mxu1 %vm556_vm1, %v9931_v21  ;;  %8169 = vmatprep.mubr.msk.f32.mxu1 %vm8931_vm0, %v8930_v0 }
 0x275   : > { %8177 = vmatprep.subr.mxu1 %v8930_v0  ;;  %8233 = vmatpush3.msk.msra.mxu0 %vm556_vm1, %v9998_v33 }
 0x276   : > { %8234 = vmatprep.mubr.msk.f32.mxu0 %vm8931_vm0, %v8930_v0 }
 0x277   : > { %8170 = vmatmul.mubr.msk.f32.vlgmr.msra.gmra.mrb[32].mxu1 %vm553_vm2, %v5543_v35  ;;  %8235 = vmatmul.mubr.msk.f32.vlgmr.msra.gmra.mrb[46].mxu0 %vm553_vm2, %v6514_v40 }
 0x278   : > { %8178 = vmatpush3.msk.msra.mxu1 %vm556_vm1, %v9946_v25  ;;  %8179 = vmatprep.mubr.msk.f32.mxu1 %vm8931_vm0, %v8930_v0 }
 0x279   : > { %8187 = vmatprep.subr.mxu1 %v8930_v0 }
 0x27b   : > { %8180 = vmatmul.mubr.msk.f32.vlgmr.msra.gmra.mrb[34].mxu1 %vm553_vm2, %v5691_v37 }
 0x27c   : > { %8188 = vmatpush3.msk.msra.mxu1 %vm556_vm1, %v9961_v27  ;;  %8189 = vmatprep.mubr.msk.f32.mxu1 %vm8931_vm0, %v8930_v0 }
 0x27d   : > { %8197 = vmatprep.subr.mxu1 %v8930_v0 }
 0x27f   : > { %8190 = vmatmul.mubr.msk.f32.vlgmr.msra.gmra.mrb[36].mxu1 %vm553_vm2, %v5841_v39 }
 0x280   : > { %8198 = vmatpush3.msk.msra.mxu1 %vm556_vm1, %v9983_v30  ;;  %8199 = vmatprep.mubr.msk.f32.mxu1 %vm8931_vm0, %v8930_v0 }
 0x281   : > { %8207 = vmatprep.subr.mxu1 %v8930_v0 }
 0x283   : > { %8200 = vmatmul.mubr.msk.f32.vlgmr.msra.gmra.mrb[38].mxu1 %vm553_vm2, %v5991_v41 }
 0x284   : > { %8208 = vmatpush3.msk.msra.mxu1 %vm556_vm1, %v9998_v33  ;;  %8209 = vmatprep.mubr.msk.f32.mxu1 %vm8931_vm0, %v8930_v0 }
 0x285   : > { %8217 = vmatprep.subr.mxu1 %v8930_v0 }
 0x287   : > { %8210 = vmatmul.mubr.msk.f32.vlgmr.msra.gmra.mrb[40].mxu1 %vm553_vm2, %v6140_v42 }
 0x288   : > { %8218 = vmatpush3.msk.msra.mxu1 %vm556_vm1, %v9931_v21  ;;  %8219 = vmatprep.mubr.msk.f32.mxu1 %vm8931_vm0, %v8930_v0  ;;  %v7567_v21 = vld [vmem:[#allocation11] ss:$0 sm:$0xff] }
 0x289   : > { %8227 = vmatprep.subr.mxu1 %v8930_v0 }
 0x28b   : > { %8220 = vmatmul.mubr.msk.f32.vlgmr.msra.gmra.mrb[42].mxu1 %vm553_vm2, %v6291_v43 }
 0x28c   : > { %8228 = vmatpush3.msk.msra.mxu1 %vm556_vm1, %v9946_v25  ;;  %8229 = vmatprep.mubr.msk.f32.mxu1 %vm8931_vm0, %v8930_v0 }
 0x28d   : > { %8237 = vmatprep.subr.mxu1 %v8930_v0 }
 0x28f   : > { %8230 = vmatmul.mubr.msk.f32.vlgmr.msra.gmra.mrb[44].mxu1 %vm553_vm2, %v6439_v44 }
 0x290   : > { %8238 = vmatpush3.msk.msra.mxu1 %vm556_vm1, %v9961_v27  ;;  %8239 = vmatprep.mubr.msk.f32.mxu1 %vm8931_vm0, %v8930_v0 }
 0x293   : > { %8240 = vmatmul.mubr.msk.f32.vlgmr.msra.gmra.mrb[46].mxu1 %vm553_vm2, %v6589_v45 }
 0x294   : > { %8258 = vmatprep.mubr.msk.f32.mxu1 %vm8931_vm0, %v8930_v0 }
 0x2aa   : > { %v10112_v46 = vpop.f32.mrb[0].mxu1 }
 0x2ab   : > { %v7891_v47 = vpop.f32.mrb[1].mxu1 }
 0x2b2   : > { %v10114_v48 = vpop.f32.mrb[2].mxu0 }
 0x2b3   : > { %v7916_v49 = vpop.f32.mrb[3].mxu0 }
 0x2ce   : > { %v10116_v50 = vpop.f32.mrb[2].mxu1 }
 0x2cf   : > { %v7941_v51 = vpop.f32.mrb[3].mxu1 }
 0x2d6   : > { %v10118_v52 = vpop.f32.mrb[4].mxu0 }
 0x2d7   : > { %v7966_v53 = vpop.f32.mrb[5].mxu0 }
 0x2f2   : > { %v10120_v54 = vpop.f32.mrb[4].mxu1 }
 0x2f3   : > { %v7991_v55 = vpop.f32.mrb[5].mxu1 }
 0x2fa   : > { %v10122_v56 = vpop.f32.mrb[6].mxu0 }
 0x2fb   : > { %v8016_v57 = vpop.f32.mrb[7].mxu0 }
 0x2fe   : > { %v3689_v58 = vpop.f32.mrb[8].mxu0 }
 0x2ff   : > { %v8046_v59 = vpop.f32.mrb[9].mxu0 }
 0x302   : > { %v3840_v60 = vpop.f32.mrb[10].mxu0 }
 0x303   : > { %v8056_v61 = vpop.f32.mrb[11].mxu0 }
 0x306   : > { %v3997_v62 = vpop.f32.mrb[12].mxu0 }
 0x307   : > { %v8066_v63 = vpop.f32.mrb[13].mxu0 }
 0x30a   : > { %v4153_v1 = vpop.f32.mrb[14].mxu0 }
 0x30b   : > { %v8076_v2 = vpop.f32.mrb[15].mxu0 }
 0x30e   : > { %v4302_v3 = vpop.f32.mrb[16].mxu0 }
 0x30f   : > { %v8086_v4 = vpop.f32.mrb[17].mxu0 }
 0x312   : > { %v4453_v5 = vpop.f32.mrb[18].mxu0 }
 0x313   : > { %v8096_v6 = vpop.f32.mrb[19].mxu0 }
 0x316   : > { %v10124_v7 = vpop.f32.mrb[6].mxu1  ;;  %v4601_v8 = vpop.f32.mrb[20].mxu0 }
 0x317   : > { %v8041_v9 = vpop.f32.mrb[7].mxu1  ;;  %v8106_v10 = vpop.f32.mrb[21].mxu0 }
 0x31a   : > { %v3764_v11 = vpop.f32.mrb[8].mxu1  ;;  %v4751_v12 = vpop.f32.mrb[22].mxu0 }
 0x31b   : > { %v3765_v13 = vadd.f32 %v3764_v11, %v3689_v58  ;;  %v8051_v16 = vpop.f32.mrb[9].mxu1  ;;  %v8116_v17 = vpop.f32.mrb[23].mxu0 }
 0x31d   : > { %v3844_v18 = vadd.f32 %v3840_v60, %v3765_v13 }
 0x31e   : > { %v3917_v19 = vpop.f32.mrb[10].mxu1  ;;  %v4901_v20 = vpop.f32.mrb[24].mxu0 }
 0x31f   : > { %v3921_v22 = vadd.f32 %v3917_v19, %v3844_v18  ;;  %v8061_v15 = vpop.f32.mrb[11].mxu1  ;;  %v8126_v23 = vpop.f32.mrb[25].mxu0 }
 0x321   : > { %v4001_v24 = vadd.f32 %v3997_v62, %v3921_v22 }
 0x322   : > { %v4079_v25 = vpop.f32.mrb[12].mxu1  ;;  %v5050_v26 = vpop.f32.mrb[26].mxu0 }
 0x323   : > { %v10126_v27 = vadd.f32 %v7567_v21, %v4001_v24  ;;  %v4154_v28 = vadd.f32 %v4153_v1, %v4079_v25  ;;  %v8071_v29 = vpop.f32.mrb[13].mxu1  ;;  %v8136_v30 = vpop.f32.mrb[27].mxu0 }
 0x324   : > { %v7608_v30 = vld [vmem:[#allocation14] ss:$0 sm:$0xff] }
 0x326   : > { %v4227_v31 = vpop.f32.mrb[14].mxu1  ;;  %v5220_v32 = vpop.f32.mrb[28].mxu0 }
 0x327   : > { %v4231_v33 = vadd.f32 %v4227_v31, %v4154_v28  ;;  %v8081_v34 = vpop.f32.mrb[15].mxu1  ;;  %v8146_v35 = vpop.f32.mrb[29].mxu0 }
 0x329   : > { %v4306_v36 = vadd.f32 %v4302_v3, %v4231_v33 }
 0x32a   : > { %v4377_v37 = vpop.f32.mrb[16].mxu1  ;;  %v5374_v38 = vpop.f32.mrb[30].mxu0 }
 0x32b   : > { %v4381_v39 = vadd.f32 %v4377_v37, %v4306_v36  ;;  %v8091_v40 = vpop.f32.mrb[17].mxu1  ;;  %v8156_v41 = vpop.f32.mrb[31].mxu0 }
 0x32d   : > { %v4382_v42 = vadd.f32 %v7567_v21, %v4381_v39 }
 0x32e   : > { %v4527_v43 = vpop.f32.mrb[18].mxu1  ;;  %v5530_v44 = vpop.f32.mrb[32].mxu0 }
 0x32f   : > { %v4528_v45 = vadd.f32 %v4527_v43, %v4453_v5  ;;  %v8101_v47 = vpop.f32.mrb[19].mxu1  ;;  %5132 = vrot.lane.b32.xlu0 %v4382_v42, %s8939_s2  ;;  %v8166_v49 = vpop.f32.mrb[33].mxu0 }
 0x331   : > { %v4605_v51 = vadd.f32 %v4601_v8, %v4528_v45 }
 0x332   : > { %v4676_v53 = vpop.f32.mrb[20].mxu1  ;;  %v5686_v55 = vpop.f32.mrb[34].mxu0 }
 0x333   : > { %v4680_v57 = vadd.f32 %v4676_v53, %v4605_v51  ;;  %v8111_v58 = vpop.f32.mrb[21].mxu1  ;;  %v8176_v59 = vpop.f32.mrb[35].mxu0 }
 0x335   : > { %v4755_v60 = vadd.f32 %v4751_v12, %v4680_v57 }
 0x336   : > { %v4827_v61 = vpop.f32.mrb[22].mxu1  ;;  %v5835_v62 = vpop.f32.mrb[36].mxu0 }
 0x337   : > { %v4756_v63 = vadd.f32 %v7567_v21, %v4755_v60  ;;  %v4902_v1 = vadd.f32 %v4901_v20, %v4827_v61  ;;  %v8121_v2 = vpop.f32.mrb[23].mxu1  ;;  %v8186_v3 = vpop.f32.mrb[37].mxu0 }
 0x339   : > { %5136 = vrot.lane.b32.xlu1 %v4756_v63, %s8940_s0 }
 0x33a   : > { %v4975_v4 = vpop.f32.mrb[24].mxu1  ;;  %v5986_v5 = vpop.f32.mrb[38].mxu0 }
 0x33b   : > { %v4979_v6 = vadd.f32 %v4975_v4, %v4902_v1  ;;  %v8131_v9 = vpop.f32.mrb[25].mxu1  ;;  %v8196_v8 = vpop.f32.mrb[39].mxu0 }
 0x33c   : > { %v7496_v9 = vld [vmem:[#allocation8] ss:$0 sm:$0xff] }
 0x33d   : > { %v5054_v10 = vadd.f32 %v5050_v26, %v4979_v6  ;;  %2088 = vrot.lane.b32.xlu1 %v10116_v50, %s8941_s26 }
 0x33e   : > { %v5125_v11 = vpop.f32.mrb[26].mxu1  ;;  %v6134_v12 = vpop.f32.mrb[40].mxu0 }
 0x33f   : > { %v5129_v13 = vadd.f32 %v5125_v11, %v5054_v10  ;;  %v8141_v16 = vpop.f32.mrb[27].mxu1  ;;  %v8206_v17 = vpop.f32.mrb[41].mxu0 }
 0x341   : > { %v5130_v18 = vadd.f32 %v7567_v21, %v5129_v13  ;;  %3592 = vrot.lane.b32.xlu1 %v10124_v7, %s8941_s26 }
 0x342   : > { %v5297_v19 = vpop.f32.mrb[28].mxu1  ;;  %v6284_v20 = vpop.f32.mrb[42].mxu0 }
 0x343   : > { %5140 = vrot.lane.b32.xlu0 %v5130_v18, %s8942_s22  ;;  %v5298_v22 = vadd.f32 %v5297_v19, %v5220_v32  ;;  %v8151_v15 = vpop.f32.mrb[29].mxu1  ;;  %v8216_v23 = vpop.f32.mrb[43].mxu0 }
 0x345   : > { %v5378_v24 = vadd.f32 %v5374_v38, %v5298_v22 }
 0x346   : > { %v5452_v25 = vpop.f32.mrb[30].mxu1  ;;  %v6434_v50 = vpop.f32.mrb[44].mxu0 }
 0x347   : > { %2840 = vrot.lane.b32.xlu0 %v10120_v54, %s8941_s26  ;;  %v5456_v26 = vadd.f32 %v5452_v25, %v5378_v24  ;;  %v8161_v28 = vpop.f32.mrb[31].mxu1  ;;  %v8226_v21 = vpop.f32.mrb[45].mxu0 }
 0x349   : > { %v5534_v29 = vadd.f32 %v5530_v44, %v5456_v26 }
 0x34a   : > { %v5612_v7 = vpop.f32.mrb[32].mxu1  ;;  %v6583_v31 = vpop.f32.mrb[46].mxu0 }
 0x34b   : > { %v10137_v33 = vadd.f32 %v7608_v30, %v5534_v29  ;;  %v5687_v34 = vadd.f32 %v5686_v55, %v5612_v7  ;;  %v8171_v35 = vpop.f32.mrb[33].mxu1  ;;  %v8236_v32 = vpop.f32.mrb[47].mxu0 }
 0x34e   : > { %v5760_v36 = vpop.f32.mrb[34].mxu1 }
 0x34f   : > { %v5764_v37 = vadd.f32 %v5760_v36, %v5687_v34  ;;  %v8181_v38 = vpop.f32.mrb[35].mxu1 }
 0x351   : > { %v5839_v39 = vadd.f32 %v5835_v62, %v5764_v37 }
 0x352   : > { %v5910_v40 = vpop.f32.mrb[36].mxu1 }
 0x353   : > { %v5914_v41 = vadd.f32 %v5910_v40, %v5839_v39  ;;  %v8191_v42 = vpop.f32.mrb[37].mxu1 }
 0x355   : > { %v5915_v54 = vadd.f32 %v7608_v30, %v5914_v41 }
 0x356   : > { %v6060_v43 = vpop.f32.mrb[38].mxu1 }
 0x357   : > { %v6061_v45 = vadd.f32 %v6060_v43, %v5986_v5  ;;  %6665 = vrot.lane.b32.xlu0 %v5915_v54, %s8939_s2  ;;  %v8201_v44 = vpop.f32.mrb[39].mxu1 }
 0x359   : > { %v6138_v47 = vadd.f32 %v6134_v12, %v6061_v45 }
 0x35a   : > { %v6209_v49 = vpop.f32.mrb[40].mxu1 }
 0x35b   : > { %v6213_v51 = vadd.f32 %v6209_v49, %v6138_v47  ;;  %v8211_v53 = vpop.f32.mrb[41].mxu1 }
 0x35d   : > { %v6288_v55 = vadd.f32 %v6284_v20, %v6213_v51 }
 0x35e   : > { %v6360_v57 = vpop.f32.mrb[42].mxu1 }
 0x35f   : > { %v6289_v58 = vadd.f32 %v7608_v30, %v6288_v55  ;;  %v6435_v59 = vadd.f32 %v6434_v50, %v6360_v57  ;;  %v8221_v60 = vpop.f32.mrb[43].mxu1 }
 0x361   : > { %6669 = vrot.lane.b32.xlu1 %v6289_v58, %s8940_s0 }
 0x362   : > { %v6508_v61 = vpop.f32.mrb[44].mxu1 }
 0x363   : > { %v6512_v62 = vadd.f32 %v6508_v61, %v6435_v59  ;;  %v8231_v63 = vpop.f32.mrb[45].mxu1 }
 0x365   : > { %v6587_v1 = vadd.f32 %v6583_v31, %v6512_v62 }
 0x366   : > { %v6658_v2 = vpop.f32.mrb[46].mxu1 }
 0x367   : > { %v6662_v3 = vadd.f32 %v6658_v2, %v6587_v1  ;;  %v8241_v4 = vpop.f32.mrb[47].mxu1 }
 0x368   : > { %v6918_v4 = vld [vmem:[#allocation16] sm:$0xff] }
 0x369   : > { %v6663_v5 = vadd.f32 %v7608_v30, %v6662_v3  ;;  %v8943_v3 = vmov 0.0|0.0  }
 0x36a   : > { %8297 = vmatprep.subr.bf16.mxu1 %v8943_v3 }
 0x36b   : > { %6673 = vrot.lane.b32.xlu0 %v6663_v5, %s8942_s22  ;;  %v6919_v5 = vld [vmem:[#allocation16 + $0x8] sm:$0xff] }
 0x36f   : > { %1329 = vrot.lane.b32.xlu0 %v10112_v46, %s8941_s26 }
 0x3a1   : > { %v5133_v11 = vpop.permute.xlu0 %5132 }
 0x3a2   : > { %v5143_v13 = vsel %vm3609_vm5, %v10126_v27, %v5133_v11 }
 0x3ab   : > { %v5137_v6 = vpop.permute.xlu1 %5136 }
 0x3ac   : > { %v5144_v46 = vsel %vm3611_vm6, %v5143_v13, %v5137_v6  ;;  %v8304_v6 = vpack.c.bf16 %v6919_v5, %v6918_v4 }
 0x3af   : > { %v2089_v8 = vpop.permute.xlu1 %2088 }
 0x3b0   : > { %v2091_v10 = vsel %vm1332_vm4, %v10114_v48, %v2089_v8 }
 0x3b1   : > { %v2092_v12 = vadd.f32 %v7496_v9, %v2091_v10 }
 0x3b3   : > { %3598 = vrot.lane.b32.xlu0 %v2092_v12, %s8939_s2  ;;  %v3593_v48 = vpop.permute.xlu1 %3592 }
 0x3b4   : > { %v3595_v24 = vsel %vm1332_vm4, %v10122_v56, %v3593_v48 }
 0x3b5   : > { %v5141_v16 = vpop.permute.xlu0 %5140  ;;  %v3596_v50 = vadd.f32 %v7496_v9, %v3595_v24 }
 0x3b6   : > { %v5145_v17 = vsel %vm3613_vm7, %v5144_v46, %v5141_v16 }
 0x3b7   : > { %v6691_v18 = vsel %vm6679_vm8, %v5145_v17, -inf }
 0x3b8   : > { %v6692_v19 = vrot.slane %v6691_v18, 4 }
 0x3b9   : > { %v2841_v20 = vpop.permute.xlu0 %2840 }
 0x3ba   : > { %v6693_v22 = vmax.f32 %v6691_v18, %v6692_v19  ;;  %v2843_v15 = vsel %vm1332_vm4, %v10118_v52, %v2841_v20  ;;  %v6920_v18 = vld [vmem:[#allocation16 + $0x10] sm:$0xff] }
 0x3bb   : > { %v2844_v23 = vadd.f32 %v7496_v9, %v2843_v15 }
 0x3bc   : > { %v6694_v27 = vrot.slane %v6693_v22, 2 }
 0x3bd   : > { %3602 = vrot.lane.b32.xlu0 %v2844_v23, %s8940_s0 }
 0x3be   : > { %v6695_v25 = vmax.f32 %v6693_v22, %v6694_v27 }
 0x3c0   : > { %v6696_v26 = vrot.slane %v6695_v25, 1 }
 0x3c1   : > { %3606 = vrot.lane.b32.xlu0 %v3596_v50, %s8942_s22 }
 0x3c2   : > { %v6697_v28 = vmax.f32 %v6695_v25, %v6696_v26 }
 0x3c4   : > { %v6698_v21 = vsub.f32 %v5145_v17, %v6697_v28 }
 0x3c6   : > { %v6699_v29 = vmul.f32 1.442695, %v6698_v21 }
 0x3c8   : > { %8532 = vpow2.f32 %v6699_v29 }
 0x3c9   : > { %v6666_v35 = vpop.permute.xlu0 %6665 }
 0x3ca   : > { %v6676_v36 = vsel %vm3609_vm5, %v10137_v33, %v6666_v35 }
 0x3d2   : > { %v8533_v30 = vpop.eup %8532 }
 0x3d3   : > { %v6701_v7 = vsel %vm6679_vm8, %v8533_v30, 0.0  ;;  %v6670_v32 = vpop.permute.xlu1 %6669 }
 0x3d4   : > { %v6702_v52 = vrot.slane %v6701_v7, 4  ;;  %v6677_v38 = vsel %vm3611_vm6, %v6676_v36, %v6670_v32 }
 0x3d6   : > { %v6703_v31 = vadd.f32 %v6702_v52, %v6701_v7 }
 0x3d8   : > { %v6704_v34 = vrot.slane %v6703_v31, 2 }
 0x3da   : > { %v6705_v56 = vadd.f32 %v6704_v34, %v6703_v31 }
 0x3dc   : > { %v6706_v37 = vrot.slane %v6705_v56, 1 }
 0x3dd   : > { %v6674_v39 = vpop.permute.xlu0 %6673 }
 0x3de   : > { %v6678_v40 = vsel %vm3613_vm7, %v6677_v38, %v6674_v39  ;;  %v6707_v41 = vadd.f32 %v6706_v37, %v6705_v56 }
 0x3df   : > { %8242 = vmatprep.subr.msk.mxu0 %vm6755_vm9, %v6678_v40 }
 0x3e0   : > { %8243 = vmatpush3.msk.msra.mxu0 %vm6755_vm9, %v6678_v40  ;;  %8534 = vrcp.f32 %v6707_v41 }
 0x3e1   : > { %v1330_v42 = vpop.permute.xlu0 %1329  ;;  %8303 = vmatprep.subr.bf16.mxu0 %v8943_v3 }
 0x3e2   : > { %v1333_v54 = vsel %vm1332_vm4, %v9862_v14, %v1330_v42 }
 0x3e3   : > { %v1340_v43 = vadd.f32 %v7496_v9, %v1333_v54 }
 0x3ea   : > { %v8535_v45 = vpop.eup %8534 }
 0x3eb   : > { %v6709_v44 = vmul.f32 %v8535_v45, %v8533_v30  ;;  %v7645_v30 = vld [vmem:[#allocation17] ss:$0 sm:$0xff] }
 0x3ed   : > { %6710 = vxpose.xlu1.b32.start.end [1/1] (short) (narrow) %v6709_v44, 32 }
 0x425   : > { %v3599_v33 = vpop.permute.xlu0 %3598 }
 0x426   : > { %v3610_v49 = vsel %vm3609_vm5, %v1340_v43, %v3599_v33 }
 0x42f   : > { %v3603_v47 = vpop.permute.xlu0 %3602 }
 0x430   : > { %v3612_v51 = vsel %vm3611_vm6, %v3610_v49, %v3603_v47 }
 0x433   : > { %v3607_v53 = vpop.permute.xlu0 %3606 }
 0x434   : > { %v3614_v55 = vsel %vm3613_vm7, %v3612_v51, %v3607_v53 }
 0x435   : > { %v6680_v57 = vsel %vm6679_vm8, %v3614_v55, -inf }
 0x436   : > { %6681 = vmax.xlane.f32.xlu0 %v6680_v57 }
 0x46d   : > { %v6726_v58 = vpop.trf.xlu1 }
 0x46e   : > { %8244 = vmatprep.mubr.msk.f32.mxu0 %vm6742_vm10, %v6726_v58 }
 0x471   : > { %v6727_v14 = vpop.trf.xlu1 }
 0x472   : > { %8245 = vmatmul.mubr.msk.f32.vlgmr.msra.gmra.mrb[48].mxu0 %vm6742_vm10, %v6727_v14 }
 0x473   : > { %8305 = vmatpush3.bf16.msra.mxu0 %v8304_v6 }
 0x474   : > { %8265 = vmatprep.subr.mxu0 %v8930_v0 }
 0x475   : > { %v6728_v59 = vpop.trf.xlu1 }
 0x476   : > { %8247 = vmatprep.mubr.msk.f32.mxu0 %vm6742_vm10, %v6728_v59 }
 0x477   : > { %8266 = vmatpush3.msra.mxu0 %v6920_v18 }
 0x478   : > { %8309 = vmatprep.subr.bf16.mxu0 %v8943_v3 }
 0x479   : > { %v6729_v60 = vpop.trf.xlu1 }
 0x47a   : > { %8248 = vmatmul.mubr.msk.f32.gmra.mrb[50].mxu0 %vm6742_vm10, %v6729_v60 }
 0x47b   : > { %8267 = vmatprep.mubr.msk.f32.mxu0 %vm8931_vm0, %v8930_v0 }
 0x4c3   : > { %v6682_v61 = vpop.xlane.xlu0 %6681 }
 0x4c4   : > { %v6683_v62 = vsub.f32 %v3614_v55, %v6682_v61 }
 0x4c6   : > { %v6684_v63 = vmul.f32 1.442695, %v6683_v62 }
 0x4c8   : > { %8536 = vpow2.f32 %v6684_v63 }
 0x4d2   : > { %v8537_v1 = vpop.eup %8536 }
 0x4d3   : > { %v6686_v2 = vsel %vm6679_vm8, %v8537_v1, 0.0 }
 0x4d4   : > { %6687 = vadd.xlane.f32.xlu1 %v6686_v2 }
 0x545   : > { %v8246_v9 = vpop.f32.mrb[48].mxu0 }
 0x546   : > { %v6825_v8 = vpop.f32.mrb[49].mxu0 }
 0x547   : > { %v8298_v10 = vpack.c.bf16 %v8246_v9, %v6825_v8 }
 0x549   : > { %8299 = vmatpush3.bf16.msra.mxu1 %v8298_v10 }
 0x54a   : > { %8300 = vmatprep.subr.bf16.mxu1 %v8943_v3 }
 0x54d   : > { %v8249_v11 = vpop.f32.mrb[50].mxu0 }
 0x54e   : > { %v6835_v12 = vpop.f32.mrb[51].mxu0 }
 0x54f   : > { %v8301_v13 = vpack.c.bf16 %v8249_v11, %v6835_v12 }
 0x551   : > { %8302 = vmatpush3.bf16.msra.mxu1 %v8301_v13 }
 0x552   : > { %8306 = vmatprep.subr.bf16.mxu1 %v8943_v3 }
 0x561   : > { %v6688_v46 = vpop.xlane.xlu1 %6687 }
 0x562   : > { %8538 = vrcp.f32 %v6688_v46 }
 0x56c   : > { %v8539_v16 = vpop.eup %8538 }
 0x56d   : > { %v6690_v17 = vmul.f32 %v8539_v16, %v8537_v1 }
 0x56f   : > { %8259 = vmatmul.mubr.msk.f32.vlgmr.msra.gmra.mrb[48].mxu1 %vm6844_vm11, %v6690_v17 }
 0x570   : > { %8308 = vmatpush3.bf16.msra.mxu1 %v8304_v6  ;;  %8276 = vmatprep.mubr.msk.f32.mxu1 %vm8931_vm0, %v8930_v0 }
 0x571   : > { %8274 = vmatprep.subr.mxu1 %v8930_v0 }
 0x574   : > { %8275 = vmatpush3.msra.mxu1 %v6920_v18 }
 0x575   : > { %8312 = vmatprep.subr.bf16.mxu1 %v8943_v3 }
 0x642   : > { %v6914_v19 = vpop.f32.mrb[48].mxu1 }
 0x643   : > { %6929 = vrot.lane.b32.xlu0 %v6914_v19, %s8939_s2  ;;  %v8260_v48 = vpop.f32.mrb[49].mxu1  ;;  %8277 = vmatmul.mubr.msk.f32.vlgmr.msra.gmra.mrb[50].mxu1 %vm3613_vm7, %v6914_v19  ;;  %v6923_v20 = vrot.slane %v6914_v19, 7  ;;  %v7162_v22 = vrot.slane %v6914_v19, 1 }
 0x644   : > { %8314 = vmatpush3.bf16.msra.mxu1 %v8304_v6  ;;  %8294 = vmatprep.mubr.msk.f32.mxu1 %vm8931_vm0, %v8930_v0 }
 0x645   : > { %8292 = vmatprep.subr.mxu1 %v8930_v0  ;;  %v7164_v15 = vsel %vm860_vm3, %v7162_v22, 0.0 }
 0x647   : > { %7085 = vrot.lane.b32.xlu0 %v6914_v19, %s8935_s29 }
 0x648   : > { %8293 = vmatpush3.msra.mxu1 %v6920_v18 }
 0x64b   : > { %6924 = vrot.lane.b32.xlu0 %v6923_v20, %s8944_s5 }
 0x64f   : > { %7165 = vrot.lane.b32.xlu0 %v6914_v19, %s8945_s25 }
 0x653   : > { %7169 = vrot.lane.b32.xlu0 %v7164_v15, %s8940_s0 }
 0x6b5   : > { %v6930_v23 = vpop.permute.xlu0 %6929 }
 0x6b9   : > { %v7086_v24 = vpop.permute.xlu0 %7085 }
 0x6bd   : > { %v6925_v27 = vpop.permute.xlu0 %6924 }
 0x6be   : > { %v6928_v25 = vsel %vm6927_vm12, 0.0, %v6925_v27 }
 0x6bf   : > { %v6932_v50 = vsel %vm3609_vm5, %v6928_v25, %v6930_v23 }
 0x6c0   : > { %v6933_v26 = vsel %vm3611_vm6, %v6932_v50, %v6930_v23 }
 0x6c1   : > { %8268 = vmatmul.mubr.msk.f32.vlgmr.msra.gmra.mrb[52].mxu0 %vm3613_vm7, %v6933_v26  ;;  %v7166_v28 = vpop.permute.xlu0 %7165 }
 0x6c2   : > { %8311 = vmatpush3.bf16.msra.mxu0 %v8304_v6  ;;  %8285 = vmatprep.mubr.msk.f32.mxu0 %vm8931_vm0, %v8930_v0 }
 0x6c3   : > { %8283 = vmatprep.subr.mxu0 %v8930_v0 }
 0x6c5   : > { %v7170_v21 = vpop.permute.xlu0 %7169 }
 0x6c6   : > { %8284 = vmatpush3.msra.mxu0 %v6920_v18  ;;  %v7172_v29 = vsel %vm3611_vm6, %v7166_v28, %v7170_v21 }
 0x6c7   : > { %8286 = vmatmul.mubr.msk.f32.vlgmr.msra.gmra.mrb[54].mxu0 %vm3613_vm7, %v7086_v24  ;;  %8295 = vmatmul.mubr.msk.f32.vlgmr.msra.gmra.mrb[52].mxu1 %vm3613_vm7, %v7172_v29 }
 0x716   : > { %v7081_v7 = vpop.f32.mrb[50].mxu1 }
 0x717   : > { %v7082_v52 = vadd.f32 %v7645_v30, %v7081_v7  ;;  %v8278_v31 = vpop.f32.mrb[51].mxu1 }
 0x719   : > { %7247 = vrot.lane.b32.xlu0 %v7082_v52, %s8941_s26 }
 0x78b   : > { %v7248_v39 = vpop.permute.xlu0 %7247 }
 0x794   : > { %v7009_v34 = vpop.f32.mrb[52].mxu0 }
 0x795   : > { %v8269_v35 = vpop.f32.mrb[53].mxu0  ;;  %v7010_v40 = vadd.f32 %v7645_v30, %v7009_v34 }
 0x797   : > { %v7258_v42 = vsel %vm1332_vm4, %v7010_v40, %v7248_v39 }
 0x79a   : > { %v7158_v56 = vpop.f32.mrb[54].mxu0  ;;  %v7242_v0 = vpop.f32.mrb[52].mxu1 }
 0x79b   : > { %v7159_v32 = vadd.f32 %v7645_v30, %v7158_v56  ;;  %v8287_v36 = vpop.f32.mrb[55].mxu0  ;;  %v7243_v37 = vadd.f32 %v7645_v30, %v7242_v0  ;;  %v8296_v38 = vpop.f32.mrb[53].mxu1 }
 0x79d   : > { %7251 = vrot.lane.b32.xlu1 %v7159_v32, %s8939_s2  ;;  %7255 = vrot.lane.b32.xlu0 %v7243_v37, %s8946_s3  ;;  %s8947_s2 = smov [#allocation19]  }
 0x79e   : > { %s8828_s0 = sshll.u32 %s8947_s2, 4  ;;  %s8829_s0 = int_to_ptr.vmem [resolvable:$false] %s8828_s0 }
 0x79f   : > { %s8830_s26 = scalar_lea.vmem %s8829_s0, 256  ;;  %p8831_p11 = scmp.lt.s32.totalorder %s10204_s11, %s8829_s0 }
 0x7a0   : > { %p8832_p0 = scmp.lt.s32.totalorder %s8830_s26, %s8824_s12 }
 0x7a2   : > { %p8833_p12 = por %p8832_p0, %p8831_p11 }
 0x7a4   : > { %p8834_p13 = pnand %p8833_p12, %p8827_p8 }
 0x80f   : > { %v7252_v41 = vpop.permute.xlu1 %7251  ;;  %v7256_v54 = vpop.permute.xlu0 %7255 }
 0x810   : > { %v7259_v43 = vsel %vm3609_vm5, %v7258_v42, %v7252_v41 }
 0x811   : > { %v7261_v45 = vsel %vm7260_vm13, %v7259_v43, %v7256_v54 }
 0x812   : > { %7263 = vst.msk [vmem:[%s525_s28] sm:$0x1f] %vm7262_vm14, %v7261_v45 }
 0x813   : > { %8837 = shalt.err (!%p8834_p13)
}
 0x814   : > { %s8838_s21 = scalar_lea.hbm %s10202_s4, 128  ;;  %s8842_s25 = scalar_lea.hbm %s10304_s24, 256 }
 0x815   : > { %p8839_p1 = scmp.ne.s32.totalorder %s10202_s4, %s8838_s21  ;;  %p8843_p2 = scmp.lt.u32.totalorder %s10202_s4, %s10304_s24 }
 0x816   : > { %p8844_p4 = scmp.lt.u32.totalorder %s8842_s25, %s8838_s21  ;;  %p8846_p5 = scmp.lt.u32.totalorder %s8838_s21, %s10202_s4 }
 0x817   : > { %p8840_p3 = pnand %p8839_p1, %p10305_p7 }
 0x818   : > { %p8845_p10 = por %p8844_p4, %p8843_p2 }
 0x819   : > { %p8841_p6 = pneg %p8840_p3 }
 0x81a   : > { %p8847_p9 = por %p8846_p5, %p8845_p10 }
 0x81c   : > { %p8848_p8 = pnand %p8847_p9, %p8841_p6 }
 0x81e   : > { %8851 = shalt.err (!%p8848_p8)
}
 0x81f   : > { %8415 = dma.vmem_to_hbm [thread:$0]  (%p10305_p7), %s10204_s11, 128, %s10202_s4, %s7265_s19  }
 0x820 PF: > { %s7290_s20 = sand.u32 1, %s8902_s13   ;;  %p10306_p11 = scmp.ne.s32.totalorder %s10287_s10, 0 }
 0x821   : > { %p10307_p0 = scmp.ge.s32.totalorder %s8914_s16, 2  ;;  %s7291_s28 = scalar_lea.sflag [#allocation4], %s7290_s20 }
 0x823   : > { %p8450_p12 = pnand %p10307_p0, %p10306_p11 }
 0x825   : > { %8897 = dma.done.wait (!%p8450_p12), %s7291_s28, 128  }
 0x826   : > { %8899 = vsyncadd (!%p8450_p12), %s7291_s28, 4294967168  ;;  %p30_p13 = scmp.ge.s32.totalorder %s9229_s23, 4   ;;  %s10308_s13 = smov %s8906_s14 }
 0x827   : > { %s10309_s14 = smov %s8910_s15  ;;  %s10310_s15 = smov %s9240_s17 }
 0x828   : > { %s10311_s16 = smov %s9229_s23  ;;  %32 = sbr.rel (!%p30_p13) target bundleno = 18 (0x12), region = 150 }
 0x82f   :  { %7296 = vsyncpa [#allocation3], 1 }
 0x830   :  { %7298 = vsyncpa [#allocation3 + $0x1], 1 }
 0x831   :  { %7299 = vsyncpa [#allocation6], 1 }
 0x832   :  { %7301 = vsyncpa [#allocation6 + $0x1], 1 }
 0x833   :  { %7302 = vsyncpa [#allocation9], 1 }
 0x834   :  { %7303 = vsyncpa [#allocation12], 1 }
 0x835   :  { %7304 = vsyncpa [#allocation15], 1 }
 0x836   :  { %7305 = vsyncpa [#allocation18], 1 }
 0x837   :  { %7306 = vsyncpa [#allocation4], 1 }
 0x838   :  { %7308 = vsyncpa [#allocation4 + $0x1], 1 }

</bundles_post_ra>
